<compile_context>
chip_gen: v6e
topology: v6e:2x2x1
jax: 0.10.0
libtpu: 0.0.40
codegen_flags: <defaults>
</compile_context>

<pallas_src>
import functools

import jax
import jax.numpy as jnp
from jax import lax
from jax.experimental import pallas as pl
from jax.experimental.pallas import tpu as pltpu


# ----------------------------- model config --------------------------------
# Small ViT config (synthetic stand-in for google/vit-base-patch16-224-in21k).
BATCH = 2
CHANNELS = 4
IMG = 16
PATCH = 4
HIDDEN = 32
HEADS = 2
LAYERS = 2
INTERMEDIATE = 64
NUM_CLASSES = 10

LN_EPS = 1e-12
ATTN_SCALE = float((HIDDEN // HEADS) ** -0.5)  # static python float


def _round_up(x, m):
    return (x + m - 1) // m * m


# ----------------------------- fused kernel --------------------------------
def _vit_forward_kernel(
    # inputs (whole arrays, VMEM-resident)
    patches_ref, patch_w_ref, tok_ref, mask_ref,
    ln1_g_ref, ln1_b_ref, wqkv_ref, bqkv_ref, wo_ref, bo_ref,
    ln2_g_ref, ln2_b_ref, wi_ref, bi_ref, wo2_ref, bo2_ref,
    lnf_g_ref, lnf_b_ref, pool_w_ref, pool_b_ref, cls_w_ref, cls_b_ref,
    # output
    out_ref,
    # scratch
    x_scr,
    *, num_layers, batch, seq_pad, hidden, heads, scale, eps,
):
    f32 = jnp.float32
    dh = hidden // heads

    def layer_norm(v, g, b):
        # single-pass: var = E[x^2] - mu^2 (clamped for numerical safety)
        mu = jnp.mean(v, axis=-1, keepdims=True)
        var = jnp.maximum(jnp.mean(v * v, axis=-1, keepdims=True) - mu * mu, 0.0)
        return (v - mu) * lax.rsqrt(var + eps) * g + b

    # Patch embedding; CLS token / position embedding / conv bias are pre-folded
    # into tok_ref (zero rows where padded), so one matmul + add builds x0.
    x_scr[...] = (
        jnp.dot(patches_ref[...], patch_w_ref[...], preferred_element_type=f32)
        + tok_ref[...]
    )

    mask = mask_ref[...]  # [Mp, Mp] block-diagonal additive mask (0 / -1e30)

    for l in range(num_layers):
        # ---- self-attention block (pre-norm), batched across images ----
        xv = x_scr[...]
        h = layer_norm(xv, ln1_g_ref[l], ln1_b_ref[l])
        qkv = jnp.dot(h, wqkv_ref[l], preferred_element_type=f32) + bqkv_ref[l]
        heads_out = []
        for hd in range(heads):                     # static unroll (H=2)
            c0 = hd * dh                            # heads = contiguous lane chunks
            q = qkv[:, c0:c0 + dh]
            k = qkv[:, hidden + c0:hidden + c0 + dh]
            v = qkv[:, 2 * hidden + c0:2 * hidden + c0 + dh]
            s = lax.dot_general(q, k, (((1,), (1,)), ((), ())),
                                preferred_element_type=f32) * scale + mask
            m = jnp.max(s, axis=-1, keepdims=True)
            p = jnp.exp(s - m)
            p = p * pl.reciprocal(jnp.sum(p, axis=-1, keepdims=True), approx=True)
            heads_out.append(jnp.dot(p, v, preferred_element_type=f32))  # [Mp, dh]
        o = jnp.concatenate(heads_out, axis=-1)                          # [Mp, hidden]
        proj = jnp.dot(o, wo_ref[l], preferred_element_type=f32)         # one matmul
        x_scr[...] = xv + proj + bo_ref[l]          # full, aligned 48-row store

        # ---- MLP block (pre-norm, tanh-approximate GELU on the EUP) ----
        xv = x_scr[...]
        h2 = layer_norm(xv, ln2_g_ref[l], ln2_b_ref[l])
        mid = jax.nn.gelu(
            jnp.dot(h2, wi_ref[l], preferred_element_type=f32) + bi_ref[l],
            approximate=True,
        )
        x_scr[...] = (
            xv + jnp.dot(mid, wo2_ref[l], preferred_element_type=f32) + bo2_ref[l]
        )

    # ---- epilogue: layernorm + tanh pooler + classifier on CLS rows only ----
    cls_rows = x_scr[pl.ds(0, batch, stride=seq_pad), :]     # strided gather, 1 op
    c = layer_norm(cls_rows, lnf_g_ref[...], lnf_b_ref[...])
    pooled = jnp.tanh(
        jnp.dot(c, pool_w_ref[...], preferred_element_type=f32) + pool_b_ref[...])
    logits = (jnp.dot(pooled, cls_w_ref[...], preferred_element_type=f32)
              + cls_b_ref[...])
    out_ref[...] = logits.astype(out_ref.dtype)


# ----------------------------- wrapper --------------------------------------
def custom_vit_forward(images, params):
    """images: [B, C, H, W] (NCHW) float32 -> logits [B, NUM_CLASSES]."""
    B, C, Himg, Wimg = images.shape
    P = PATCH
    nh, nw = Himg // P, Wimg // P
    n_patches = nh * nw
    S = n_patches + 1
    S_pad = _round_up(S, 8)                 # 24: per-batch rows sublane-aligned
    Mp = B * S_pad
    cpp = C * P * P

    # Patch extraction in PyTorch Conv2d flattening order (channel-major patch).
    patches = (
        images.reshape(B, C, nh, P, nw, P)
        .transpose(0, 2, 4, 1, 3, 5)
        .reshape(B, n_patches, cpp)
        .astype(jnp.float32)
    )
    # Row layout per batch: [CLS, patch_0..patch_15, pad...]; CLS/pad rows are 0
    # so the single patch-embed matmul inside the kernel leaves them untouched.
    patches_pad = jnp.zeros((B, S_pad, cpp), jnp.float32).at[:, 1:S, :].set(patches)
    patches_pad = patches_pad.reshape(Mp, cpp)

    # Token bias: CLS row gets cls+pos[0]; patch rows get conv bias + pos[1:].
    pos = params["pos"][0]                  # [S, HIDDEN]
    cls = params["cls"][0, 0]               # [HIDDEN]
    tok = jnp.zeros((B, S_pad, HIDDEN), jnp.float32)
    tok = tok.at[:, 0, :].set(cls + pos[0])
    tok = tok.at[:, 1:S, :].set(pos[1:] + params["patch_b"])
    tok = tok.reshape(Mp, HIDDEN)

    # Block-diagonal additive attention mask: key column j is attendable from
    # query row i iff same image AND j is a valid (non-pad) token row.
    row_batch = jnp.repeat(jnp.arange(B), S_pad)          # [Mp]
    col_in_image = jnp.tile(jnp.arange(S_pad), B)         # [Mp]
    valid_key = col_in_image < S
    same_batch = row_batch[:, None] == row_batch[None, :]
    attn_mask = jnp.where(same_batch & valid_key[None, :], 0.0, -1e30
                          ).astype(jnp.float32)           # [Mp, Mp]

    # Stack per-layer weights; fuse Q/K/V into one [HIDDEN, 3*HIDDEN] weight.
    L = len(params["layers"])

    def stack(name):
        return jnp.stack([lyr[name] for lyr in params["layers"]], axis=0)

    ln1_g = stack("ln1_g").reshape(L, 1, HIDDEN)
    ln1_b = stack("ln1_b").reshape(L, 1, HIDDEN)
    wqkv = jnp.concatenate([stack("wq"), stack("wk"), stack("wv")], axis=-1)
    bqkv = jnp.concatenate([stack("bq"), stack("bk"), stack("bv")],
                           axis=-1).reshape(L, 1, 3 * HIDDEN)
    wo = stack("wo")
    bo = stack("bo").reshape(L, 1, HIDDEN)
    ln2_g = stack("ln2_g").reshape(L, 1, HIDDEN)
    ln2_b = stack("ln2_b").reshape(L, 1, HIDDEN)
    wi = stack("wi")
    bi = stack("bi").reshape(L, 1, INTERMEDIATE)
    wo2 = stack("wo2")
    bo2 = stack("bo2").reshape(L, 1, HIDDEN)

    lnf_g = params["lnf_g"].reshape(1, HIDDEN)
    lnf_b = params["lnf_b"].reshape(1, HIDDEN)
    pool_w = params["pool_w"]
    pool_b = params["pool_b"].reshape(1, HIDDEN)

    # Lane-dense classifier: pad NUM_CLASSES -> 128.
    ncp = 128
    cls_w = jnp.zeros((HIDDEN, ncp), jnp.float32).at[:, :NUM_CLASSES].set(
        params["cls_w"])
    cls_b = jnp.zeros((1, ncp), jnp.float32).at[0, :NUM_CLASSES].set(
        params["cls_b"])

    kernel = functools.partial(
        _vit_forward_kernel,
        num_layers=L, batch=B, seq_pad=S_pad,
        hidden=HIDDEN, heads=HEADS,
        scale=ATTN_SCALE, eps=LN_EPS,
    )

    logits_pad = pl.pallas_call(
        kernel,
        out_shape=jax.ShapeDtypeStruct((B, ncp), jnp.float32),
        scratch_shapes=[
            pltpu.VMEM((Mp, HIDDEN), jnp.float32),   # resident activations
        ],
    )(
        patches_pad, params["patch_w"], tok, attn_mask,
        ln1_g, ln1_b, wqkv, bqkv, wo, bo,
        ln2_g, ln2_b, wi, bi, wo2, bo2,
        lnf_g, lnf_b, pool_w, pool_b, cls_w, cls_b,
    )
    return logits_pad[:, :NUM_CLASSES]


# ----------------------------- params ---------------------------------------
def init_params(key):
    def normal(k, shape, scale=0.02):
        return (scale * jax.random.normal(k, shape)).astype(jnp.float32)

    keys = iter(jax.random.split(key, 128))
    num_patches = (IMG // PATCH) ** 2
    params = {
        "patch_w": normal(next(keys), (CHANNELS * PATCH * PATCH, HIDDEN)),
        "patch_b": jnp.zeros((HIDDEN,), jnp.float32),
        "cls": normal(next(keys), (1, 1, HIDDEN)),
        "pos": normal(next(keys), (1, 1 + num_patches, HIDDEN)),
        "lnf_g": jnp.ones((HIDDEN,), jnp.float32),
        "lnf_b": jnp.zeros((HIDDEN,), jnp.float32),
        "pool_w": normal(next(keys), (HIDDEN, HIDDEN)),
        "pool_b": jnp.zeros((HIDDEN,), jnp.float32),
        "cls_w": normal(next(keys), (HIDDEN, NUM_CLASSES)),
        "cls_b": jnp.zeros((NUM_CLASSES,), jnp.float32),
        "layers": [],
    }
    for _ in range(LAYERS):
        layer = {
            "ln1_g": jnp.ones((HIDDEN,), jnp.float32),
            "ln1_b": jnp.zeros((HIDDEN,), jnp.float32),
            "wq": normal(next(keys), (HIDDEN, HIDDEN)),
            "bq": jnp.zeros((HIDDEN,), jnp.float32),
            "wk": normal(next(keys), (HIDDEN, HIDDEN)),
            "bk": jnp.zeros((HIDDEN,), jnp.float32),
            "wv": normal(next(keys), (HIDDEN, HIDDEN)),
            "bv": jnp.zeros((HIDDEN,), jnp.float32),
            "wo": normal(next(keys), (HIDDEN, HIDDEN)),
            "bo": jnp.zeros((HIDDEN,), jnp.float32),
            "ln2_g": jnp.ones((HIDDEN,), jnp.float32),
            "ln2_b": jnp.zeros((HIDDEN,), jnp.float32),
            "wi": normal(next(keys), (HIDDEN, INTERMEDIATE)),
            "bi": jnp.zeros((INTERMEDIATE,), jnp.float32),
            "wo2": normal(next(keys), (INTERMEDIATE, HIDDEN)),
            "bo2": jnp.zeros((HIDDEN,), jnp.float32),
        }
        params["layers"].append(layer)
    return params


if __name__ == "__main__":
    key = jax.random.PRNGKey(0)
    k_img, k_params = jax.random.split(key)
    images = jax.random.normal(k_img, (BATCH, CHANNELS, IMG, IMG), dtype=jnp.float32)
    params = init_params(k_params)

    forward = jax.jit(custom_vit_forward)
    logits = forward(images, params)
    jax.block_until_ready(logits)
    assert logits.shape == (BATCH, NUM_CLASSES)
    assert bool(jnp.all(jnp.isfinite(logits)))
    print("KERNEL_OK")
</pallas_src>

<mosaic_0001>
module attributes {stable_mosaic.version = 11 : i64} {
  func.func @_vit_forward_kernel(%arg0: memref<48x64xf32, #tpu.memory_space<vmem>>, %arg1: memref<64x32xf32, #tpu.memory_space<vmem>>, %arg2: memref<48x32xf32, #tpu.memory_space<vmem>>, %arg3: memref<48x48xf32, #tpu.memory_space<vmem>>, %arg4: memref<2x1x32xf32, #tpu.memory_space<vmem>>, %arg5: memref<2x1x32xf32, #tpu.memory_space<vmem>>, %arg6: memref<2x32x96xf32, #tpu.memory_space<vmem>>, %arg7: memref<2x1x96xf32, #tpu.memory_space<vmem>>, %arg8: memref<2x32x32xf32, #tpu.memory_space<vmem>>, %arg9: memref<2x1x32xf32, #tpu.memory_space<vmem>>, %arg10: memref<2x1x32xf32, #tpu.memory_space<vmem>>, %arg11: memref<2x1x32xf32, #tpu.memory_space<vmem>>, %arg12: memref<2x32x64xf32, #tpu.memory_space<vmem>>, %arg13: memref<2x1x64xf32, #tpu.memory_space<vmem>>, %arg14: memref<2x64x32xf32, #tpu.memory_space<vmem>>, %arg15: memref<2x1x32xf32, #tpu.memory_space<vmem>>, %arg16: memref<1x32xf32, #tpu.memory_space<vmem>>, %arg17: memref<1x32xf32, #tpu.memory_space<vmem>>, %arg18: memref<32x32xf32, #tpu.memory_space<vmem>>, %arg19: memref<1x32xf32, #tpu.memory_space<vmem>>, %arg20: memref<32x128xf32, #tpu.memory_space<vmem>>, %arg21: memref<1x128xf32, #tpu.memory_space<vmem>>, %arg22: memref<2x128xf32, #tpu.memory_space<vmem>>, %arg23: memref<48x32xf32, #tpu.memory_space<vmem>>) attributes {dimension_semantics = [], scalar_prefetch = 0 : i64, scratch_operands = 1 : i64, tpu.core_type = #tpu.core_type<tc>} {
    %c0 = arith.constant 0 : index
    %c0_0 = arith.constant 0 : index
    %0 = vector.load %arg0[%c0, %c0_0] : memref<48x64xf32, #tpu.memory_space<vmem>>, vector<48x64xf32>
    %c0_1 = arith.constant 0 : index
    %c0_2 = arith.constant 0 : index
    %1 = vector.load %arg1[%c0_1, %c0_2] : memref<64x32xf32, #tpu.memory_space<vmem>>, vector<64x32xf32>
    %cst = arith.constant dense<0.000000e+00> : vector<48x32xf32>
    %2 = tpu.matmul %0, %1, %cst {dimension_numbers = #tpu.dot_dimension_numbers<[1], [0], [0], [1], [0, 0, 1, 1], [], []>} : vector<48x64xf32>, vector<64x32xf32>, vector<48x32xf32> -> vector<48x32xf32>
    %c0_3 = arith.constant 0 : index
    %c0_4 = arith.constant 0 : index
    %3 = vector.load %arg2[%c0_3, %c0_4] : memref<48x32xf32, #tpu.memory_space<vmem>>, vector<48x32xf32>
    %4 = arith.addf %2, %3 : vector<48x32xf32>
    %c0_5 = arith.constant 0 : index
    %c0_6 = arith.constant 0 : index
    %5 = vector.load %arg23[%c0_5, %c0_6] : memref<48x32xf32, #tpu.memory_space<vmem>>, vector<48x32xf32>
    tpu.vector_store %arg23[%c0_5, %c0_6], %4 {strides = array<i32>} : memref<48x32xf32, #tpu.memory_space<vmem>>, vector<48x32xf32>,
    %c0_7 = arith.constant 0 : index
    %c0_8 = arith.constant 0 : index
    %6 = vector.load %arg3[%c0_7, %c0_8] : memref<48x48xf32, #tpu.memory_space<vmem>>, vector<48x48xf32>
    %c0_9 = arith.constant 0 : index
    %c0_10 = arith.constant 0 : index
    %7 = vector.load %arg23[%c0_9, %c0_10] : memref<48x32xf32, #tpu.memory_space<vmem>>, vector<48x32xf32>
    %c0_11 = arith.constant 0 : index
    %c0_12 = arith.constant 0 : index
    %c0_13 = arith.constant 0 : index
    %8 = vector.load %arg4[%c0_11, %c0_12, %c0_13] : memref<2x1x32xf32, #tpu.memory_space<vmem>>, vector<1x1x32xf32>
    %9 = vector.shape_cast %8 : vector<1x1x32xf32> to vector<1x32xf32>
    %c0_14 = arith.constant 0 : index
    %c0_15 = arith.constant 0 : index
    %c0_16 = arith.constant 0 : index
    %10 = vector.load %arg5[%c0_14, %c0_15, %c0_16] : memref<2x1x32xf32, #tpu.memory_space<vmem>>, vector<1x1x32xf32>
    %11 = vector.shape_cast %10 : vector<1x1x32xf32> to vector<1x32xf32>
    %cst_17 = arith.constant dense<0.000000e+00> : vector<48xf32>
    %12 = vector.multi_reduction <add>, %7, %cst_17 [1] : vector<48x32xf32> to vector<48xf32>
    %13 = vector.shape_cast %12 : vector<48xf32> to vector<48x1xf32>
    %cst_18 = arith.constant 3.200000e+01 : f32
    %14 = vector.broadcast %cst_18 : f32 to vector<48x1xf32>
    %15 = arith.divf %13, %14 : vector<48x1xf32>
    %16 = arith.mulf %7, %7 : vector<48x32xf32>
    %cst_19 = arith.constant dense<0.000000e+00> : vector<48xf32>
    %17 = vector.multi_reduction <add>, %16, %cst_19 [1] : vector<48x32xf32> to vector<48xf32>
    %18 = vector.shape_cast %17 : vector<48xf32> to vector<48x1xf32>
    %cst_20 = arith.constant 3.200000e+01 : f32
    %19 = vector.broadcast %cst_20 : f32 to vector<48x1xf32>
    %20 = arith.divf %18, %19 : vector<48x1xf32>
    %21 = arith.mulf %15, %15 : vector<48x1xf32>
    %22 = arith.subf %20, %21 : vector<48x1xf32>
    %cst_21 = arith.constant 0.000000e+00 : f32
    %23 = vector.broadcast %cst_21 : f32 to vector<48x1xf32>
    %24 = arith.maximumf %22, %23 : vector<48x1xf32>
    %25 = vector.broadcast %15 : vector<48x1xf32> to vector<48x32xf32>
    %26 = arith.subf %7, %25 : vector<48x32xf32>
    %cst_22 = arith.constant 9.99999996E-13 : f32
    %27 = vector.broadcast %cst_22 : f32 to vector<48x1xf32>
    %28 = arith.addf %24, %27 : vector<48x1xf32>
    %29 = math.rsqrt %28 : vector<48x1xf32>
    %30 = vector.broadcast %29 : vector<48x1xf32> to vector<48x32xf32>
    %31 = arith.mulf %26, %30 : vector<48x32xf32>
    %32 = vector.broadcast %9 : vector<1x32xf32> to vector<48x32xf32>
    %33 = arith.mulf %31, %32 : vector<48x32xf32>
    %34 = vector.broadcast %11 : vector<1x32xf32> to vector<48x32xf32>
    %35 = arith.addf %33, %34 : vector<48x32xf32>
    %c0_23 = arith.constant 0 : index
    %c0_24 = arith.constant 0 : index
    %c0_25 = arith.constant 0 : index
    %36 = vector.load %arg6[%c0_23, %c0_24, %c0_25] : memref<2x32x96xf32, #tpu.memory_space<vmem>>, vector<1x32x96xf32>
    %37 = vector.shape_cast %36 : vector<1x32x96xf32> to vector<32x96xf32>
    %cst_26 = arith.constant dense<0.000000e+00> : vector<48x96xf32>
    %38 = tpu.matmul %35, %37, %cst_26 {dimension_numbers = #tpu.dot_dimension_numbers<[1], [0], [0], [1], [0, 0, 1, 1], [], []>} : vector<48x32xf32>, vector<32x96xf32>, vector<48x96xf32> -> vector<48x96xf32>
    %c0_27 = arith.constant 0 : index
    %c0_28 = arith.constant 0 : index
    %c0_29 = arith.constant 0 : index
    %39 = vector.load %arg7[%c0_27, %c0_28, %c0_29] : memref<2x1x96xf32, #tpu.memory_space<vmem>>, vector<1x1x96xf32>
    %40 = vector.shape_cast %39 : vector<1x1x96xf32> to vector<1x96xf32>
    %41 = vector.broadcast %40 : vector<1x96xf32> to vector<48x96xf32>
    %42 = arith.addf %38, %41 : vector<48x96xf32>
    %43 = vector.extract_strided_slice %42 {offsets = [0, 0], sizes = [48, 16], strides = [1, 1]} : vector<48x96xf32> to vector<48x16xf32>
    %44 = vector.extract_strided_slice %42 {offsets = [0, 32], sizes = [48, 16], strides = [1, 1]} : vector<48x96xf32> to vector<48x16xf32>
    %45 = vector.extract_strided_slice %42 {offsets = [0, 64], sizes = [48, 16], strides = [1, 1]} : vector<48x96xf32> to vector<48x16xf32>
    %cst_30 = arith.constant dense<0.000000e+00> : vector<48x48xf32>
    %46 = tpu.matmul %43, %44, %cst_30 {dimension_numbers = #tpu.dot_dimension_numbers<[1], [1], [0], [0], [0, 0, 1, 0], [], []>} : vector<48x16xf32>, vector<48x16xf32>, vector<48x48xf32> -> vector<48x48xf32>
    %cst_31 = arith.constant 2.500000e-01 : f32
    %47 = vector.broadcast %cst_31 : f32 to vector<48x48xf32>
    %48 = arith.mulf %46, %47 : vector<48x48xf32>
    %49 = arith.addf %48, %6 : vector<48x48xf32>
    %cst_32 = arith.constant dense<0xFF800000> : vector<48xf32>
    %50 = vector.multi_reduction <maximumf>, %49, %cst_32 [1] : vector<48x48xf32> to vector<48xf32>
    %51 = vector.shape_cast %50 : vector<48xf32> to vector<48x1xf32>
    %52 = vector.broadcast %51 : vector<48x1xf32> to vector<48x48xf32>
    %53 = arith.subf %49, %52 : vector<48x48xf32>
    %54 = math.exp %53 : vector<48x48xf32>
    %cst_33 = arith.constant dense<0.000000e+00> : vector<48xf32>
    %55 = vector.multi_reduction <add>, %54, %cst_33 [1] : vector<48x48xf32> to vector<48xf32>
    %56 = vector.shape_cast %55 : vector<48xf32> to vector<48x1xf32>
    %57 = tpu.reciprocal %56 {approx = true} : vector<48x1xf32> -> vector<48x1xf32>
    %58 = vector.broadcast %57 : vector<48x1xf32> to vector<48x48xf32>
    %59 = arith.mulf %54, %58 : vector<48x48xf32>
    %cst_34 = arith.constant dense<0.000000e+00> : vector<48x16xf32>
    %60 = tpu.matmul %59, %45, %cst_34 {dimension_numbers = #tpu.dot_dimension_numbers<[1], [0], [0], [1], [0, 0, 1, 1], [], []>} : vector<48x48xf32>, vector<48x16xf32>, vector<48x16xf32> -> vector<48x16xf32>
    %61 = vector.extract_strided_slice %42 {offsets = [0, 16], sizes = [48, 16], strides = [1, 1]} : vector<48x96xf32> to vector<48x16xf32>
    %62 = vector.extract_strided_slice %42 {offsets = [0, 48], sizes = [48, 16], strides = [1, 1]} : vector<48x96xf32> to vector<48x16xf32>
    %63 = vector.extract_strided_slice %42 {offsets = [0, 80], sizes = [48, 16], strides = [1, 1]} : vector<48x96xf32> to vector<48x16xf32>
    %cst_35 = arith.constant dense<0.000000e+00> : vector<48x48xf32>
    %64 = tpu.matmul %61, %62, %cst_35 {dimension_numbers = #tpu.dot_dimension_numbers<[1], [1], [0], [0], [0, 0, 1, 0], [], []>} : vector<48x16xf32>, vector<48x16xf32>, vector<48x48xf32> -> vector<48x48xf32>
    %cst_36 = arith.constant 2.500000e-01 : f32
    %65 = vector.broadcast %cst_36 : f32 to vector<48x48xf32>
    %66 = arith.mulf %64, %65 : vector<48x48xf32>
    %67 = arith.addf %66, %6 : vector<48x48xf32>
    %cst_37 = arith.constant dense<0xFF800000> : vector<48xf32>
    %68 = vector.multi_reduction <maximumf>, %67, %cst_37 [1] : vector<48x48xf32> to vector<48xf32>
    %69 = vector.shape_cast %68 : vector<48xf32> to vector<48x1xf32>
    %70 = vector.broadcast %69 : vector<48x1xf32> to vector<48x48xf32>
    %71 = arith.subf %67, %70 : vector<48x48xf32>
    %72 = math.exp %71 : vector<48x48xf32>
    %cst_38 = arith.constant dense<0.000000e+00> : vector<48xf32>
    %73 = vector.multi_reduction <add>, %72, %cst_38 [1] : vector<48x48xf32> to vector<48xf32>
    %74 = vector.shape_cast %73 : vector<48xf32> to vector<48x1xf32>
    %75 = tpu.reciprocal %74 {approx = true} : vector<48x1xf32> -> vector<48x1xf32>
    %76 = vector.broadcast %75 : vector<48x1xf32> to vector<48x48xf32>
    %77 = arith.mulf %72, %76 : vector<48x48xf32>
    %cst_39 = arith.constant dense<0.000000e+00> : vector<48x16xf32>
    %78 = tpu.matmul %77, %63, %cst_39 {dimension_numbers = #tpu.dot_dimension_numbers<[1], [0], [0], [1], [0, 0, 1, 1], [], []>} : vector<48x48xf32>, vector<48x16xf32>, vector<48x16xf32> -> vector<48x16xf32>
    %79 = tpu.concatenate %60, %78 in 1 : vector<48x16xf32>, vector<48x16xf32> -> vector<48x32xf32>
    %c0_40 = arith.constant 0 : index
    %c0_41 = arith.constant 0 : index
    %c0_42 = arith.constant 0 : index
    %80 = vector.load %arg8[%c0_40, %c0_41, %c0_42] : memref<2x32x32xf32, #tpu.memory_space<vmem>>, vector<1x32x32xf32>
    %81 = vector.shape_cast %80 : vector<1x32x32xf32> to vector<32x32xf32>
    %cst_43 = arith.constant dense<0.000000e+00> : vector<48x32xf32>
    %82 = tpu.matmul %79, %81, %cst_43 {dimension_numbers = #tpu.dot_dimension_numbers<[1], [0], [0], [1], [0, 0, 1, 1], [], []>} : vector<48x32xf32>, vector<32x32xf32>, vector<48x32xf32> -> vector<48x32xf32>
    %83 = arith.addf %7, %82 : vector<48x32xf32>
    %c0_44 = arith.constant 0 : index
    %c0_45 = arith.constant 0 : index
    %c0_46 = arith.constant 0 : index
    %84 = vector.load %arg9[%c0_44, %c0_45, %c0_46] : memref<2x1x32xf32, #tpu.memory_space<vmem>>, vector<1x1x32xf32>
    %85 = vector.shape_cast %84 : vector<1x1x32xf32> to vector<1x32xf32>
    %86 = vector.broadcast %85 : vector<1x32xf32> to vector<48x32xf32>
    %87 = arith.addf %83, %86 : vector<48x32xf32>
    %c0_47 = arith.constant 0 : index
    %c0_48 = arith.constant 0 : index
    %88 = vector.load %arg23[%c0_47, %c0_48] : memref<48x32xf32, #tpu.memory_space<vmem>>, vector<48x32xf32>
    tpu.vector_store %arg23[%c0_47, %c0_48], %87 {strides = array<i32>} : memref<48x32xf32, #tpu.memory_space<vmem>>, vector<48x32xf32>,
    %c0_49 = arith.constant 0 : index
    %c0_50 = arith.constant 0 : index
    %89 = vector.load %arg23[%c0_49, %c0_50] : memref<48x32xf32, #tpu.memory_space<vmem>>, vector<48x32xf32>
    %c0_51 = arith.constant 0 : index
    %c0_52 = arith.constant 0 : index
    %c0_53 = arith.constant 0 : index
    %90 = vector.load %arg10[%c0_51, %c0_52, %c0_53] : memref<2x1x32xf32, #tpu.memory_space<vmem>>, vector<1x1x32xf32>
    %91 = vector.shape_cast %90 : vector<1x1x32xf32> to vector<1x32xf32>
    %c0_54 = arith.constant 0 : index
    %c0_55 = arith.constant 0 : index
    %c0_56 = arith.constant 0 : index
    %92 = vector.load %arg11[%c0_54, %c0_55, %c0_56] : memref<2x1x32xf32, #tpu.memory_space<vmem>>, vector<1x1x32xf32>
    %93 = vector.shape_cast %92 : vector<1x1x32xf32> to vector<1x32xf32>
    %cst_57 = arith.constant dense<0.000000e+00> : vector<48xf32>
    %94 = vector.multi_reduction <add>, %89, %cst_57 [1] : vector<48x32xf32> to vector<48xf32>
    %95 = vector.shape_cast %94 : vector<48xf32> to vector<48x1xf32>
    %cst_58 = arith.constant 3.200000e+01 : f32
    %96 = vector.broadcast %cst_58 : f32 to vector<48x1xf32>
    %97 = arith.divf %95, %96 : vector<48x1xf32>
    %98 = arith.mulf %89, %89 : vector<48x32xf32>
    %cst_59 = arith.constant dense<0.000000e+00> : vector<48xf32>
    %99 = vector.multi_reduction <add>, %98, %cst_59 [1] : vector<48x32xf32> to vector<48xf32>
    %100 = vector.shape_cast %99 : vector<48xf32> to vector<48x1xf32>
    %cst_60 = arith.constant 3.200000e+01 : f32
    %101 = vector.broadcast %cst_60 : f32 to vector<48x1xf32>
    %102 = arith.divf %100, %101 : vector<48x1xf32>
    %103 = arith.mulf %97, %97 : vector<48x1xf32>
    %104 = arith.subf %102, %103 : vector<48x1xf32>
    %cst_61 = arith.constant 0.000000e+00 : f32
    %105 = vector.broadcast %cst_61 : f32 to vector<48x1xf32>
    %106 = arith.maximumf %104, %105 : vector<48x1xf32>
    %107 = vector.broadcast %97 : vector<48x1xf32> to vector<48x32xf32>
    %108 = arith.subf %89, %107 : vector<48x32xf32>
    %cst_62 = arith.constant 9.99999996E-13 : f32
    %109 = vector.broadcast %cst_62 : f32 to vector<48x1xf32>
    %110 = arith.addf %106, %109 : vector<48x1xf32>
    %111 = math.rsqrt %110 : vector<48x1xf32>
    %112 = vector.broadcast %111 : vector<48x1xf32> to vector<48x32xf32>
    %113 = arith.mulf %108, %112 : vector<48x32xf32>
    %114 = vector.broadcast %91 : vector<1x32xf32> to vector<48x32xf32>
    %115 = arith.mulf %113, %114 : vector<48x32xf32>
    %116 = vector.broadcast %93 : vector<1x32xf32> to vector<48x32xf32>
    %117 = arith.addf %115, %116 : vector<48x32xf32>
    %c0_63 = arith.constant 0 : index
    %c0_64 = arith.constant 0 : index
    %c0_65 = arith.constant 0 : index
    %118 = vector.load %arg12[%c0_63, %c0_64, %c0_65] : memref<2x32x64xf32, #tpu.memory_space<vmem>>, vector<1x32x64xf32>
    %119 = vector.shape_cast %118 : vector<1x32x64xf32> to vector<32x64xf32>
    %cst_66 = arith.constant dense<0.000000e+00> : vector<48x64xf32>
    %120 = tpu.matmul %117, %119, %cst_66 {dimension_numbers = #tpu.dot_dimension_numbers<[1], [0], [0], [1], [0, 0, 1, 1], [], []>} : vector<48x32xf32>, vector<32x64xf32>, vector<48x64xf32> -> vector<48x64xf32>
    %c0_67 = arith.constant 0 : index
    %c0_68 = arith.constant 0 : index
    %c0_69 = arith.constant 0 : index
    %121 = vector.load %arg13[%c0_67, %c0_68, %c0_69] : memref<2x1x64xf32, #tpu.memory_space<vmem>>, vector<1x1x64xf32>
    %122 = vector.shape_cast %121 : vector<1x1x64xf32> to vector<1x64xf32>
    %123 = vector.broadcast %122 : vector<1x64xf32> to vector<48x64xf32>
    %124 = arith.addf %120, %123 : vector<48x64xf32>
    %125 = arith.mulf %124, %124 : vector<48x64xf32>
    %126 = arith.mulf %124, %125 : vector<48x64xf32>
    %cst_70 = arith.constant 4.471500e-02 : f32
    %127 = vector.broadcast %cst_70 : f32 to vector<48x64xf32>
    %128 = arith.mulf %127, %126 : vector<48x64xf32>
    %129 = arith.addf %124, %128 : vector<48x64xf32>
    %cst_71 = arith.constant 0.797884583 : f32
    %130 = vector.broadcast %cst_71 : f32 to vector<48x64xf32>
    %131 = arith.mulf %130, %129 : vector<48x64xf32>
    %132 = math.tanh %131 : vector<48x64xf32>
    %cst_72 = arith.constant 1.000000e+00 : f32
    %133 = vector.broadcast %cst_72 : f32 to vector<48x64xf32>
    %134 = arith.addf %133, %132 : vector<48x64xf32>
    %cst_73 = arith.constant 5.000000e-01 : f32
    %135 = vector.broadcast %cst_73 : f32 to vector<48x64xf32>
    %136 = arith.mulf %135, %134 : vector<48x64xf32>
    %137 = arith.mulf %124, %136 : vector<48x64xf32>
    %c0_74 = arith.constant 0 : index
    %c0_75 = arith.constant 0 : index
    %c0_76 = arith.constant 0 : index
    %138 = vector.load %arg14[%c0_74, %c0_75, %c0_76] : memref<2x64x32xf32, #tpu.memory_space<vmem>>, vector<1x64x32xf32>
    %139 = vector.shape_cast %138 : vector<1x64x32xf32> to vector<64x32xf32>
    %cst_77 = arith.constant dense<0.000000e+00> : vector<48x32xf32>
    %140 = tpu.matmul %137, %139, %cst_77 {dimension_numbers = #tpu.dot_dimension_numbers<[1], [0], [0], [1], [0, 0, 1, 1], [], []>} : vector<48x64xf32>, vector<64x32xf32>, vector<48x32xf32> -> vector<48x32xf32>
    %141 = arith.addf %89, %140 : vector<48x32xf32>
    %c0_78 = arith.constant 0 : index
    %c0_79 = arith.constant 0 : index
    %c0_80 = arith.constant 0 : index
    %142 = vector.load %arg15[%c0_78, %c0_79, %c0_80] : memref<2x1x32xf32, #tpu.memory_space<vmem>>, vector<1x1x32xf32>
    %143 = vector.shape_cast %142 : vector<1x1x32xf32> to vector<1x32xf32>
    %144 = vector.broadcast %143 : vector<1x32xf32> to vector<48x32xf32>
    %145 = arith.addf %141, %144 : vector<48x32xf32>
    %c0_81 = arith.constant 0 : index
    %c0_82 = arith.constant 0 : index
    %146 = vector.load %arg23[%c0_81, %c0_82] : memref<48x32xf32, #tpu.memory_space<vmem>>, vector<48x32xf32>
    tpu.vector_store %arg23[%c0_81, %c0_82], %145 {strides = array<i32>} : memref<48x32xf32, #tpu.memory_space<vmem>>, vector<48x32xf32>,
    %c0_83 = arith.constant 0 : index
    %c0_84 = arith.constant 0 : index
    %147 = vector.load %arg23[%c0_83, %c0_84] : memref<48x32xf32, #tpu.memory_space<vmem>>, vector<48x32xf32>
    %c1 = arith.constant 1 : index
    %c0_85 = arith.constant 0 : index
    %c0_86 = arith.constant 0 : index
    %148 = vector.load %arg4[%c1, %c0_85, %c0_86] : memref<2x1x32xf32, #tpu.memory_space<vmem>>, vector<1x1x32xf32>
    %149 = vector.shape_cast %148 : vector<1x1x32xf32> to vector<1x32xf32>
    %c1_87 = arith.constant 1 : index
    %c0_88 = arith.constant 0 : index
    %c0_89 = arith.constant 0 : index
    %150 = vector.load %arg5[%c1_87, %c0_88, %c0_89] : memref<2x1x32xf32, #tpu.memory_space<vmem>>, vector<1x1x32xf32>
    %151 = vector.shape_cast %150 : vector<1x1x32xf32> to vector<1x32xf32>
    %cst_90 = arith.constant dense<0.000000e+00> : vector<48xf32>
    %152 = vector.multi_reduction <add>, %147, %cst_90 [1] : vector<48x32xf32> to vector<48xf32>
    %153 = vector.shape_cast %152 : vector<48xf32> to vector<48x1xf32>
    %cst_91 = arith.constant 3.200000e+01 : f32
    %154 = vector.broadcast %cst_91 : f32 to vector<48x1xf32>
    %155 = arith.divf %153, %154 : vector<48x1xf32>
    %156 = arith.mulf %147, %147 : vector<48x32xf32>
    %cst_92 = arith.constant dense<0.000000e+00> : vector<48xf32>
    %157 = vector.multi_reduction <add>, %156, %cst_92 [1] : vector<48x32xf32> to vector<48xf32>
    %158 = vector.shape_cast %157 : vector<48xf32> to vector<48x1xf32>
    %cst_93 = arith.constant 3.200000e+01 : f32
    %159 = vector.broadcast %cst_93 : f32 to vector<48x1xf32>
    %160 = arith.divf %158, %159 : vector<48x1xf32>
    %161 = arith.mulf %155, %155 : vector<48x1xf32>
    %162 = arith.subf %160, %161 : vector<48x1xf32>
    %cst_94 = arith.constant 0.000000e+00 : f32
    %163 = vector.broadcast %cst_94 : f32 to vector<48x1xf32>
    %164 = arith.maximumf %162, %163 : vector<48x1xf32>
    %165 = vector.broadcast %155 : vector<48x1xf32> to vector<48x32xf32>
    %166 = arith.subf %147, %165 : vector<48x32xf32>
    %cst_95 = arith.constant 9.99999996E-13 : f32
    %167 = vector.broadcast %cst_95 : f32 to vector<48x1xf32>
    %168 = arith.addf %164, %167 : vector<48x1xf32>
    %169 = math.rsqrt %168 : vector<48x1xf32>
    %170 = vector.broadcast %169 : vector<48x1xf32> to vector<48x32xf32>
    %171 = arith.mulf %166, %170 : vector<48x32xf32>
    %172 = vector.broadcast %149 : vector<1x32xf32> to vector<48x32xf32>
    %173 = arith.mulf %171, %172 : vector<48x32xf32>
    %174 = vector.broadcast %151 : vector<1x32xf32> to vector<48x32xf32>
    %175 = arith.addf %173, %174 : vector<48x32xf32>
    %c1_96 = arith.constant 1 : index
    %c0_97 = arith.constant 0 : index
    %c0_98 = arith.constant 0 : index
    %176 = vector.load %arg6[%c1_96, %c0_97, %c0_98] : memref<2x32x96xf32, #tpu.memory_space<vmem>>, vector<1x32x96xf32>
    %177 = vector.shape_cast %176 : vector<1x32x96xf32> to vector<32x96xf32>
    %cst_99 = arith.constant dense<0.000000e+00> : vector<48x96xf32>
    %178 = tpu.matmul %175, %177, %cst_99 {dimension_numbers = #tpu.dot_dimension_numbers<[1], [0], [0], [1], [0, 0, 1, 1], [], []>} : vector<48x32xf32>, vector<32x96xf32>, vector<48x96xf32> -> vector<48x96xf32>
    %c1_100 = arith.constant 1 : index
    %c0_101 = arith.constant 0 : index
    %c0_102 = arith.constant 0 : index
    %179 = vector.load %arg7[%c1_100, %c0_101, %c0_102] : memref<2x1x96xf32, #tpu.memory_space<vmem>>, vector<1x1x96xf32>
    %180 = vector.shape_cast %179 : vector<1x1x96xf32> to vector<1x96xf32>
    %181 = vector.broadcast %180 : vector<1x96xf32> to vector<48x96xf32>
    %182 = arith.addf %178, %181 : vector<48x96xf32>
    %183 = vector.extract_strided_slice %182 {offsets = [0, 0], sizes = [48, 16], strides = [1, 1]} : vector<48x96xf32> to vector<48x16xf32>
    %184 = vector.extract_strided_slice %182 {offsets = [0, 32], sizes = [48, 16], strides = [1, 1]} : vector<48x96xf32> to vector<48x16xf32>
    %185 = vector.extract_strided_slice %182 {offsets = [0, 64], sizes = [48, 16], strides = [1, 1]} : vector<48x96xf32> to vector<48x16xf32>
    %cst_103 = arith.constant dense<0.000000e+00> : vector<48x48xf32>
    %186 = tpu.matmul %183, %184, %cst_103 {dimension_numbers = #tpu.dot_dimension_numbers<[1], [1], [0], [0], [0, 0, 1, 0], [], []>} : vector<48x16xf32>, vector<48x16xf32>, vector<48x48xf32> -> vector<48x48xf32>
    %cst_104 = arith.constant 2.500000e-01 : f32
    %187 = vector.broadcast %cst_104 : f32 to vector<48x48xf32>
    %188 = arith.mulf %186, %187 : vector<48x48xf32>
    %189 = arith.addf %188, %6 : vector<48x48xf32>
    %cst_105 = arith.constant dense<0xFF800000> : vector<48xf32>
    %190 = vector.multi_reduction <maximumf>, %189, %cst_105 [1] : vector<48x48xf32> to vector<48xf32>
    %191 = vector.shape_cast %190 : vector<48xf32> to vector<48x1xf32>
    %192 = vector.broadcast %191 : vector<48x1xf32> to vector<48x48xf32>
    %193 = arith.subf %189, %192 : vector<48x48xf32>
    %194 = math.exp %193 : vector<48x48xf32>
    %cst_106 = arith.constant dense<0.000000e+00> : vector<48xf32>
    %195 = vector.multi_reduction <add>, %194, %cst_106 [1] : vector<48x48xf32> to vector<48xf32>
    %196 = vector.shape_cast %195 : vector<48xf32> to vector<48x1xf32>
    %197 = tpu.reciprocal %196 {approx = true} : vector<48x1xf32> -> vector<48x1xf32>
    %198 = vector.broadcast %197 : vector<48x1xf32> to vector<48x48xf32>
    %199 = arith.mulf %194, %198 : vector<48x48xf32>
    %cst_107 = arith.constant dense<0.000000e+00> : vector<48x16xf32>
    %200 = tpu.matmul %199, %185, %cst_107 {dimension_numbers = #tpu.dot_dimension_numbers<[1], [0], [0], [1], [0, 0, 1, 1], [], []>} : vector<48x48xf32>, vector<48x16xf32>, vector<48x16xf32> -> vector<48x16xf32>
    %201 = vector.extract_strided_slice %182 {offsets = [0, 16], sizes = [48, 16], strides = [1, 1]} : vector<48x96xf32> to vector<48x16xf32>
    %202 = vector.extract_strided_slice %182 {offsets = [0, 48], sizes = [48, 16], strides = [1, 1]} : vector<48x96xf32> to vector<48x16xf32>
    %203 = vector.extract_strided_slice %182 {offsets = [0, 80], sizes = [48, 16], strides = [1, 1]} : vector<48x96xf32> to vector<48x16xf32>
    %cst_108 = arith.constant dense<0.000000e+00> : vector<48x48xf32>
    %204 = tpu.matmul %201, %202, %cst_108 {dimension_numbers = #tpu.dot_dimension_numbers<[1], [1], [0], [0], [0, 0, 1, 0], [], []>} : vector<48x16xf32>, vector<48x16xf32>, vector<48x48xf32> -> vector<48x48xf32>
    %cst_109 = arith.constant 2.500000e-01 : f32
    %205 = vector.broadcast %cst_109 : f32 to vector<48x48xf32>
    %206 = arith.mulf %204, %205 : vector<48x48xf32>
    %207 = arith.addf %206, %6 : vector<48x48xf32>
    %cst_110 = arith.constant dense<0xFF800000> : vector<48xf32>
    %208 = vector.multi_reduction <maximumf>, %207, %cst_110 [1] : vector<48x48xf32> to vector<48xf32>
    %209 = vector.shape_cast %208 : vector<48xf32> to vector<48x1xf32>
    %210 = vector.broadcast %209 : vector<48x1xf32> to vector<48x48xf32>
    %211 = arith.subf %207, %210 : vector<48x48xf32>
    %212 = math.exp %211 : vector<48x48xf32>
    %cst_111 = arith.constant dense<0.000000e+00> : vector<48xf32>
    %213 = vector.multi_reduction <add>, %212, %cst_111 [1] : vector<48x48xf32> to vector<48xf32>
    %214 = vector.shape_cast %213 : vector<48xf32> to vector<48x1xf32>
    %215 = tpu.reciprocal %214 {approx = true} : vector<48x1xf32> -> vector<48x1xf32>
    %216 = vector.broadcast %215 : vector<48x1xf32> to vector<48x48xf32>
    %217 = arith.mulf %212, %216 : vector<48x48xf32>
    %cst_112 = arith.constant dense<0.000000e+00> : vector<48x16xf32>
    %218 = tpu.matmul %217, %203, %cst_112 {dimension_numbers = #tpu.dot_dimension_numbers<[1], [0], [0], [1], [0, 0, 1, 1], [], []>} : vector<48x48xf32>, vector<48x16xf32>, vector<48x16xf32> -> vector<48x16xf32>
    %219 = tpu.concatenate %200, %218 in 1 : vector<48x16xf32>, vector<48x16xf32> -> vector<48x32xf32>
    %c1_113 = arith.constant 1 : index
    %c0_114 = arith.constant 0 : index
    %c0_115 = arith.constant 0 : index
    %220 = vector.load %arg8[%c1_113, %c0_114, %c0_115] : memref<2x32x32xf32, #tpu.memory_space<vmem>>, vector<1x32x32xf32>
    %221 = vector.shape_cast %220 : vector<1x32x32xf32> to vector<32x32xf32>
    %cst_116 = arith.constant dense<0.000000e+00> : vector<48x32xf32>
    %222 = tpu.matmul %219, %221, %cst_116 {dimension_numbers = #tpu.dot_dimension_numbers<[1], [0], [0], [1], [0, 0, 1, 1], [], []>} : vector<48x32xf32>, vector<32x32xf32>, vector<48x32xf32> -> vector<48x32xf32>
    %223 = arith.addf %147, %222 : vector<48x32xf32>
    %c1_117 = arith.constant 1 : index
    %c0_118 = arith.constant 0 : index
    %c0_119 = arith.constant 0 : index
    %224 = vector.load %arg9[%c1_117, %c0_118, %c0_119] : memref<2x1x32xf32, #tpu.memory_space<vmem>>, vector<1x1x32xf32>
    %225 = vector.shape_cast %224 : vector<1x1x32xf32> to vector<1x32xf32>
    %226 = vector.broadcast %225 : vector<1x32xf32> to vector<48x32xf32>
    %227 = arith.addf %223, %226 : vector<48x32xf32>
    %c0_120 = arith.constant 0 : index
    %c0_121 = arith.constant 0 : index
    %228 = vector.load %arg23[%c0_120, %c0_121] : memref<48x32xf32, #tpu.memory_space<vmem>>, vector<48x32xf32>
    tpu.vector_store %arg23[%c0_120, %c0_121], %227 {strides = array<i32>} : memref<48x32xf32, #tpu.memory_space<vmem>>, vector<48x32xf32>,
    %c0_122 = arith.constant 0 : index
    %c0_123 = arith.constant 0 : index
    %229 = vector.load %arg23[%c0_122, %c0_123] : memref<48x32xf32, #tpu.memory_space<vmem>>, vector<48x32xf32>
    %c1_124 = arith.constant 1 : index
    %c0_125 = arith.constant 0 : index
    %c0_126 = arith.constant 0 : index
    %230 = vector.load %arg10[%c1_124, %c0_125, %c0_126] : memref<2x1x32xf32, #tpu.memory_space<vmem>>, vector<1x1x32xf32>
    %231 = vector.shape_cast %230 : vector<1x1x32xf32> to vector<1x32xf32>
    %c1_127 = arith.constant 1 : index
    %c0_128 = arith.constant 0 : index
    %c0_129 = arith.constant 0 : index
    %232 = vector.load %arg11[%c1_127, %c0_128, %c0_129] : memref<2x1x32xf32, #tpu.memory_space<vmem>>, vector<1x1x32xf32>
    %233 = vector.shape_cast %232 : vector<1x1x32xf32> to vector<1x32xf32>
    %cst_130 = arith.constant dense<0.000000e+00> : vector<48xf32>
    %234 = vector.multi_reduction <add>, %229, %cst_130 [1] : vector<48x32xf32> to vector<48xf32>
    %235 = vector.shape_cast %234 : vector<48xf32> to vector<48x1xf32>
    %cst_131 = arith.constant 3.200000e+01 : f32
    %236 = vector.broadcast %cst_131 : f32 to vector<48x1xf32>
    %237 = arith.divf %235, %236 : vector<48x1xf32>
    %238 = arith.mulf %229, %229 : vector<48x32xf32>
    %cst_132 = arith.constant dense<0.000000e+00> : vector<48xf32>
    %239 = vector.multi_reduction <add>, %238, %cst_132 [1] : vector<48x32xf32> to vector<48xf32>
    %240 = vector.shape_cast %239 : vector<48xf32> to vector<48x1xf32>
    %cst_133 = arith.constant 3.200000e+01 : f32
    %241 = vector.broadcast %cst_133 : f32 to vector<48x1xf32>
    %242 = arith.divf %240, %241 : vector<48x1xf32>
    %243 = arith.mulf %237, %237 : vector<48x1xf32>
    %244 = arith.subf %242, %243 : vector<48x1xf32>
    %cst_134 = arith.constant 0.000000e+00 : f32
    %245 = vector.broadcast %cst_134 : f32 to vector<48x1xf32>
    %246 = arith.maximumf %244, %245 : vector<48x1xf32>
    %247 = vector.broadcast %237 : vector<48x1xf32> to vector<48x32xf32>
    %248 = arith.subf %229, %247 : vector<48x32xf32>
    %cst_135 = arith.constant 9.99999996E-13 : f32
    %249 = vector.broadcast %cst_135 : f32 to vector<48x1xf32>
    %250 = arith.addf %246, %249 : vector<48x1xf32>
    %251 = math.rsqrt %250 : vector<48x1xf32>
    %252 = vector.broadcast %251 : vector<48x1xf32> to vector<48x32xf32>
    %253 = arith.mulf %248, %252 : vector<48x32xf32>
    %254 = vector.broadcast %231 : vector<1x32xf32> to vector<48x32xf32>
    %255 = arith.mulf %253, %254 : vector<48x32xf32>
    %256 = vector.broadcast %233 : vector<1x32xf32> to vector<48x32xf32>
    %257 = arith.addf %255, %256 : vector<48x32xf32>
    %c1_136 = arith.constant 1 : index
    %c0_137 = arith.constant 0 : index
    %c0_138 = arith.constant 0 : index
    %258 = vector.load %arg12[%c1_136, %c0_137, %c0_138] : memref<2x32x64xf32, #tpu.memory_space<vmem>>, vector<1x32x64xf32>
    %259 = vector.shape_cast %258 : vector<1x32x64xf32> to vector<32x64xf32>
    %cst_139 = arith.constant dense<0.000000e+00> : vector<48x64xf32>
    %260 = tpu.matmul %257, %259, %cst_139 {dimension_numbers = #tpu.dot_dimension_numbers<[1], [0], [0], [1], [0, 0, 1, 1], [], []>} : vector<48x32xf32>, vector<32x64xf32>, vector<48x64xf32> -> vector<48x64xf32>
    %c1_140 = arith.constant 1 : index
    %c0_141 = arith.constant 0 : index
    %c0_142 = arith.constant 0 : index
    %261 = vector.load %arg13[%c1_140, %c0_141, %c0_142] : memref<2x1x64xf32, #tpu.memory_space<vmem>>, vector<1x1x64xf32>
    %262 = vector.shape_cast %261 : vector<1x1x64xf32> to vector<1x64xf32>
    %263 = vector.broadcast %262 : vector<1x64xf32> to vector<48x64xf32>
    %264 = arith.addf %260, %263 : vector<48x64xf32>
    %265 = arith.mulf %264, %264 : vector<48x64xf32>
    %266 = arith.mulf %264, %265 : vector<48x64xf32>
    %cst_143 = arith.constant 4.471500e-02 : f32
    %267 = vector.broadcast %cst_143 : f32 to vector<48x64xf32>
    %268 = arith.mulf %267, %266 : vector<48x64xf32>
    %269 = arith.addf %264, %268 : vector<48x64xf32>
    %cst_144 = arith.constant 0.797884583 : f32
    %270 = vector.broadcast %cst_144 : f32 to vector<48x64xf32>
    %271 = arith.mulf %270, %269 : vector<48x64xf32>
    %272 = math.tanh %271 : vector<48x64xf32>
    %cst_145 = arith.constant 1.000000e+00 : f32
    %273 = vector.broadcast %cst_145 : f32 to vector<48x64xf32>
    %274 = arith.addf %273, %272 : vector<48x64xf32>
    %cst_146 = arith.constant 5.000000e-01 : f32
    %275 = vector.broadcast %cst_146 : f32 to vector<48x64xf32>
    %276 = arith.mulf %275, %274 : vector<48x64xf32>
    %277 = arith.mulf %264, %276 : vector<48x64xf32>
    %c1_147 = arith.constant 1 : index
    %c0_148 = arith.constant 0 : index
    %c0_149 = arith.constant 0 : index
    %278 = vector.load %arg14[%c1_147, %c0_148, %c0_149] : memref<2x64x32xf32, #tpu.memory_space<vmem>>, vector<1x64x32xf32>
    %279 = vector.shape_cast %278 : vector<1x64x32xf32> to vector<64x32xf32>
    %cst_150 = arith.constant dense<0.000000e+00> : vector<48x32xf32>
    %280 = tpu.matmul %277, %279, %cst_150 {dimension_numbers = #tpu.dot_dimension_numbers<[1], [0], [0], [1], [0, 0, 1, 1], [], []>} : vector<48x64xf32>, vector<64x32xf32>, vector<48x32xf32> -> vector<48x32xf32>
    %281 = arith.addf %229, %280 : vector<48x32xf32>
    %c1_151 = arith.constant 1 : index
    %c0_152 = arith.constant 0 : index
    %c0_153 = arith.constant 0 : index
    %282 = vector.load %arg15[%c1_151, %c0_152, %c0_153] : memref<2x1x32xf32, #tpu.memory_space<vmem>>, vector<1x1x32xf32>
    %283 = vector.shape_cast %282 : vector<1x1x32xf32> to vector<1x32xf32>
    %284 = vector.broadcast %283 : vector<1x32xf32> to vector<48x32xf32>
    %285 = arith.addf %281, %284 : vector<48x32xf32>
    %c0_154 = arith.constant 0 : index
    %c0_155 = arith.constant 0 : index
    %286 = vector.load %arg23[%c0_154, %c0_155] : memref<48x32xf32, #tpu.memory_space<vmem>>, vector<48x32xf32>
    tpu.vector_store %arg23[%c0_154, %c0_155], %285 {strides = array<i32>} : memref<48x32xf32, #tpu.memory_space<vmem>>, vector<48x32xf32>,
    %c0_156 = arith.constant 0 : index
    %c0_157 = arith.constant 0 : index
    %287 = tpu.strided_load %arg23[%c0_156, %c0_157] {strides = array<i32: 24, 1>} : memref<48x32xf32, #tpu.memory_space<vmem>>, vector<2x32xf32>
    %c0_158 = arith.constant 0 : index
    %c0_159 = arith.constant 0 : index
    %288 = vector.load %arg16[%c0_158, %c0_159] : memref<1x32xf32, #tpu.memory_space<vmem>>, vector<1x32xf32>
    %c0_160 = arith.constant 0 : index
    %c0_161 = arith.constant 0 : index
    %289 = vector.load %arg17[%c0_160, %c0_161] : memref<1x32xf32, #tpu.memory_space<vmem>>, vector<1x32xf32>
    %cst_162 = arith.constant dense<0.000000e+00> : vector<2xf32>
    %290 = vector.multi_reduction <add>, %287, %cst_162 [1] : vector<2x32xf32> to vector<2xf32>
    %291 = vector.shape_cast %290 : vector<2xf32> to vector<2x1xf32>
    %cst_163 = arith.constant 3.200000e+01 : f32
    %292 = vector.broadcast %cst_163 : f32 to vector<2x1xf32>
    %293 = arith.divf %291, %292 : vector<2x1xf32>
    %294 = arith.mulf %287, %287 : vector<2x32xf32>
    %cst_164 = arith.constant dense<0.000000e+00> : vector<2xf32>
    %295 = vector.multi_reduction <add>, %294, %cst_164 [1] : vector<2x32xf32> to vector<2xf32>
    %296 = vector.shape_cast %295 : vector<2xf32> to vector<2x1xf32>
    %cst_165 = arith.constant 3.200000e+01 : f32
    %297 = vector.broadcast %cst_165 : f32 to vector<2x1xf32>
    %298 = arith.divf %296, %297 : vector<2x1xf32>
    %299 = arith.mulf %293, %293 : vector<2x1xf32>
    %300 = arith.subf %298, %299 : vector<2x1xf32>
    %cst_166 = arith.constant 0.000000e+00 : f32
    %301 = vector.broadcast %cst_166 : f32 to vector<2x1xf32>
    %302 = arith.maximumf %300, %301 : vector<2x1xf32>
    %303 = vector.broadcast %293 : vector<2x1xf32> to vector<2x32xf32>
    %304 = arith.subf %287, %303 : vector<2x32xf32>
    %cst_167 = arith.constant 9.99999996E-13 : f32
    %305 = vector.broadcast %cst_167 : f32 to vector<2x1xf32>
    %306 = arith.addf %302, %305 : vector<2x1xf32>
    %307 = math.rsqrt %306 : vector<2x1xf32>
    %308 = vector.broadcast %307 : vector<2x1xf32> to vector<2x32xf32>
    %309 = arith.mulf %304, %308 : vector<2x32xf32>
    %310 = vector.broadcast %288 : vector<1x32xf32> to vector<2x32xf32>
    %311 = arith.mulf %309, %310 : vector<2x32xf32>
    %312 = vector.broadcast %289 : vector<1x32xf32> to vector<2x32xf32>
    %313 = arith.addf %311, %312 : vector<2x32xf32>
    %c0_168 = arith.constant 0 : index
    %c0_169 = arith.constant 0 : index
    %314 = vector.load %arg18[%c0_168, %c0_169] : memref<32x32xf32, #tpu.memory_space<vmem>>, vector<32x32xf32>
    %cst_170 = arith.constant dense<0.000000e+00> : vector<2x32xf32>
    %315 = tpu.matmul %313, %314, %cst_170 {dimension_numbers = #tpu.dot_dimension_numbers<[1], [0], [0], [1], [0, 0, 1, 1], [], []>} : vector<2x32xf32>, vector<32x32xf32>, vector<2x32xf32> -> vector<2x32xf32>
    %c0_171 = arith.constant 0 : index
    %c0_172 = arith.constant 0 : index
    %316 = vector.load %arg19[%c0_171, %c0_172] : memref<1x32xf32, #tpu.memory_space<vmem>>, vector<1x32xf32>
    %317 = vector.broadcast %316 : vector<1x32xf32> to vector<2x32xf32>
    %318 = arith.addf %315, %317 : vector<2x32xf32>
    %319 = math.tanh %318 : vector<2x32xf32>
    %c0_173 = arith.constant 0 : index
    %c0_174 = arith.constant 0 : index
    %320 = vector.load %arg20[%c0_173, %c0_174] : memref<32x128xf32, #tpu.memory_space<vmem>>, vector<32x128xf32>
    %cst_175 = arith.constant dense<0.000000e+00> : vector<2x128xf32>
    %321 = tpu.matmul %319, %320, %cst_175 {dimension_numbers = #tpu.dot_dimension_numbers<[1], [0], [0], [1], [0, 0, 1, 1], [], []>} : vector<2x32xf32>, vector<32x128xf32>, vector<2x128xf32> -> vector<2x128xf32>
    %c0_176 = arith.constant 0 : index
    %c0_177 = arith.constant 0 : index
    %322 = vector.load %arg21[%c0_176, %c0_177] : memref<1x128xf32, #tpu.memory_space<vmem>>, vector<1x128xf32>
    %323 = vector.broadcast %322 : vector<1x128xf32> to vector<2x128xf32>
    %324 = arith.addf %321, %323 : vector<2x128xf32>
    %c0_178 = arith.constant 0 : index
    %c0_179 = arith.constant 0 : index
    %325 = vector.load %arg22[%c0_178, %c0_179] : memref<2x128xf32, #tpu.memory_space<vmem>>, vector<2x128xf32>
    tpu.vector_store %arg22[%c0_178, %c0_179], %324 {strides = array<i32>} : memref<2x128xf32, #tpu.memory_space<vmem>>, vector<2x128xf32>,
    return
  }
}

</mosaic_0001>

<bundles_post_ra>
// kernel: eq.8
= control target key start
LH: loop header
LB: loop body
LE: loop exit
PB: predicated region body
PF: predicated region fallthrough
CT: control target
= control target key end

     0   :  { %vm8_vm0 = vcmask 195584   ;;  %vm14_vm1 = vcmask 392384   ;;  %s42_s0 = inlined_call_operand.vmem [shape: s32[2,24], index: 0, kind: input, shape index: {}]   ;;  %s43_s1 = inlined_call_operand.vmem [shape: s32[48], index: 1, kind: output, shape index: {}]  }
   0x1   :  { %v5_v0 = vld [vmem:[%s42_s0] sm:$0x3]  ;;  %s25_s0 = smov 24  }
   0x2   :  { %6 = vst [vmem:[#allocation1] sm:$0x3] %v5_v0 }
   0x9   :  { %v11_v1 = vld [vmem:[#allocation1 + $0x1] sm:$0x1]   ;;  %v7_v2 = vld [vmem:[#allocation1] sm:$0x1]  }
   0xa   :  { %12 = vrot.lane.b32.xlu0 %v11_v1, %s25_s0  ;;  %9 = vst.msk [vmem:[#allocation0] sm:$0x1] %vm8_vm0, %v7_v2  }
  0x7c   :  { %v13_v3 = vpop.permute.xlu0 %12  }
  0x7d   :  { %15 = vst.msk [vmem:[#allocation0] sm:$0x1] %vm14_vm1, %v13_v3  }
  0x84   :  { %v20_v4 = vld [vmem:[#allocation0] sm:$0x1] }
  0x85   :  { %23 = vst [vmem:[%s43_s1] sm:$0x1] %v20_v4 }

// kernel: custom_vit_forward.1
= control target key start
LH: loop header
LB: loop body
LE: loop exit
PB: predicated region body
PF: predicated region fallthrough
CT: control target
= control target key end

     0   :  { %s5770_s0 = inlined_call_operand.vmem [shape: f32[48,64], index: 0, kind: input, shape index: {}]   ;;  %s5771_s1 = inlined_call_operand.vmem [shape: f32[64,32], index: 1, kind: input, shape index: {}]   ;;  %s5772_s2 = inlined_call_operand.vmem [shape: f32[48,32], index: 2, kind: input, shape index: {}]   ;;  %s5773_s3 = inlined_call_operand.vmem [shape: f32[48,48], index: 3, kind: input, shape index: {}]   ;;  %s5774_s4 = inlined_call_operand.vmem [shape: f32[2,1,32], index: 4, kind: input, shape index: {}]   ;;  %s5775_s5 = inlined_call_operand.vmem [shape: f32[2,1,32], index: 5, kind: input, shape index: {}]   ;;  %s5776_s6 = inlined_call_operand.vmem [shape: f32[2,32,96], index: 6, kind: input, shape index: {}]   ;;  %s5777_s7 = inlined_call_operand.vmem [shape: f32[2,1,96], index: 7, kind: input, shape index: {}]   ;;  %s5778_s8 = inlined_call_operand.vmem [shape: f32[2,32,32], index: 8, kind: input, shape index: {}]   ;;  %s5779_s9 = inlined_call_operand.vmem [shape: f32[2,1,32], index: 9, kind: input, shape index: {}]   ;;  %s5780_s10 = inlined_call_operand.vmem [shape: f32[2,1,32], index: 10, kind: input, shape index: {}]   ;;  %s5781_s11 = inlined_call_operand.vmem [shape: f32[2,1,32], index: 11, kind: input, shape index: {}]   ;;  %s5782_s12 = inlined_call_operand.vmem [shape: f32[2,32,64], index: 12, kind: input, shape index: {}]   ;;  %s5783_s13 = inlined_call_operand.vmem [shape: f32[2,1,64], index: 13, kind: input, shape index: {}]   ;;  %s5784_s14 = inlined_call_operand.vmem [shape: f32[2,64,32], index: 14, kind: input, shape index: {}]   ;;  %s5785_s15 = inlined_call_operand.vmem [shape: f32[2,1,32], index: 15, kind: input, shape index: {}]   ;;  %s5786_s16 = inlined_call_operand.vmem [shape: f32[1,32], index: 16, kind: input, shape index: {}]   ;;  %s5787_s17 = inlined_call_operand.vmem [shape: f32[1,32], index: 17, kind: input, shape index: {}]   ;;  %s5788_s18 = inlined_call_operand.vmem [shape: f32[32,32], index: 18, kind: input, shape index: {}]   ;;  %s5789_s19 = inlined_call_operand.vmem [shape: f32[1,32], index: 19, kind: input, shape index: {}]   ;;  %s5790_s20 = inlined_call_operand.vmem [shape: f32[32,128], index: 20, kind: input, shape index: {}]   ;;  %s5791_s21 = inlined_call_operand.vmem [shape: f32[1,128], index: 21, kind: input, shape index: {}]   ;;  %s5792_s22 = inlined_call_operand.hbm [shape: f32[2,128], index: 22, kind: output, shape index: {}]  }
   0x1   :  { %5806 = sst [smem:[#allocation6_spill]] %s5770_s0 }
   0x2   :  { %5807 = sst [smem:[#allocation7_spill]] %s5771_s1 }
   0x3   :  { %5808 = sst [smem:[#allocation8_spill]] %s5772_s2 }
   0x4   :  { %5809 = sst [smem:[#allocation9_spill]] %s5773_s3 }
   0x5   :  { %5810 = sst [smem:[#allocation10_spill]] %s5774_s4 }
   0x6   :  { %5811 = sst [smem:[#allocation11_spill]] %s5775_s5 }
   0x7   :  { %5812 = sst [smem:[#allocation12_spill]] %s5776_s6 }
   0x8   :  { %s5813_s29 = sld [smem:[#allocation7_spill]]  ;;  %vm92_vm0 = vcmask 523264  }
   0x9   :  { %s5814_s24 = sld [smem:[#allocation6_spill]] }
   0xe   :  { %v85_v0 = vld [vmem:[%s5813_s29 + $0x38] sm:$0xff]  ;;  %v84_v1 = vld [vmem:[%s5813_s29 + $0x30] sm:$0xff]  ;;  %v83_v2 = vld [vmem:[%s5813_s29 + $0x28] sm:$0xff] }
   0xf   :  { %3984 = vmatprep.subr.mxu0 %v85_v0  ;;  %v72_v3 = vld [vmem:[%s5814_s24] sm:$0xff] }
  0x10   :  { %3985 = vmatpush3.msra.mxu0 %v85_v0  ;;  %4000 = vmatprep.mubr.msk.f32.mxu0 %vm92_vm0, %v72_v3  ;;  %v82_v4 = vld [vmem:[%s5813_s29 + $0x20] sm:$0xff] }
  0x11   :  { %3986 = vmatprep.subr.mxu0 %v84_v1 }
  0x12   :  { %3987 = vmatpush3.msra.mxu0 %v84_v1 }
  0x13   :  { %3988 = vmatprep.subr.mxu0 %v83_v2 }
  0x14   :  { %27 = vsyncpa [#allocation4], 0  ;;  %3989 = vmatpush3.msra.mxu0 %v83_v2  ;;  %v81_v5 = vld [vmem:[%s5813_s29 + $0x18] sm:$0xff]  ;;  %v80_v6 = vld [vmem:[%s5813_s29 + $0x10] sm:$0xff]  ;;  %s5815_s4 = sld [smem:[#allocation8_spill]]  ;;  %vm206_vm1 = vcmask 261120  }
  0x15   :  { %3990 = vmatprep.subr.mxu0 %v82_v4  ;;  %v79_v7 = vld [vmem:[%s5813_s29 + $0x8] sm:$0xff]  ;;  %v78_v8 = vld [vmem:[%s5813_s29] sm:$0xff]  ;;  %v74_v10 = vld [vmem:[%s5814_s24 + $0x10] sm:$0xff]  ;;  %s5816_s28 = sld [smem:[#allocation12_spill]]  ;;  %vm490_vm2 = vcmask 130048   ;;  %s4572_s30 = smov 96  }
  0x16   :  { %3991 = vmatpush3.msra.mxu0 %v82_v4  ;;  %v73_v9 = vld [vmem:[%s5814_s24 + $0x8] sm:$0xff]  ;;  %v75_v11 = vld [vmem:[%s5814_s24 + $0x18] sm:$0xff]  ;;  %v76_v12 = vld [vmem:[%s5814_s24 + $0x20] sm:$0xff]  ;;  %s5817_s25 = sld [smem:[#allocation10_spill]]  ;;  %s4574_s0 = smov 80   ;;  %vm622_vm3 = vcmask 392192  }
  0x17   :  { %3992 = vmatprep.subr.mxu0 %v81_v5  ;;  %v77_v13 = vld [vmem:[%s5814_s24 + $0x28] sm:$0xff]  ;;  %s5818_s2 = sld [smem:[#allocation11_spill]]  ;;  %s5802_s26 = smov 112   ;;  %vm3385_vm4 = vcmask 254976   ;;  %vm4579_vm5 = vmmov 0  }
  0x18   :  { %3993 = vmatpush3.msra.mxu0 %v81_v5  ;;  %s5819_s5 = sld [smem:[#allocation9_spill]]  ;;  %s5800_s29 = smov 48  }
  0x19   :  { %3994 = vmatprep.subr.mxu0 %v80_v6  ;;  %s5804_s27 = smov 16  }
  0x1a   :  { %3995 = vmatpush3.msra.mxu0 %v80_v6  ;;  %v87_v14 = vld [vmem:[%s5815_s4 + $0x8] sm:$0xff]  ;;  %v86_v16 = vld [vmem:[%s5815_s4] sm:$0xff]  ;;  %v89_v19 = vld [vmem:[%s5815_s4 + $0x18] sm:$0xff] }
  0x1b   :  { %3996 = vmatprep.subr.mxu0 %v79_v7  ;;  %v88_v22 = vld [vmem:[%s5815_s4 + $0x10] sm:$0xff]  ;;  %v91_v25 = vld [vmem:[%s5815_s4 + $0x28] sm:$0xff]  ;;  %v90_v28 = vld [vmem:[%s5815_s4 + $0x20] sm:$0xff]  ;;  %s4573_s4 = smov 64  }
  0x1c   :  { %3997 = vmatpush3.msra.mxu0 %v79_v7  ;;  %v351_v56 = vld [vmem:[%s5816_s28 + $0x18] sm:$0xff]  ;;  %v350_v57 = vld [vmem:[%s5816_s28 + $0x10] sm:$0xff]  ;;  %v349_v58 = vld [vmem:[%s5816_s28 + $0x8] sm:$0xff] }
  0x1d   :  { %3998 = vmatprep.subr.mxu0 %v78_v8  ;;  %4009 = vmatprep.subr.mxu1 %v351_v56  ;;  %v348_v59 = vld [vmem:[%s5816_s28] sm:$0xff] }
  0x1e   :  { %3999 = vmatpush3.msra.mxu0 %v78_v8  ;;  %4010 = vmatpush3.msra.mxu1 %v351_v56 }
  0x1f   :  { %4001 = vmatmul.mubr.msk.f32.vlgmr.msra.gmra.mxu0 %vm92_vm0, %v73_v9  ;;  %4011 = vmatprep.subr.mxu1 %v350_v57 }
  0x20   :  { %4003 = vmatprep.mubr.msk.f32.mxu0 %vm92_vm0, %v74_v10  ;;  %4012 = vmatpush3.msra.mxu1 %v350_v57 }
  0x21   :  { %4013 = vmatprep.subr.mxu1 %v349_v58 }
  0x22   :  { %4014 = vmatpush3.msra.mxu1 %v349_v58 }
  0x23   :  { %4004 = vmatmul.mubr.msk.f32.gmra.mxu0 %vm92_vm0, %v75_v11  ;;  %4015 = vmatprep.subr.mxu1 %v348_v59 }
  0x24   :  { %4006 = vmatprep.mubr.msk.f32.mxu0 %vm92_vm0, %v76_v12  ;;  %4016 = vmatpush3.msra.mxu1 %v348_v59 }
  0x27   :  { %4007 = vmatmul.mubr.msk.f32.gmra.mxu0 %vm92_vm0, %v77_v13 }
  0xdf   :  { %v4002_v15 = vpop.f32.mrf.mxu0 }
  0xe0   :  { %v183_v17 = vadd.f32 %v4002_v15, %v87_v14 }
  0xe1   :  { %v177_v18 = vpop.f32.mrf.mxu0 }
  0xe2   :  { %208 = vst.msk [vmem:[#allocation2 + $0x8] sm:$0xff] %vm206_vm1, %v183_v17  ;;  %v178_v20 = vadd.f32 %v177_v18, %v86_v16 }
  0xe3   :  { %v4005_v21 = vpop.f32.mrf.mxu0 }
  0xe4   :  { %207 = vst.msk [vmem:[#allocation2] sm:$0xff] %vm206_vm1, %v178_v20  ;;  %v193_v23 = vadd.f32 %v4005_v21, %v89_v19 }
  0xe5   :  { %v187_v24 = vpop.f32.mrf.mxu0 }
  0xe6   :  { %210 = vst.msk [vmem:[#allocation2 + $0x18] sm:$0xff] %vm206_vm1, %v193_v23  ;;  %v188_v26 = vadd.f32 %v187_v24, %v88_v22 }
  0xe7   :  { %v4008_v27 = vpop.f32.mrf.mxu0 }
  0xe8   :  { %209 = vst.msk [vmem:[#allocation2 + $0x10] sm:$0xff] %vm206_vm1, %v188_v26  ;;  %v203_v29 = vadd.f32 %v4008_v27, %v91_v25 }
  0xe9   :  { %v4766_v30 = vld [vmem:[#allocation2 + $0x8] sm:$0xff]  ;;  %v197_v31 = vpop.f32.mrf.mxu0 }
  0xea   :  { %v230_v32 = vsel %vm206_vm1, %v4766_v30, 0.0  ;;  %212 = vst.msk [vmem:[#allocation2 + $0x28] sm:$0xff] %vm206_vm1, %v203_v29  ;;  %v253_v33 = vmul.f32 %v4766_v30, %v4766_v30  ;;  %v198_v34 = vadd.f32 %v197_v31, %v90_v28 }
  0xeb   :  { %231 = vadd.xlane.f32.xlu0 %v230_v32  ;;  %v4773_v35 = vld [vmem:[#allocation2] sm:$0xff] }
  0xec   :  { %v261_v36 = vsel %vm206_vm1, %v253_v33, 0.0  ;;  %211 = vst.msk [vmem:[#allocation2 + $0x20] sm:$0xff] %vm206_vm1, %v198_v34  ;;  %v252_v37 = vmul.f32 %v4773_v35, %v4773_v35  ;;  %v227_v38 = vsel %vm206_vm1, %v4773_v35, 0.0 }
  0xed   :  { %262 = vadd.xlane.f32.xlu1 %v261_v36  ;;  %v4786_v42 = vld [vmem:[#allocation2 + $0x18] sm:$0xff] }
  0xee   :  { %v258_v40 = vsel %vm206_vm1, %v252_v37, 0.0  ;;  %v236_v44 = vsel %vm206_vm1, %v4786_v42, 0.0  ;;  %v255_v45 = vmul.f32 %v4786_v42, %v4786_v42 }
  0xef   :  { %228 = vadd.xlane.f32.xlu0 %v227_v38  ;;  %v4781_v39 = vld [vmem:[#allocation2 + $0x10] sm:$0xff] }
  0xf0   :  { %v233_v41 = vsel %vm206_vm1, %v4781_v39, 0.0  ;;  %v254_v43 = vmul.f32 %v4781_v39, %v4781_v39  ;;  %v267_v48 = vsel %vm206_vm1, %v255_v45, 0.0 }
  0xf1   :  { %259 = vadd.xlane.f32.xlu1 %v258_v40  ;;  %v4800_v50 = vld [vmem:[#allocation2 + $0x28] sm:$0xff] }
  0xf2   :  { %v264_v47 = vsel %vm206_vm1, %v254_v43, 0.0  ;;  %v242_v52 = vsel %vm206_vm1, %v4800_v50, 0.0  ;;  %v257_v53 = vmul.f32 %v4800_v50, %v4800_v50 }
  0xf3   :  { %234 = vadd.xlane.f32.xlu0 %v233_v41  ;;  %v4794_v46 = vld [vmem:[#allocation2 + $0x20] sm:$0xff] }
  0xf4   :  { %v239_v49 = vsel %vm206_vm1, %v4794_v46, 0.0  ;;  %v256_v51 = vmul.f32 %v4794_v46, %v4794_v46  ;;  %v273_v55 = vsel %vm206_vm1, %v257_v53, 0.0  ;;  %v3606_v53 = vld [vmem:[%s5817_s25] ss:$0 sm:$0xff] }
  0xf5   :  { %237 = vadd.xlane.f32.xlu1 %v236_v44 }
  0xf6   :  { %v270_v54 = vsel %vm206_vm1, %v256_v51, 0.0 }
  0xf7   :  { %265 = vadd.xlane.f32.xlu0 %v264_v47 }
  0xf9   :  { %268 = vadd.xlane.f32.xlu1 %v267_v48 }
  0xfb   :  { %240 = vadd.xlane.f32.xlu0 %v239_v49 }
  0xfd   :  { %243 = vadd.xlane.f32.xlu1 %v242_v52 }
  0xff   :  { %271 = vadd.xlane.f32.xlu0 %v270_v54 }
 0x101   :  { %274 = vadd.xlane.f32.xlu1 %v273_v55 }
 0x174   :  { %v232_v60 = vpop.xlane.xlu0 %231 }
 0x175   :  { %v247_v61 = vmul.f32 0.03125, %v232_v60 }
 0x176   :  { %v263_v62 = vpop.xlane.xlu1 %262 }
 0x177   :  { %v283_v63 = vmul.f32 %v247_v61, %v247_v61  ;;  %v277_v0 = vmul.f32 0.03125, %v263_v62  ;;  %v301_v44 = vsub.f32 %v4766_v30, %v247_v61  ;;  %v3607_v30 = vld [vmem:[%s5818_s2] ss:$0 sm:$0xff] }
 0x178   :  { %v229_v1 = vpop.xlane.xlu0 %228 }
 0x179   :  { %v289_v2 = vsub.f32 %v277_v0, %v283_v63  ;;  %v246_v3 = vmul.f32 0.03125, %v229_v1 }
 0x17a   :  { %v260_v4 = vpop.xlane.xlu1 %259 }
 0x17b   :  { %v295_v5 = vmax.f32 %v289_v2, 0.0  ;;  %v282_v6 = vmul.f32 %v246_v3, %v246_v3  ;;  %v276_v7 = vmul.f32 0.03125, %v260_v4  ;;  %v300_v49 = vsub.f32 %v4773_v35, %v246_v3 }
 0x17c   :  { %v235_v8 = vpop.xlane.xlu0 %234 }
 0x17d   :  { %v307_v9 = vadd.f32 1e-12, %v295_v5  ;;  %v288_v10 = vsub.f32 %v276_v7, %v282_v6  ;;  %v248_v11 = vmul.f32 0.03125, %v235_v8 }
 0x17e   :  { %v238_v12 = vpop.xlane.xlu1 %237 }
 0x17f   :  { %4360 = vrsqrt.f32 %v307_v9  ;;  %v294_v13 = vmax.f32 %v288_v10, 0.0  ;;  %v249_v14 = vmul.f32 0.03125, %v238_v12  ;;  %v284_v17 = vmul.f32 %v248_v11, %v248_v11 }
 0x180   :  { %v266_v15 = vpop.xlane.xlu0 %265  ;;  %v302_v59 = vsub.f32 %v4781_v39, %v248_v11 }
 0x181   :  { %v306_v16 = vadd.f32 1e-12, %v294_v13  ;;  %v278_v18 = vmul.f32 0.03125, %v266_v15  ;;  %v285_v20 = vmul.f32 %v249_v14, %v249_v14  ;;  %v303_v62 = vsub.f32 %v4786_v42, %v249_v14  ;;  %v3608_v14 = vld [vmem:[%s5777_s7] ss:$0 sm:$0xff] }
 0x182   :  { %v269_v19 = vpop.xlane.xlu1 %268 }
 0x183   :  { %4362 = vrsqrt.f32 %v306_v16  ;;  %v290_v21 = vsub.f32 %v278_v18, %v284_v17  ;;  %v279_v22 = vmul.f32 0.03125, %v269_v19 }
 0x184   :  { %v241_v23 = vpop.xlane.xlu0 %240 }
 0x185   :  { %v296_v24 = vmax.f32 %v290_v21, 0.0  ;;  %v291_v25 = vsub.f32 %v279_v22, %v285_v20  ;;  %v250_v26 = vmul.f32 0.03125, %v241_v23 }
 0x186   :  { %v244_v27 = vpop.xlane.xlu1 %243 }
 0x187   :  { %v308_v28 = vadd.f32 1e-12, %v296_v24  ;;  %v297_v29 = vmax.f32 %v291_v25, 0.0  ;;  %v251_v31 = vmul.f32 0.03125, %v244_v27  ;;  %v286_v34 = vmul.f32 %v250_v26, %v250_v26 }
 0x188   :  { %v272_v32 = vpop.xlane.xlu0 %271  ;;  %v304_v5 = vsub.f32 %v4794_v46, %v250_v26 }
 0x189   :  { %4364 = vrsqrt.f32 %v308_v28  ;;  %v309_v33 = vadd.f32 1e-12, %v297_v29  ;;  %v280_v36 = vmul.f32 0.03125, %v272_v32  ;;  %v287_v38 = vmul.f32 %v251_v31, %v251_v31 }
 0x18a   :  { %v275_v37 = vpop.xlane.xlu1 %274  ;;  %v305_v7 = vsub.f32 %v4800_v50, %v251_v31 }
 0x18b   :  { %4366 = vrsqrt.f32 %v309_v33  ;;  %v292_v40 = vsub.f32 %v280_v36, %v286_v34  ;;  %v281_v41 = vmul.f32 0.03125, %v275_v37 }
 0x18c   :  { %v4361_v43 = vpop.eup %4360 }
 0x18d   :  { %v298_v45 = vmax.f32 %v292_v40, 0.0  ;;  %v293_v47 = vsub.f32 %v281_v41, %v287_v38  ;;  %v319_v48 = vmul.f32 %v4361_v43, %v301_v44  ;;  %v4914_v43 = vld [vmem:[%s5819_s5 + $0x8] sm:$0xff] }
 0x18f   :  { %v310_v51 = vadd.f32 1e-12, %v298_v45  ;;  %v299_v52 = vmax.f32 %v293_v47, 0.0  ;;  %v331_v57 = vmul.f32 %v3606_v53, %v319_v48  ;;  %v4919_v47 = vld [vmem:[%s5819_s5] sm:$0xff] }
 0x190   :  { %v4363_v54 = vpop.eup %4362 }
 0x191   :  { %4368 = vrsqrt.f32 %v310_v51  ;;  %v311_v55 = vadd.f32 1e-12, %v299_v52  ;;  %v318_v56 = vmul.f32 %v4363_v54, %v300_v49  ;;  %v343_v61 = vadd.f32 %v3607_v30, %v331_v57  ;;  %v4925_v52 = vld [vmem:[%s5819_s5 + $0x18] sm:$0xff] }
 0x193   :  { %4370 = vrsqrt.f32 %v311_v55  ;;  %v330_v58 = vmul.f32 %v3606_v53, %v318_v56 }
 0x195   :  { %v342_v35 = vadd.f32 %v3607_v30, %v330_v58 }
 0x196   :  { %v4365_v60 = vpop.eup %4364 }
 0x197   :  { %4017 = vmatprep.mubr.msk.f32.mxu1 %vm206_vm1, %v342_v35  ;;  %v320_v63 = vmul.f32 %v4365_v60, %v302_v59  ;;  %v4934_v35 = vld [vmem:[%s5819_s5 + $0x28] sm:$0xff]  ;;  %v4939_v60 = vld [vmem:[%s5819_s5 + $0x10] sm:$0xff] }
 0x198   :  { %v4367_v0 = vpop.eup %4366  ;;  %4018 = vmatmul.mubr.msk.f32.vlgmr.msra.gmra.mxu1 %vm206_vm1, %v343_v61 }
 0x199   :  { %v332_v1 = vmul.f32 %v3606_v53, %v320_v63  ;;  %v321_v2 = vmul.f32 %v4367_v0, %v303_v62 }
 0x19b   :  { %v344_v3 = vadd.f32 %v3607_v30, %v332_v1  ;;  %v333_v4 = vmul.f32 %v3606_v53, %v321_v2 }
 0x19d   :  { %4020 = vmatprep.mubr.msk.f32.mxu1 %vm206_vm1, %v344_v3  ;;  %v345_v39 = vadd.f32 %v3607_v30, %v333_v4  ;;  %v4947_v3 = vld [vmem:[%s5819_s5 + $0x20] sm:$0xff] }
 0x19e   :  { %v4369_v6 = vpop.eup %4368 }
 0x19f   :  { %4021 = vmatmul.mubr.msk.f32.gmra.mxu1 %vm206_vm1, %v345_v39  ;;  %v322_v42 = vmul.f32 %v4369_v6, %v304_v5 }
 0x1a0   :  { %v4371_v8 = vpop.eup %4370 }
 0x1a1   :  { %v334_v9 = vmul.f32 %v3606_v53, %v322_v42  ;;  %v323_v10 = vmul.f32 %v4371_v8, %v305_v7 }
 0x1a3   :  { %v346_v11 = vadd.f32 %v3607_v30, %v334_v9  ;;  %v335_v12 = vmul.f32 %v3606_v53, %v323_v10 }
 0x1a5   :  { %4023 = vmatprep.mubr.msk.f32.mxu1 %vm206_vm1, %v346_v11  ;;  %v347_v13 = vadd.f32 %v3607_v30, %v335_v12 }
 0x1a7   :  { %4024 = vmatmul.mubr.msk.f32.gmra.mxu1 %vm206_vm1, %v347_v13 }
 0x258   :  { %v4019_v46 = vpop.f32.mrf.mxu1 }
 0x259   :  { %v4853_v22 = vadd.f32 %v4019_v46, %v3608_v14 }
 0x25a   :  { %v443_v15 = vpop.f32.mrf.mxu1 }
 0x25b   :  { %v4843_v50 = vadd.f32 %v3608_v14, %v443_v15 }
 0x25d   :  { %4038 = vmatprep.mubr.msk.f32.mxu1 %vm490_vm2, %v4843_v50 }
 0x25f   :  { %v4022_v16 = vpop.f32.mrf.mxu1 }
 0x260   :  { %v4857_v23 = vadd.f32 %v4022_v16, %v3608_v14 }
 0x261   :  { %v453_v17 = vpop.f32.mrf.mxu1 }
 0x262   :  { %v4863_v24 = vadd.f32 %v3608_v14, %v453_v17 }
 0x267   :  { %v4025_v18 = vpop.f32.mrf.mxu1 }
 0x268   :  { %v4847_v19 = vadd.f32 %v4025_v18, %v3608_v14 }
 0x269   :  { %v463_v20 = vpop.f32.mrf.mxu1 }
 0x26a   :  { %v4849_v21 = vadd.f32 %v3608_v14, %v463_v20  ;;  %488 = vrot.lane.b32.xlu0 %v4847_v19, %s4572_s30 }
 0x26c   :  { %486 = vrot.lane.b32.xlu1 %v4849_v21, %s4572_s30 }
 0x26e   :  { %480 = vrot.lane.b32.xlu0 %v4853_v22, %s4572_s30 }
 0x270   :  { %484 = vrot.lane.b32.xlu1 %v4857_v23, %s4572_s30 }
 0x272   :  { %699 = vrot.lane.b32.xlu0 %v4847_v19, %s4573_s4 }
 0x274   :  { %482 = vrot.lane.b32.xlu1 %v4863_v24, %s4572_s30 }
 0x276   :  { %695 = vrot.lane.b32.xlu0 %v4857_v23, %s4573_s4 }
 0x278   :  { %478 = vrot.lane.b32.xlu1 %v4843_v50, %s4572_s30 }
 0x27a   :  { %842 = vrot.lane.b32.xlu0 %v4847_v19, %s4574_s0 }
 0x27c   :  { %693 = vrot.lane.b32.xlu1 %v4863_v24, %s4573_s4 }
 0x280   :  { %691 = vrot.lane.b32.xlu1 %v4853_v22, %s4573_s4 }
 0x284   :  { %689 = vrot.lane.b32.xlu1 %v4843_v50, %s4573_s4 }
 0x288   :  { %697 = vrot.lane.b32.xlu1 %v4849_v21, %s4573_s4 }
 0x28c   :  { %840 = vrot.lane.b32.xlu1 %v4849_v21, %s4574_s0 }
 0x2dc   :  { %v489_v25 = vpop.permute.xlu0 %488 }
 0x2dd   :  { %4026 = vmatprep.subr.msk.mxu1 %vm490_vm2, %v489_v25 }
 0x2de   :  { %4027 = vmatpush3.xpose.msk.msra.mxu1 %vm490_vm2, %v489_v25  ;;  %v487_v26 = vpop.permute.xlu1 %486 }
 0x2df   :  { %4028 = vmatprep.subr.msk.mxu1 %vm490_vm2, %v487_v26 }
 0x2e0   :  { %v481_v27 = vpop.permute.xlu0 %480 }
 0x2e2   :  { %4029 = vmatpush3.xpose.msk.msra.mxu1 %vm490_vm2, %v487_v26  ;;  %v485_v28 = vpop.permute.xlu1 %484 }
 0x2e3   :  { %4030 = vmatprep.subr.msk.mxu1 %vm490_vm2, %v485_v28 }
 0x2e4   :  { %v700_v29 = vpop.permute.xlu0 %699 }
 0x2e5   :  { %4047 = vmatprep.subr.mxu0 %v700_v29 }
 0x2e6   :  { %4031 = vmatpush3.xpose.msk.msra.mxu1 %vm490_vm2, %v485_v28  ;;  %4048 = vmatpush3.msra.mxu0 %v700_v29  ;;  %v483_v31 = vpop.permute.xlu1 %482 }
 0x2e7   :  { %4032 = vmatprep.subr.msk.mxu1 %vm490_vm2, %v483_v31 }
 0x2e8   :  { %v696_v38 = vpop.permute.xlu0 %695 }
 0x2ea   :  { %4033 = vmatpush3.xpose.msk.msra.mxu1 %vm490_vm2, %v483_v31  ;;  %v479_v32 = vpop.permute.xlu1 %478 }
 0x2eb   :  { %4034 = vmatprep.subr.msk.mxu1 %vm490_vm2, %v481_v27 }
 0x2ec   :  { %v4907_v40 = vpop.permute.xlu0 %842 }
 0x2ee   :  { %4035 = vmatpush3.xpose.msk.msra.mxu1 %vm490_vm2, %v481_v27  ;;  %v694_v33 = vpop.permute.xlu1 %693 }
 0x2ef   :  { %4036 = vmatprep.subr.msk.mxu1 %vm490_vm2, %v479_v32 }
 0x2f2   :  { %4037 = vmatpush3.xpose.msk.msra.mxu1 %vm490_vm2, %v479_v32  ;;  %v692_v34 = vpop.permute.xlu1 %691 }
 0x2f5   :  { %4039 = vmatmul.mubr.msk.f32.vlgmr.msra.gmra.mxu1 %vm490_vm2, %v4853_v22 }
 0x2f6   :  { %4041 = vmatprep.mubr.msk.f32.mxu1 %vm490_vm2, %v4863_v24  ;;  %v690_v36 = vpop.permute.xlu1 %689 }
 0x2f9   :  { %4042 = vmatmul.mubr.msk.f32.gmra.mxu1 %vm490_vm2, %v4857_v23 }
 0x2fa   :  { %4044 = vmatprep.mubr.msk.f32.mxu1 %vm490_vm2, %v4849_v21  ;;  %v698_v37 = vpop.permute.xlu1 %697 }
 0x2fb   :  { %4049 = vmatprep.subr.mxu0 %v698_v37 }
 0x2fc   :  { %4050 = vmatpush3.msra.mxu0 %v698_v37 }
 0x2fd   :  { %4045 = vmatmul.mubr.msk.f32.gmra.mxu1 %vm490_vm2, %v4847_v19  ;;  %4051 = vmatprep.subr.mxu0 %v696_v38 }
 0x2fe   :  { %4052 = vmatpush3.msra.mxu0 %v696_v38  ;;  %v4957_v7 = vpop.permute.xlu1 %840 }
 0x2ff   :  { %4053 = vmatprep.subr.mxu0 %v694_v33 }
 0x300   :  { %4054 = vmatpush3.msra.mxu0 %v694_v33 }
 0x301   :  { %4055 = vmatprep.subr.mxu0 %v692_v34 }
 0x302   :  { %4056 = vmatpush3.msra.mxu0 %v692_v34 }
 0x303   :  { %4057 = vmatprep.subr.mxu0 %v690_v36 }
 0x304   :  { %4058 = vmatpush3.msra.mxu0 %v690_v36 }
 0x305   :  { %4068 = vmatprep.subr.msk.mxu0 %vm490_vm2, %v4907_v40 }
 0x3b5   :  { %v4040_v41 = vpop.f32.mrf.mxu1 }
 0x3b6   :  { %v611_v44 = vmul.f32 0.25, %v4040_v41 }
 0x3b7   :  { %v581_v45 = vpop.f32.mrf.mxu1 }
 0x3b8   :  { %v610_v48 = vmul.f32 0.25, %v581_v45  ;;  %v617_v49 = vadd.f32 %v611_v44, %v4914_v43 }
 0x3b9   :  { %v4043_v51 = vpop.f32.mrf.mxu1 }
 0x3ba   :  { %v613_v53 = vmul.f32 0.25, %v4043_v51  ;;  %v626_v54 = vsel %vm622_vm3, %v617_v49, -inf  ;;  %v616_v55 = vadd.f32 %v610_v48, %v4919_v47 }
 0x3bb   :  { %627 = vmax.xlane.f32.xlu1 %v626_v54  ;;  %v591_v56 = vpop.f32.mrf.mxu1 }
 0x3bc   :  { %v612_v57 = vmul.f32 0.25, %v591_v56  ;;  %v623_v30 = vsel %vm622_vm3, %v616_v55, -inf  ;;  %v619_v58 = vadd.f32 %v613_v53, %v4925_v52 }
 0x3bd   :  { %624 = vmax.xlane.f32.xlu0 %v623_v30  ;;  %v4046_v59 = vpop.f32.mrf.mxu1 }
 0x3be   :  { %v615_v61 = vmul.f32 0.25, %v4046_v59  ;;  %v632_v0 = vsel %vm622_vm3, %v619_v58, -inf  ;;  %v618_v2 = vadd.f32 %v612_v57, %v4939_v60 }
 0x3bf   :  { %v601_v62 = vpop.f32.mrf.mxu1 }
 0x3c0   :  { %v614_v63 = vmul.f32 0.25, %v601_v62  ;;  %v621_v1 = vadd.f32 %v615_v61, %v4934_v35  ;;  %v629_v5 = vsel %vm622_vm3, %v618_v2, -inf }
 0x3c1   :  { %633 = vmax.xlane.f32.xlu0 %v632_v0 }
 0x3c2   :  { %v638_v4 = vsel %vm622_vm3, %v621_v1, -inf  ;;  %v620_v39 = vadd.f32 %v614_v63, %v4947_v3 }
 0x3c3   :  { %639 = vmax.xlane.f32.xlu1 %v638_v4 }
 0x3c4   :  { %v635_v6 = vsel %vm622_vm3, %v620_v39, -inf }
 0x3c5   :  { %630 = vmax.xlane.f32.xlu0 %v629_v5 }
 0x3c9   :  { %636 = vmax.xlane.f32.xlu0 %v635_v6 }
 0x3d4   :  { %836 = vrot.lane.b32.xlu1 %v4863_v24, %s4574_s0 }
 0x3df   :  { %838 = vrot.lane.b32.xlu0 %v4857_v23, %s4574_s0 }
 0x444   :  { %v628_v42 = vpop.xlane.xlu1 %627 }
 0x445   :  { %v642_v8 = vsub.f32 %v617_v49, %v628_v42 }
 0x446   :  { %v625_v9 = vpop.xlane.xlu0 %624 }
 0x447   :  { %v649_v10 = vmul.f32 1.442695, %v642_v8  ;;  %v641_v11 = vsub.f32 %v616_v55, %v625_v9 }
 0x449   :  { %4372 = vpow2.f32 %v649_v10  ;;  %v647_v12 = vmul.f32 1.442695, %v641_v11 }
 0x44a   :  { %v634_v13 = vpop.xlane.xlu0 %633 }
 0x44b   :  { %4374 = vpow2.f32 %v647_v12  ;;  %v644_v46 = vsub.f32 %v619_v58, %v634_v13 }
 0x44c   :  { %v640_v34 = vpop.xlane.xlu1 %639 }
 0x44d   :  { %v653_v14 = vmul.f32 1.442695, %v644_v46  ;;  %v646_v36 = vsub.f32 %v621_v1, %v640_v34 }
 0x44e   :  { %v631_v15 = vpop.xlane.xlu0 %630 }
 0x44f   :  { %4376 = vpow2.f32 %v653_v14  ;;  %v643_v16 = vsub.f32 %v618_v2, %v631_v15  ;;  %v657_v38 = vmul.f32 1.442695, %v646_v36 }
 0x450   :  { %v837_v49 = vpop.permute.xlu1 %836 }
 0x451   :  { %v651_v17 = vmul.f32 1.442695, %v643_v16 }
 0x452   :  { %v637_v32 = vpop.xlane.xlu0 %636 }
 0x453   :  { %4378 = vpow2.f32 %v651_v17  ;;  %v645_v33 = vsub.f32 %v620_v39, %v637_v32 }
 0x455   :  { %v655_v37 = vmul.f32 1.442695, %v645_v33 }
 0x456   :  { %v4373_v18 = vpop.eup %4372  ;;  %v839_v51 = vpop.permute.xlu0 %838 }
 0x457   :  { %v662_v20 = vsel %vm622_vm3, %v4373_v18, 0.0  ;;  %4380 = vpow2.f32 %v655_v37 }
 0x458   :  { %v4375_v25 = vpop.eup %4374  ;;  %663 = vadd.xlane.f32.xlu1 %v662_v20  ;;  %4382 = vpow2.f32 %v657_v38 }
 0x459   :  { %v659_v26 = vsel %vm622_vm3, %v4375_v25, 0.0 }
 0x45a   :  { %660 = vadd.xlane.f32.xlu0 %v659_v26 }
 0x45c   :  { %v4377_v27 = vpop.eup %4376 }
 0x45d   :  { %v668_v28 = vsel %vm622_vm3, %v4377_v27, 0.0 }
 0x45e   :  { %669 = vadd.xlane.f32.xlu1 %v668_v28 }
 0x460   :  { %v4379_v29 = vpop.eup %4378 }
 0x461   :  { %v665_v31 = vsel %vm622_vm3, %v4379_v29, 0.0 }
 0x462   :  { %666 = vadd.xlane.f32.xlu0 %v665_v31 }
 0x464   :  { %v4381_v41 = vpop.eup %4380 }
 0x465   :  { %v671_v44 = vsel %vm622_vm3, %v4381_v41, 0.0  ;;  %v4383_v45 = vpop.eup %4382 }
 0x466   :  { %v674_v48 = vsel %vm622_vm3, %v4383_v45, 0.0 }
 0x46f   :  { %832 = vrot.lane.b32.xlu1 %v4843_v50, %s4574_s0 }
 0x478   :  { %834 = vrot.lane.b32.xlu0 %v4853_v22, %s4574_s0 }
 0x493   :  { %672 = vadd.xlane.f32.xlu1 %v671_v44 }
 0x497   :  { %675 = vadd.xlane.f32.xlu0 %v674_v48 }
 0x4a4   :  { %822 = vrot.lane.b32.xlu1 %v4853_v22, %s5802_s26 }
 0x4a8   :  { %826 = vrot.lane.b32.xlu1 %v4857_v23, %s5802_s26 }
 0x4ac   :  { %830 = vrot.lane.b32.xlu1 %v4847_v19, %s5802_s26 }
 0x4ad   :  { %820 = vrot.lane.b32.xlu0 %v4843_v50, %s5802_s26 }
 0x4b1   :  { %824 = vrot.lane.b32.xlu0 %v4863_v24, %s5802_s26 }
 0x4b5   :  { %828 = vrot.lane.b32.xlu0 %v4849_v21, %s5802_s26  ;;  %s5822_s26 = smov 16  }
 0x4e1   :  { %v664_v53 = vpop.xlane.xlu1 %663 }
 0x4e2   :  { %4384 = vrcp.f32 %v664_v53 }
 0x4e3   :  { %v661_v54 = vpop.xlane.xlu0 %660 }
 0x4e4   :  { %4386 = vrcp.f32 %v661_v54 }
 0x4e7   :  { %v670_v55 = vpop.xlane.xlu1 %669 }
 0x4e8   :  { %4388 = vrcp.f32 %v670_v55 }
 0x4eb   :  { %v667_v56 = vpop.xlane.xlu0 %666  ;;  %v833_v1 = vpop.permute.xlu1 %832 }
 0x4ec   :  { %4390 = vrcp.f32 %v667_v56 }
 0x4ef   :  { %v4385_v57 = vpop.eup %4384 }
 0x4f0   :  { %v684_v59 = vmul.f32 %v4385_v57, %v4373_v18 }
 0x4f1   :  { %v4387_v30 = vpop.eup %4386 }
 0x4f2   :  { %v683_v58 = vmul.f32 %v4387_v30, %v4375_v25 }
 0x4f4   :  { %4059 = vmatprep.mubr.msk.f32.mxu0 %vm622_vm3, %v683_v58 }
 0x4f5   :  { %4060 = vmatmul.mubr.msk.f32.vlgmr.msra.gmra.mxu0 %vm622_vm3, %v684_v59  ;;  %v4389_v61 = vpop.eup %4388 }
 0x4f6   :  { %4069 = vmatpush3.xpose.msk.msra.mxu0 %vm490_vm2, %v4907_v40  ;;  %v686_v0 = vmul.f32 %v4389_v61, %v4377_v27  ;;  %v835_v40 = vpop.permute.xlu0 %834 }
 0x4f7   :  { %4070 = vmatprep.subr.msk.mxu0 %vm490_vm2, %v4957_v7 }
 0x4f9   :  { %v4391_v62 = vpop.eup %4390 }
 0x4fa   :  { %4071 = vmatpush3.xpose.msk.msra.mxu0 %vm490_vm2, %v4957_v7  ;;  %v685_v63 = vmul.f32 %v4391_v62, %v4379_v29 }
 0x4fb   :  { %4072 = vmatprep.subr.msk.mxu0 %vm490_vm2, %v839_v51 }
 0x4fc   :  { %4062 = vmatprep.mubr.msk.f32.mxu0 %vm622_vm3, %v685_v63 }
 0x4fd   :  { %4063 = vmatmul.mubr.msk.f32.gmra.mxu0 %vm622_vm3, %v686_v0 }
 0x4fe   :  { %4073 = vmatpush3.xpose.msk.msra.mxu0 %vm490_vm2, %v839_v51 }
 0x4ff   :  { %4074 = vmatprep.subr.msk.mxu0 %vm490_vm2, %v837_v49 }
 0x502   :  { %4075 = vmatpush3.xpose.msk.msra.mxu0 %vm490_vm2, %v837_v49 }
 0x503   :  { %4076 = vmatprep.subr.msk.mxu0 %vm490_vm2, %v835_v40 }
 0x506   :  { %4077 = vmatpush3.xpose.msk.msra.mxu0 %vm490_vm2, %v835_v40 }
 0x507   :  { %4078 = vmatprep.subr.msk.mxu0 %vm490_vm2, %v833_v1 }
 0x50a   :  { %4079 = vmatpush3.xpose.msk.msra.mxu0 %vm490_vm2, %v833_v1 }
 0x51c   :  { %v673_v2 = vpop.xlane.xlu1 %672 }
 0x51d   :  { %4392 = vrcp.f32 %v673_v2 }
 0x520   :  { %v676_v4 = vpop.xlane.xlu0 %675  ;;  %v823_v8 = vpop.permute.xlu1 %822 }
 0x521   :  { %4394 = vrcp.f32 %v676_v4 }
 0x524   :  { %v821_v6 = vpop.permute.xlu0 %820  ;;  %v827_v10 = vpop.permute.xlu1 %826 }
 0x528   :  { %v825_v9 = vpop.permute.xlu0 %824  ;;  %v831_v12 = vpop.permute.xlu1 %830 }
 0x52a   :  { %v4393_v5 = vpop.eup %4392 }
 0x52b   :  { %v687_v39 = vmul.f32 %v4393_v5, %v4381_v41 }
 0x52c   :  { %v829_v11 = vpop.permute.xlu0 %828 }
 0x52d   :  { %4065 = vmatprep.mubr.msk.f32.mxu0 %vm622_vm3, %v687_v39 }
 0x52e   :  { %v4395_v7 = vpop.eup %4394 }
 0x52f   :  { %v688_v42 = vmul.f32 %v4395_v7, %v4383_v45 }
 0x531   :  { %4066 = vmatmul.mubr.msk.f32.gmra.mxu0 %vm622_vm3, %v688_v42 }
 0x532   :  { %4080 = vmatprep.mubr.msk.f32.mxu0 %vm490_vm2, %v821_v6 }
 0x535   :  { %4081 = vmatmul.mubr.msk.f32.vlgmr.msra.gmra.mxu0 %vm490_vm2, %v823_v8 }
 0x536   :  { %4083 = vmatprep.mubr.msk.f32.mxu0 %vm490_vm2, %v825_v9 }
 0x539   :  { %4084 = vmatmul.mubr.msk.f32.gmra.mxu0 %vm490_vm2, %v827_v10 }
 0x53a   :  { %4086 = vmatprep.mubr.msk.f32.mxu0 %vm490_vm2, %v829_v11 }
 0x53d   :  { %4087 = vmatmul.mubr.msk.f32.gmra.mxu0 %vm490_vm2, %v831_v12 }
 0x5b5   :  { %v5007_v13 = vpop.f32.mrf.mxu0 }
 0x5b7   :  { %v5009_v46 = vpop.f32.mrf.mxu0 }
 0x5bd   :  { %v5011_v14 = vpop.f32.mrf.mxu0 }
 0x5bf   :  { %v5013_v15 = vpop.f32.mrf.mxu0 }
 0x5f1   :  { %v5015_v16 = vpop.f32.mrf.mxu0 }
 0x5f3   :  { %v5017_v17 = vpop.f32.mrf.mxu0 }
 0x5f5   :  { %v4082_v18 = vpop.f32.mrf.mxu0 }
 0x5f6   :  { %v964_v20 = vmul.f32 0.25, %v4082_v18 }
 0x5f7   :  { %v934_v25 = vpop.f32.mrf.mxu0 }
 0x5f8   :  { %v963_v26 = vmul.f32 0.25, %v934_v25  ;;  %v970_v27 = vadd.f32 %v964_v20, %v4914_v43 }
 0x5f9   :  { %v4085_v28 = vpop.f32.mrf.mxu0 }
 0x5fa   :  { %v966_v29 = vmul.f32 0.25, %v4085_v28  ;;  %v978_v31 = vsel %vm622_vm3, %v970_v27, -inf  ;;  %v969_v32 = vadd.f32 %v963_v26, %v4919_v47 }
 0x5fb   :  { %979 = vmax.xlane.f32.xlu1 %v978_v31  ;;  %v944_v33 = vpop.f32.mrf.mxu0 }
 0x5fc   :  { %v965_v34 = vmul.f32 0.25, %v944_v33  ;;  %v975_v36 = vsel %vm622_vm3, %v969_v32, -inf  ;;  %v972_v37 = vadd.f32 %v966_v29, %v4925_v52 }
 0x5fd   :  { %976 = vmax.xlane.f32.xlu0 %v975_v36  ;;  %v4088_v38 = vpop.f32.mrf.mxu0 }
 0x5fe   :  { %v968_v41 = vmul.f32 0.25, %v4088_v38  ;;  %v984_v43 = vsel %vm622_vm3, %v972_v37, -inf  ;;  %v971_v49 = vadd.f32 %v965_v34, %v4939_v60 }
 0x5ff   :  { %v954_v44 = vpop.f32.mrf.mxu0 }
 0x600   :  { %v967_v45 = vmul.f32 0.25, %v954_v44  ;;  %v974_v48 = vadd.f32 %v968_v41, %v4934_v35  ;;  %v981_v51 = vsel %vm622_vm3, %v971_v49, -inf }
 0x601   :  { %985 = vmax.xlane.f32.xlu0 %v984_v43 }
 0x602   :  { %v990_v47 = vsel %vm622_vm3, %v974_v48, -inf  ;;  %v973_v53 = vadd.f32 %v967_v45, %v4947_v3 }
 0x603   :  { %991 = vmax.xlane.f32.xlu1 %v990_v47  ;;  %v1205_v47 = vld [vmem:[%s5778_s8 + $0x18] sm:$0xff] }
 0x604   :  { %v987_v52 = vsel %vm622_vm3, %v973_v53, -inf }
 0x605   :  { %982 = vmax.xlane.f32.xlu0 %v981_v51  ;;  %v1204_v51 = vld [vmem:[%s5778_s8 + $0x10] sm:$0xff] }
 0x609   :  { %988 = vmax.xlane.f32.xlu0 %v987_v52  ;;  %v1202_v52 = vld [vmem:[%s5778_s8] sm:$0xff] }
 0x614   :  { %1049 = vrot.lane.b32.xlu1 %v4849_v21, %s5800_s29 }
 0x618   :  { %1047 = vrot.lane.b32.xlu1 %v4857_v23, %s5800_s29 }
 0x61c   :  { %1045 = vrot.lane.b32.xlu1 %v4863_v24, %s5800_s29 }
 0x61f   :  { %1051 = vrot.lane.b32.xlu0 %v4847_v19, %s5800_s29 }
 0x684   :  { %v980_v35 = vpop.xlane.xlu1 %979 }
 0x685   :  { %v994_v60 = vsub.f32 %v970_v27, %v980_v35 }
 0x686   :  { %v977_v3 = vpop.xlane.xlu0 %976 }
 0x687   :  { %v1001_v54 = vmul.f32 1.442695, %v994_v60  ;;  %v993_v55 = vsub.f32 %v969_v32, %v977_v3 }
 0x689   :  { %4396 = vpow2.f32 %v1001_v54  ;;  %v999_v56 = vmul.f32 1.442695, %v993_v55 }
 0x68a   :  { %v986_v57 = vpop.xlane.xlu0 %985 }
 0x68b   :  { %4398 = vpow2.f32 %v999_v56  ;;  %v996_v30 = vsub.f32 %v972_v37, %v986_v57 }
 0x68c   :  { %v992_v21 = vpop.xlane.xlu1 %991 }
 0x68d   :  { %v1005_v58 = vmul.f32 1.442695, %v996_v30  ;;  %v998_v59 = vsub.f32 %v974_v48, %v992_v21 }
 0x68e   :  { %v983_v23 = vpop.xlane.xlu0 %982 }
 0x68f   :  { %4400 = vpow2.f32 %v1005_v58  ;;  %v1009_v61 = vmul.f32 1.442695, %v998_v59  ;;  %v995_v24 = vsub.f32 %v971_v49, %v983_v23 }
 0x690   :  { %v1050_v62 = vpop.permute.xlu1 %1049 }
 0x691   :  { %4402 = vpow2.f32 %v1009_v61  ;;  %v1003_v19 = vmul.f32 1.442695, %v995_v24 }
 0x692   :  { %v989_v63 = vpop.xlane.xlu0 %988 }
 0x693   :  { %4404 = vpow2.f32 %v1003_v19  ;;  %v997_v0 = vsub.f32 %v973_v53, %v989_v63  ;;  %v1203_v53 = vld [vmem:[%s5778_s8 + $0x8] sm:$0xff] }
 0x694   :  { %v1048_v2 = vpop.permute.xlu1 %1047  ;;  %v4532_v63 = vld [vmem:[#allocation2 + $0x8] sm:$0xff] }
 0x695   :  { %v1007_v40 = vmul.f32 1.442695, %v997_v0 }
 0x696   :  { %v4397_v1 = vpop.eup %4396  ;;  %v1052_v4 = vpop.permute.xlu0 %1051 }
 0x697   :  { %4406 = vpow2.f32 %v1007_v40  ;;  %4089 = vmatprep.subr.mxu1 %v1052_v4  ;;  %v1014_v5 = vsel %vm622_vm3, %v4397_v1, 0.0 }
 0x698   :  { %v4399_v39 = vpop.eup %4398  ;;  %4090 = vmatpush3.msra.mxu1 %v1052_v4  ;;  %1015 = vadd.xlane.f32.xlu1 %v1014_v5  ;;  %v1046_v42 = vpop.permute.xlu1 %1045 }
 0x699   :  { %4091 = vmatprep.subr.mxu1 %v1050_v62  ;;  %v1011_v6 = vsel %vm622_vm3, %v4399_v39, 0.0 }
 0x69a   :  { %1012 = vadd.xlane.f32.xlu0 %v1011_v6  ;;  %4092 = vmatpush3.msra.mxu1 %v1050_v62 }
 0x69b   :  { %4093 = vmatprep.subr.mxu1 %v1048_v2 }
 0x69c   :  { %v4401_v7 = vpop.eup %4400  ;;  %4094 = vmatpush3.msra.mxu1 %v1048_v2  ;;  %v4533_v2 = vld [vmem:[#allocation2] sm:$0xff] }
 0x69d   :  { %4095 = vmatprep.subr.mxu1 %v1046_v42  ;;  %v1020_v8 = vsel %vm622_vm3, %v4401_v7, 0.0 }
 0x69e   :  { %v4403_v9 = vpop.eup %4402  ;;  %1021 = vadd.xlane.f32.xlu1 %v1020_v8  ;;  %4096 = vmatpush3.msra.mxu1 %v1046_v42  ;;  %v4535_v42 = vld [vmem:[#allocation2 + $0x10] sm:$0xff] }
 0x69f   :  { %v1026_v12 = vsel %vm622_vm3, %v4403_v9, 0.0 }
 0x6a0   :  { %v4405_v10 = vpop.eup %4404 }
 0x6a1   :  { %v1017_v11 = vsel %vm622_vm3, %v4405_v10, 0.0 }
 0x6a2   :  { %1018 = vadd.xlane.f32.xlu0 %v1017_v11  ;;  %1027 = vadd.xlane.f32.xlu1 %v1026_v12  ;;  %v4536_v11 = vld [vmem:[#allocation2 + $0x28] sm:$0xff] }
 0x6a4   :  { %v4407_v18 = vpop.eup %4406 }
 0x6a5   :  { %v1023_v20 = vsel %vm622_vm3, %v4407_v18, 0.0 }
 0x6a6   :  { %1024 = vadd.xlane.f32.xlu0 %v1023_v20 }
 0x6b3   :  { %1041 = vrot.lane.b32.xlu1 %v4843_v50, %s5800_s29 }
 0x6bc   :  { %1043 = vrot.lane.b32.xlu0 %v4853_v22, %s5800_s29 }
 0x721   :  { %v1016_v25 = vpop.xlane.xlu1 %1015 }
 0x723   :  { %v1013_v26 = vpop.xlane.xlu0 %1012 }
 0x724   :  { %4408 = vrcp.f32 %v1013_v26 }
 0x725   :  { %4410 = vrcp.f32 %v1016_v25  ;;  %v4537_v25 = vld [vmem:[#allocation2 + $0x20] sm:$0xff] }
 0x727   :  { %v1022_v27 = vpop.xlane.xlu1 %1021 }
 0x728   :  { %4412 = vrcp.f32 %v1022_v27 }
 0x72b   :  { %v1019_v28 = vpop.xlane.xlu0 %1018  ;;  %v1028_v29 = vpop.xlane.xlu1 %1027 }
 0x72c   :  { %4414 = vrcp.f32 %v1019_v28 }
 0x72d   :  { %4416 = vrcp.f32 %v1028_v29 }
 0x72f   :  { %v1025_v31 = vpop.xlane.xlu0 %1024  ;;  %v1042_v50 = vpop.permute.xlu1 %1041 }
 0x730   :  { %4418 = vrcp.f32 %v1025_v31 }
 0x731   :  { %v4409_v32 = vpop.eup %4408 }
 0x732   :  { %v1035_v33 = vmul.f32 %v4409_v32, %v4399_v39  ;;  %v4411_v34 = vpop.eup %4410 }
 0x733   :  { %v1044_v36 = vpop.permute.xlu0 %1043  ;;  %v1036_v22 = vmul.f32 %v4411_v34, %v4397_v1 }
 0x734   :  { %4097 = vmatprep.subr.mxu1 %v1044_v36  ;;  %4101 = vmatprep.mubr.msk.f32.mxu1 %vm622_vm3, %v1035_v33 }
 0x735   :  { %4098 = vmatpush3.msra.mxu1 %v1044_v36  ;;  %v4413_v37 = vpop.eup %4412 }
 0x736   :  { %4099 = vmatprep.subr.mxu1 %v1042_v50  ;;  %v1038_v44 = vmul.f32 %v4413_v37, %v4401_v7 }
 0x737   :  { %4100 = vmatpush3.msra.mxu1 %v1042_v50 }
 0x738   :  { %4102 = vmatmul.mubr.msk.f32.vlgmr.msra.gmra.mxu1 %vm622_vm3, %v1036_v22  ;;  %4110 = vmatprep.subr.mxu1 %v1205_v47 }
 0x739   :  { %v4415_v38 = vpop.eup %4414  ;;  %4111 = vmatpush3.msra.mxu1 %v1205_v47 }
 0x73a   :  { %v1037_v41 = vmul.f32 %v4415_v38, %v4405_v10  ;;  %v4417_v45 = vpop.eup %4416  ;;  %4112 = vmatprep.subr.mxu1 %v1204_v51 }
 0x73b   :  { %v1040_v49 = vmul.f32 %v4417_v45, %v4403_v9  ;;  %4113 = vmatpush3.msra.mxu1 %v1204_v51 }
 0x73c   :  { %4104 = vmatprep.mubr.msk.f32.mxu1 %vm622_vm3, %v1037_v41  ;;  %4114 = vmatprep.subr.mxu1 %v1203_v53 }
 0x73d   :  { %v4419_v43 = vpop.eup %4418  ;;  %4105 = vmatmul.mubr.msk.f32.gmra.mxu1 %vm622_vm3, %v1038_v44 }
 0x73e   :  { %v1039_v48 = vmul.f32 %v4419_v43, %v4407_v18  ;;  %4115 = vmatpush3.msra.mxu1 %v1203_v53 }
 0x73f   :  { %4116 = vmatprep.subr.mxu1 %v1202_v52 }
 0x740   :  { %4107 = vmatprep.mubr.msk.f32.mxu1 %vm622_vm3, %v1039_v48  ;;  %4117 = vmatpush3.msra.mxu1 %v1202_v52 }
 0x741   :  { %4108 = vmatmul.mubr.msk.f32.gmra.mxu1 %vm622_vm3, %v1040_v49 }
 0x7f8   :  { %v4103_v35 = vpop.f32.mrf.mxu1 }
 0x7f9   :  { %1180 = vrot.lane.b32.xlu1 %v4103_v35, %s5804_s27 }
 0x7fa   :  { %v1143_v60 = vpop.f32.mrf.mxu1 }
 0x7fb   :  { %1178 = vrot.lane.b32.xlu0 %v1143_v60, %s5804_s27 }
 0x7fd   :  { %v4106_v3 = vpop.f32.mrf.mxu1 }
 0x7fe   :  { %1184 = vrot.lane.b32.xlu1 %v4106_v3, %s5804_s27 }
 0x7ff   :  { %v1153_v54 = vpop.f32.mrf.mxu1 }
 0x800   :  { %1182 = vrot.lane.b32.xlu0 %v1153_v54, %s5804_s27  ;;  %v1475_v54 = vld [vmem:[%s5782_s12 + $0x18] sm:$0xff] }
 0x801   :  { %v4109_v55 = vpop.f32.mrf.mxu1  ;;  %4127 = vmatprep.subr.mxu0 %v1475_v54 }
 0x802   :  { %1188 = vrot.lane.b32.xlu1 %v4109_v55, %s5804_s27  ;;  %4128 = vmatpush3.msra.mxu0 %v1475_v54  ;;  %v1474_v55 = vld [vmem:[%s5782_s12 + $0x10] sm:$0xff] }
 0x803   :  { %v1163_v56 = vpop.f32.mrf.mxu1  ;;  %4129 = vmatprep.subr.mxu0 %v1474_v55 }
 0x804   :  { %1186 = vrot.lane.b32.xlu0 %v1163_v56, %s5804_s27  ;;  %v1473_v56 = vld [vmem:[%s5782_s12 + $0x8] sm:$0xff]  ;;  %4130 = vmatpush3.msra.mxu0 %v1474_v55 }
 0x805   :  { %4131 = vmatprep.subr.mxu0 %v1473_v56 }
 0x806   :  { %4132 = vmatpush3.msra.mxu0 %v1473_v56 }
 0x86b   :  { %v1181_v57 = vpop.permute.xlu1 %1180 }
 0x86c   :  { %v1197_v58 = vsel %vm490_vm2, %v5007_v13, %v1181_v57  ;;  %v1472_v57 = vld [vmem:[%s5782_s12] sm:$0xff] }
 0x86d   :  { %v1179_v30 = vpop.permute.xlu0 %1178  ;;  %4133 = vmatprep.subr.mxu0 %v1472_v57 }
 0x86e   :  { %v1196_v21 = vsel %vm490_vm2, %v5009_v46, %v1179_v30  ;;  %4134 = vmatpush3.msra.mxu0 %v1472_v57  ;;  %v3659_v57 = vld [vmem:[%s5781_s11] ss:$0 sm:$0xff] }
 0x86f   :  { %4118 = vmatprep.mubr.msk.f32.mxu1 %vm206_vm1, %v1196_v21 }
 0x870   :  { %4119 = vmatmul.mubr.msk.f32.vlgmr.msra.gmra.mxu1 %vm206_vm1, %v1197_v58  ;;  %v1185_v59 = vpop.permute.xlu1 %1184 }
 0x871   :  { %v1199_v24 = vsel %vm490_vm2, %v5011_v14, %v1185_v59  ;;  %v3657_v14 = vld [vmem:[%s5779_s9] ss:$0 sm:$0xff] }
 0x872   :  { %v1183_v23 = vpop.permute.xlu0 %1182 }
 0x873   :  { %v1198_v61 = vsel %vm490_vm2, %v5013_v15, %v1183_v23 }
 0x874   :  { %4121 = vmatprep.mubr.msk.f32.mxu1 %vm206_vm1, %v1198_v61  ;;  %v1189_v62 = vpop.permute.xlu1 %1188 }
 0x875   :  { %4122 = vmatmul.mubr.msk.f32.gmra.mxu1 %vm206_vm1, %v1199_v24  ;;  %v1201_v19 = vsel %vm490_vm2, %v5015_v16, %v1189_v62  ;;  %v4534_v16 = vld [vmem:[#allocation2 + $0x18] sm:$0xff] }
 0x876   :  { %v1187_v46 = vpop.permute.xlu0 %1186 }
 0x877   :  { %v1200_v13 = vsel %vm490_vm2, %v5017_v17, %v1187_v46 }
 0x878   :  { %4124 = vmatprep.mubr.msk.f32.mxu1 %vm206_vm1, %v1200_v13 }
 0x879   :  { %4125 = vmatmul.mubr.msk.f32.gmra.mxu1 %vm206_vm1, %v1201_v19 }
 0x930   :  { %v4120_v15 = vpop.f32.mrf.mxu1 }
 0x931   :  { %v1320_v0 = vadd.f32 %v4532_v63, %v4120_v15 }
 0x932   :  { %v1290_v40 = vpop.f32.mrf.mxu1 }
 0x933   :  { %v1333_v1 = vadd.f32 %v3657_v14, %v1320_v0  ;;  %v1319_v4 = vadd.f32 %v4533_v2, %v1290_v40 }
 0x935   :  { %1339 = vst.msk [vmem:[#allocation2 + $0x8] sm:$0xff] %vm206_vm1, %v1333_v1  ;;  %v1332_v17 = vadd.f32 %v3657_v14, %v1319_v4  ;;  %v4123_v5 = vpop.f32.mrf.mxu1 }
 0x936   :  { %v1322_v39 = vadd.f32 %v4534_v16, %v4123_v5 }
 0x937   :  { %1338 = vst.msk [vmem:[#allocation2] sm:$0xff] %vm206_vm1, %v1332_v17  ;;  %v1300_v6 = vpop.f32.mrf.mxu1 }
 0x938   :  { %v1335_v7 = vadd.f32 %v3657_v14, %v1322_v39  ;;  %v1321_v8 = vadd.f32 %v4535_v42, %v1300_v6 }
 0x939   :  { %v4126_v9 = vpop.f32.mrf.mxu1 }
 0x93a   :  { %1341 = vst.msk [vmem:[#allocation2 + $0x18] sm:$0xff] %vm206_vm1, %v1335_v7  ;;  %v1334_v10 = vadd.f32 %v3657_v14, %v1321_v8  ;;  %v1324_v12 = vadd.f32 %v4536_v11, %v4126_v9 }
 0x93b   :  { %v1310_v18 = vpop.f32.mrf.mxu1 }
 0x93c   :  { %1340 = vst.msk [vmem:[#allocation2 + $0x10] sm:$0xff] %vm206_vm1, %v1334_v10  ;;  %v1337_v20 = vadd.f32 %v3657_v14, %v1324_v12  ;;  %v1323_v26 = vadd.f32 %v4537_v25, %v1310_v18  ;;  %v5098_v27 = vld [vmem:[#allocation2 + $0x8] sm:$0xff] }
 0x93d   :  { %v1355_v28 = vsel %vm206_vm1, %v5098_v27, 0.0  ;;  %v1377_v33 = vmul.f32 %v5098_v27, %v5098_v27 }
 0x93e   :  { %1343 = vst.msk [vmem:[#allocation2 + $0x28] sm:$0xff] %vm206_vm1, %v1337_v20  ;;  %v1336_v29 = vadd.f32 %v3657_v14, %v1323_v26  ;;  %1356 = vadd.xlane.f32.xlu1 %v1355_v28  ;;  %v5103_v31 = vld [vmem:[#allocation2] sm:$0xff] }
 0x93f   :  { %v1352_v32 = vsel %vm206_vm1, %v5103_v31, 0.0  ;;  %v1385_v22 = vsel %vm206_vm1, %v1377_v33, 0.0  ;;  %v1376_v37 = vmul.f32 %v5103_v31, %v5103_v31 }
 0x940   :  { %1342 = vst.msk [vmem:[#allocation2 + $0x20] sm:$0xff] %vm206_vm1, %v1336_v29  ;;  %1353 = vadd.xlane.f32.xlu0 %v1352_v32 }
 0x941   :  { %v5110_v34 = vld [vmem:[#allocation2 + $0x18] sm:$0xff]  ;;  %v1382_v41 = vsel %vm206_vm1, %v1376_v37, 0.0 }
 0x942   :  { %v1361_v36 = vsel %vm206_vm1, %v5110_v34, 0.0  ;;  %v1379_v50 = vmul.f32 %v5110_v34, %v5110_v34 }
 0x943   :  { %1362 = vadd.xlane.f32.xlu1 %v1361_v36  ;;  %v5123_v45 = vld [vmem:[#allocation2 + $0x10] sm:$0xff] }
 0x944   :  { %1386 = vadd.xlane.f32.xlu0 %v1385_v22  ;;  %v1391_v38 = vsel %vm206_vm1, %v1379_v50, 0.0  ;;  %v1358_v49 = vsel %vm206_vm1, %v5123_v45, 0.0  ;;  %v1378_v47 = vmul.f32 %v5123_v45, %v5123_v45 }
 0x945   :  { %v5121_v44 = vld [vmem:[#allocation2 + $0x28] sm:$0xff] }
 0x946   :  { %v1367_v43 = vsel %vm206_vm1, %v5121_v44, 0.0  ;;  %v1381_v48 = vmul.f32 %v5121_v44, %v5121_v44  ;;  %v1388_v53 = vsel %vm206_vm1, %v1378_v47, 0.0 }
 0x947   :  { %1392 = vadd.xlane.f32.xlu1 %v1391_v38  ;;  %v5135_v52 = vld [vmem:[#allocation2 + $0x20] sm:$0xff] }
 0x948   :  { %1383 = vadd.xlane.f32.xlu0 %v1382_v41  ;;  %v1397_v51 = vsel %vm206_vm1, %v1381_v48, 0.0  ;;  %v1364_v35 = vsel %vm206_vm1, %v5135_v52, 0.0  ;;  %v1380_v60 = vmul.f32 %v5135_v52, %v5135_v52 }
 0x94a   :  { %v1394_v3 = vsel %vm206_vm1, %v1380_v60, 0.0 }
 0x94b   :  { %1368 = vadd.xlane.f32.xlu1 %v1367_v43 }
 0x94c   :  { %1359 = vadd.xlane.f32.xlu0 %v1358_v49 }
 0x94f   :  { %1398 = vadd.xlane.f32.xlu1 %v1397_v51 }
 0x950   :  { %1389 = vadd.xlane.f32.xlu0 %v1388_v53 }
 0x954   :  { %1365 = vadd.xlane.f32.xlu0 %v1364_v35  ;;  %v3658_v35 = vld [vmem:[%s5780_s10] ss:$0 sm:$0xff] }
 0x958   :  { %1395 = vadd.xlane.f32.xlu0 %v1394_v3 }
 0x9c7   :  { %v1357_v30 = vpop.xlane.xlu1 %1356 }
 0x9c8   :  { %v1371_v58 = vmul.f32 0.03125, %v1357_v30 }
 0x9c9   :  { %v1354_v21 = vpop.xlane.xlu0 %1353 }
 0x9ca   :  { %v1407_v24 = vmul.f32 %v1371_v58, %v1371_v58  ;;  %v1370_v62 = vmul.f32 0.03125, %v1354_v21  ;;  %v1425_v48 = vsub.f32 %v5098_v27, %v1371_v58 }
 0x9cc   :  { %v1363_v59 = vpop.xlane.xlu1 %1362  ;;  %v1406_v0 = vmul.f32 %v1370_v62, %v1370_v62  ;;  %v1424_v51 = vsub.f32 %v5103_v31, %v1370_v62 }
 0x9cd   :  { %v5154_v23 = vmul.f32 0.03125, %v1363_v59  ;;  %v1387_v61 = vpop.xlane.xlu0 %1386 }
 0x9ce   :  { %v1401_v46 = vmul.f32 0.03125, %v1387_v61 }
 0x9cf   :  { %v1409_v15 = vmul.f32 %v5154_v23, %v5154_v23  ;;  %v1427_v21 = vsub.f32 %v5110_v34, %v5154_v23 }
 0x9d0   :  { %v1413_v13 = vsub.f32 %v1401_v46, %v1407_v24  ;;  %v1393_v19 = vpop.xlane.xlu1 %1392 }
 0x9d1   :  { %v1403_v14 = vmul.f32 0.03125, %v1393_v19  ;;  %v1384_v63 = vpop.xlane.xlu0 %1383 }
 0x9d2   :  { %v1419_v40 = vmax.f32 %v1413_v13, 0.0  ;;  %v1400_v1 = vmul.f32 0.03125, %v1384_v63 }
 0x9d3   :  { %v1415_v2 = vsub.f32 %v1403_v14, %v1409_v15 }
 0x9d4   :  { %v1431_v4 = vadd.f32 1e-12, %v1419_v40  ;;  %v1412_v17 = vsub.f32 %v1400_v1, %v1406_v0  ;;  %v1369_v5 = vpop.xlane.xlu1 %1368 }
 0x9d5   :  { %v1421_v16 = vmax.f32 %v1415_v2, 0.0  ;;  %v1375_v39 = vmul.f32 0.03125, %v1369_v5  ;;  %v1360_v6 = vpop.xlane.xlu0 %1359 }
 0x9d6   :  { %4420 = vrsqrt.f32 %v1431_v4  ;;  %v1418_v7 = vmax.f32 %v1412_v17, 0.0  ;;  %v1372_v42 = vmul.f32 0.03125, %v1360_v6  ;;  %v1656_v6 = vld [vmem:[%s5784_s14 + $0x30] sm:$0xff] }
 0x9d7   :  { %v1433_v10 = vadd.f32 1e-12, %v1421_v16  ;;  %v1411_v11 = vmul.f32 %v1375_v39, %v1375_v39  ;;  %v1429_v14 = vsub.f32 %v5121_v44, %v1375_v39  ;;  %v1657_v39 = vld [vmem:[%s5784_s14 + $0x38] sm:$0xff] }
 0x9d8   :  { %v1430_v8 = vadd.f32 1e-12, %v1418_v7  ;;  %v1399_v9 = vpop.xlane.xlu1 %1398  ;;  %v1408_v20 = vmul.f32 %v1372_v42, %v1372_v42  ;;  %v1426_v24 = vsub.f32 %v5123_v45, %v1372_v42  ;;  %4144 = vmatprep.subr.mxu1 %v1657_v39  ;;  %v1655_v7 = vld [vmem:[%s5784_s14 + $0x28] sm:$0xff]  ;;  %v1654_v42 = vld [vmem:[%s5784_s14 + $0x20] sm:$0xff] }
 0x9d9   :  { %v1405_v12 = vmul.f32 0.03125, %v1399_v9  ;;  %v1390_v18 = vpop.xlane.xlu0 %1389  ;;  %4145 = vmatpush3.msra.mxu1 %v1657_v39  ;;  %v1652_v9 = vld [vmem:[%s5784_s14 + $0x10] sm:$0xff] }
 0x9da   :  { %4422 = vrsqrt.f32 %v1430_v8  ;;  %v1402_v25 = vmul.f32 0.03125, %v1390_v18  ;;  %4146 = vmatprep.subr.mxu1 %v1656_v6  ;;  %v1653_v8 = vld [vmem:[%s5784_s14 + $0x18] sm:$0xff] }
 0x9db   :  { %v1417_v26 = vsub.f32 %v1405_v12, %v1411_v11  ;;  %4424 = vrsqrt.f32 %v1433_v10  ;;  %4147 = vmatpush3.msra.mxu1 %v1656_v6  ;;  %v1651_v10 = vld [vmem:[%s5784_s14 + $0x8] sm:$0xff]  ;;  %v1650_v11 = vld [vmem:[%s5784_s14] sm:$0xff] }
 0x9dc   :  { %v1414_v28 = vsub.f32 %v1402_v25, %v1408_v20  ;;  %4148 = vmatprep.subr.mxu1 %v1655_v7  ;;  %v3660_v12 = vld [vmem:[%s5783_s13] ss:$0 sm:$0xff] }
 0x9dd   :  { %v1423_v29 = vmax.f32 %v1417_v26, 0.0  ;;  %v1366_v32 = vpop.xlane.xlu0 %1365  ;;  %4149 = vmatpush3.msra.mxu1 %v1655_v7 }
 0x9de   :  { %v1420_v33 = vmax.f32 %v1414_v28, 0.0  ;;  %v1374_v36 = vmul.f32 0.03125, %v1366_v32  ;;  %4150 = vmatprep.subr.mxu1 %v1654_v42 }
 0x9df   :  { %v1435_v22 = vadd.f32 1e-12, %v1423_v29  ;;  %4151 = vmatpush3.msra.mxu1 %v1654_v42 }
 0x9e0   :  { %v1432_v50 = vadd.f32 1e-12, %v1420_v33  ;;  %v1410_v38 = vmul.f32 %v1374_v36, %v1374_v36  ;;  %v1428_v23 = vsub.f32 %v5135_v52, %v1374_v36  ;;  %4152 = vmatprep.subr.mxu1 %v1653_v8 }
 0x9e1   :  { %v1396_v37 = vpop.xlane.xlu0 %1395  ;;  %4153 = vmatpush3.msra.mxu1 %v1653_v8 }
 0x9e2   :  { %4426 = vrsqrt.f32 %v1432_v50  ;;  %v1404_v41 = vmul.f32 0.03125, %v1396_v37  ;;  %4154 = vmatprep.subr.mxu1 %v1652_v9 }
 0x9e3   :  { %v4421_v43 = vpop.eup %4420  ;;  %4428 = vrsqrt.f32 %v1435_v22  ;;  %4155 = vmatpush3.msra.mxu1 %v1652_v9 }
 0x9e4   :  { %v1416_v49 = vsub.f32 %v1404_v41, %v1410_v38  ;;  %v1443_v47 = vmul.f32 %v4421_v43, %v1425_v48  ;;  %4156 = vmatprep.subr.mxu1 %v1651_v10 }
 0x9e5   :  { %4157 = vmatpush3.msra.mxu1 %v1651_v10 }
 0x9e6   :  { %v1422_v53 = vmax.f32 %v1416_v49, 0.0  ;;  %v1455_v55 = vmul.f32 %v3658_v35, %v1443_v47  ;;  %4158 = vmatprep.subr.mxu1 %v1650_v11 }
 0x9e7   :  { %v4423_v60 = vpop.eup %4422  ;;  %4159 = vmatpush3.msra.mxu1 %v1650_v11 }
 0x9e8   :  { %v1434_v3 = vadd.f32 1e-12, %v1422_v53  ;;  %v1442_v54 = vmul.f32 %v4423_v60, %v1424_v51  ;;  %v4425_v56 = vpop.eup %4424  ;;  %v1467_v59 = vadd.f32 %v3659_v57, %v1455_v55 }
 0x9e9   :  { %v1445_v61 = vmul.f32 %v4425_v56, %v1427_v21 }
 0x9ea   :  { %4430 = vrsqrt.f32 %v1434_v3  ;;  %v1454_v30 = vmul.f32 %v3658_v35, %v1442_v54 }
 0x9eb   :  { %v1457_v13 = vmul.f32 %v3658_v35, %v1445_v61 }
 0x9ec   :  { %v1466_v58 = vadd.f32 %v3659_v57, %v1454_v30 }
 0x9ed   :  { %v1469_v0 = vadd.f32 %v3659_v57, %v1457_v13 }
 0x9ee   :  { %4135 = vmatprep.mubr.msk.f32.mxu0 %vm206_vm1, %v1466_v58 }
 0x9ef   :  { %v4427_v62 = vpop.eup %4426  ;;  %4136 = vmatmul.mubr.msk.f32.vlgmr.msra.gmra.mxu0 %vm206_vm1, %v1467_v59 }
 0x9f0   :  { %v1444_v46 = vmul.f32 %v4427_v62, %v1426_v24  ;;  %v4429_v19 = vpop.eup %4428 }
 0x9f1   :  { %v1447_v40 = vmul.f32 %v4429_v19, %v1429_v14 }
 0x9f2   :  { %v1456_v15 = vmul.f32 %v3658_v35, %v1444_v46 }
 0x9f3   :  { %v1459_v4 = vmul.f32 %v3658_v35, %v1447_v40 }
 0x9f4   :  { %v1468_v63 = vadd.f32 %v3659_v57, %v1456_v15 }
 0x9f5   :  { %v1471_v16 = vadd.f32 %v3659_v57, %v1459_v4 }
 0x9f6   :  { %4138 = vmatprep.mubr.msk.f32.mxu0 %vm206_vm1, %v1468_v63 }
 0x9f7   :  { %v4431_v1 = vpop.eup %4430  ;;  %4139 = vmatmul.mubr.msk.f32.gmra.mxu0 %vm206_vm1, %v1469_v0 }
 0x9f8   :  { %v1446_v2 = vmul.f32 %v4431_v1, %v1428_v23 }
 0x9fa   :  { %v1458_v17 = vmul.f32 %v3658_v35, %v1446_v2 }
 0x9fc   :  { %v1470_v5 = vadd.f32 %v3659_v57, %v1458_v17 }
 0x9fe   :  { %4141 = vmatprep.mubr.msk.f32.mxu0 %vm206_vm1, %v1470_v5 }
 0x9ff   :  { %4142 = vmatmul.mubr.msk.f32.gmra.mxu0 %vm206_vm1, %v1471_v16 }
 0xaaf   :  { %v4137_v18 = vpop.f32.mrf.mxu0 }
 0xab0   :  { %v1573_v20 = vadd.f32 %v4137_v18, %v3660_v12 }
 0xab1   :  { %v1567_v25 = vpop.f32.mrf.mxu0 }
 0xab2   :  { %v1597_v26 = vmul.f32 %v1573_v20, %v1573_v20  ;;  %v1568_v28 = vadd.f32 %v3660_v12, %v1567_v25 }
 0xab4   :  { %v1603_v29 = vmul.f32 %v1597_v26, %v1573_v20  ;;  %v1596_v32 = vmul.f32 %v1568_v28, %v1568_v28 }
 0xab6   :  { %v1609_v33 = vmul.f32 0.044715, %v1603_v29  ;;  %v1602_v36 = vmul.f32 %v1596_v32, %v1568_v28 }
 0xab7   :  { %v4140_v50 = vpop.f32.mrf.mxu0 }
 0xab8   :  { %v1615_v22 = vadd.f32 %v1609_v33, %v1573_v20  ;;  %v1608_v37 = vmul.f32 0.044715, %v1602_v36  ;;  %v1583_v38 = vadd.f32 %v4140_v50, %v3660_v12  ;;  %v3673_v50 = vld [vmem:[%s5785_s15] ss:$0 sm:$0xff] }
 0xab9   :  { %v1577_v41 = vpop.f32.mrf.mxu0 }
 0xaba   :  { %v1621_v43 = vmul.f32 0.7978846, %v1615_v22  ;;  %v1614_v48 = vadd.f32 %v1608_v37, %v1568_v28  ;;  %v1599_v49 = vmul.f32 %v1583_v38, %v1583_v38  ;;  %v1578_v47 = vadd.f32 %v3660_v12, %v1577_v41 }
 0xabc   :  { %4432 = vtanh.f32 %v1621_v43  ;;  %v1620_v51 = vmul.f32 0.7978846, %v1614_v48  ;;  %v1605_v53 = vmul.f32 %v1599_v49, %v1583_v38  ;;  %v1598_v35 = vmul.f32 %v1578_v47, %v1578_v47 }
 0xabe   :  { %4434 = vtanh.f32 %v1620_v51  ;;  %v1611_v60 = vmul.f32 0.044715, %v1605_v53  ;;  %v1604_v3 = vmul.f32 %v1598_v35, %v1578_v47 }
 0xabf   :  { %v4143_v54 = vpop.f32.mrf.mxu0 }
 0xac0   :  { %v1617_v55 = vadd.f32 %v1611_v60, %v1583_v38  ;;  %v1610_v56 = vmul.f32 0.044715, %v1604_v3  ;;  %v1593_v57 = vadd.f32 %v4143_v54, %v3660_v12 }
 0xac1   :  { %v1587_v30 = vpop.f32.mrf.mxu0 }
 0xac2   :  { %v1623_v21 = vmul.f32 0.7978846, %v1617_v55  ;;  %v1616_v58 = vadd.f32 %v1610_v56, %v1578_v47  ;;  %v1601_v59 = vmul.f32 %v1593_v57, %v1593_v57  ;;  %v1588_v61 = vadd.f32 %v3660_v12, %v1587_v30 }
 0xac4   :  { %4436 = vtanh.f32 %v1623_v21  ;;  %v1622_v24 = vmul.f32 0.7978846, %v1616_v58  ;;  %v1607_v62 = vmul.f32 %v1601_v59, %v1593_v57  ;;  %v1600_v46 = vmul.f32 %v1588_v61, %v1588_v61 }
 0xac6   :  { %4438 = vtanh.f32 %v1622_v24  ;;  %v1613_v13 = vmul.f32 0.044715, %v1607_v62  ;;  %v1606_v19 = vmul.f32 %v1600_v46, %v1588_v61 }
 0xac8   :  { %v1619_v15 = vadd.f32 %v1613_v13, %v1593_v57  ;;  %v1612_v14 = vmul.f32 0.044715, %v1606_v19 }
 0xac9   :  { %v4433_v63 = vpop.eup %4432 }
 0xaca   :  { %v1633_v0 = vadd.f32 1.0, %v4433_v63  ;;  %v1625_v40 = vmul.f32 0.7978846, %v1619_v15  ;;  %v1618_v23 = vadd.f32 %v1612_v14, %v1588_v61 }
 0xacb   :  { %v4435_v1 = vpop.eup %4434 }
 0xacc   :  { %4440 = vtanh.f32 %v1625_v40  ;;  %v1624_v2 = vmul.f32 0.7978846, %v1618_v23  ;;  %v1632_v4 = vadd.f32 1.0, %v4435_v1  ;;  %v1639_v17 = vmul.f32 0.5, %v1633_v0 }
 0xace   :  { %4442 = vtanh.f32 %v1624_v2  ;;  %v1638_v5 = vmul.f32 0.5, %v1632_v4  ;;  %v1645_v6 = vmul.f32 %v1639_v17, %v1573_v20  ;;  %v3681_v4 = vld [vmem:[%s5816_s28 + $0x38] sm:$0xff]  ;;  %v3680_v17 = vld [vmem:[%s5816_s28 + $0x30] sm:$0xff] }
 0xacf   :  { %4169 = vmatprep.subr.mxu0 %v3681_v4 }
 0xad0   :  { %v1644_v16 = vmul.f32 %v1638_v5, %v1568_v28  ;;  %4170 = vmatpush3.msra.mxu0 %v3681_v4  ;;  %v3679_v5 = vld [vmem:[%s5816_s28 + $0x28] sm:$0xff] }
 0xad1   :  { %v4437_v39 = vpop.eup %4436  ;;  %4171 = vmatprep.subr.mxu0 %v3680_v17 }
 0xad2   :  { %4160 = vmatprep.mubr.msk.f32.mxu1 %vm92_vm0, %v1644_v16  ;;  %v1635_v7 = vadd.f32 1.0, %v4437_v39  ;;  %4172 = vmatpush3.msra.mxu0 %v3680_v17  ;;  %v3678_v16 = vld [vmem:[%s5816_s28 + $0x20] sm:$0xff] }
 0xad3   :  { %v4439_v42 = vpop.eup %4438  ;;  %4161 = vmatmul.mubr.msk.f32.vlgmr.msra.gmra.mxu1 %vm92_vm0, %v1645_v6  ;;  %4173 = vmatprep.subr.mxu0 %v3679_v5 }
 0xad4   :  { %v1634_v8 = vadd.f32 1.0, %v4439_v42  ;;  %v1641_v9 = vmul.f32 0.5, %v1635_v7  ;;  %4174 = vmatpush3.msra.mxu0 %v3679_v5 }
 0xad5   :  { %4175 = vmatprep.subr.mxu0 %v3678_v16 }
 0xad6   :  { %v1640_v10 = vmul.f32 0.5, %v1634_v8  ;;  %v1647_v18 = vmul.f32 %v1641_v9, %v1583_v38  ;;  %4176 = vmatpush3.msra.mxu0 %v3678_v16 }
 0xad8   :  { %v1646_v11 = vmul.f32 %v1640_v10, %v1578_v47 }
 0xad9   :  { %v4441_v12 = vpop.eup %4440 }
 0xada   :  { %4163 = vmatprep.mubr.msk.f32.mxu1 %vm92_vm0, %v1646_v11  ;;  %v1637_v25 = vadd.f32 1.0, %v4441_v12 }
 0xadb   :  { %v4443_v26 = vpop.eup %4442  ;;  %4164 = vmatmul.mubr.msk.f32.gmra.mxu1 %vm92_vm0, %v1647_v18 }
 0xadc   :  { %v1636_v28 = vadd.f32 1.0, %v4443_v26  ;;  %v1643_v20 = vmul.f32 0.5, %v1637_v25 }
 0xade   :  { %v1642_v29 = vmul.f32 0.5, %v1636_v28  ;;  %v1649_v33 = vmul.f32 %v1643_v20, %v1593_v57 }
 0xae0   :  { %v1648_v32 = vmul.f32 %v1642_v29, %v1588_v61 }
 0xae2   :  { %4166 = vmatprep.mubr.msk.f32.mxu1 %vm92_vm0, %v1648_v32 }
 0xae3   :  { %4167 = vmatmul.mubr.msk.f32.gmra.mxu1 %vm92_vm0, %v1649_v33 }
 0xb93   :  { %v4162_v36 = vpop.f32.mrf.mxu1 }
 0xb94   :  { %v1772_v22 = vadd.f32 %v4162_v36, %v5098_v27 }
 0xb95   :  { %v1742_v37 = vpop.f32.mrf.mxu1 }
 0xb96   :  { %v1785_v38 = vadd.f32 %v3673_v50, %v1772_v22  ;;  %v1771_v41 = vadd.f32 %v1742_v37, %v5103_v31 }
 0xb98   :  { %1791 = vst.msk [vmem:[#allocation2 + $0x8] sm:$0xff] %vm206_vm1, %v1785_v38  ;;  %v1784_v43 = vadd.f32 %v3673_v50, %v1771_v41 }
 0xb9a   :  { %1790 = vst.msk [vmem:[#allocation2] sm:$0xff] %vm206_vm1, %v1784_v43 }
 0xb9b   :  { %v4165_v48 = vpop.f32.mrf.mxu1 }
 0xb9c   :  { %v1774_v49 = vadd.f32 %v4165_v48, %v5110_v34 }
 0xb9d   :  { %v1752_v47 = vpop.f32.mrf.mxu1 }
 0xb9e   :  { %v1787_v51 = vadd.f32 %v3673_v50, %v1774_v49  ;;  %v1773_v53 = vadd.f32 %v1752_v47, %v5123_v45 }
 0xb9f   :  { %v5219_v35 = vld [vmem:[#allocation2 + $0x8] sm:$0xff] }
 0xba0   :  { %1793 = vst.msk [vmem:[#allocation2 + $0x18] sm:$0xff] %vm206_vm1, %v1787_v51  ;;  %v1786_v27 = vadd.f32 %v3673_v50, %v1773_v53  ;;  %v1809_v31 = vsel %vm206_vm1, %v5219_v35, 0.0  ;;  %v1831_v60 = vmul.f32 %v5219_v35, %v5219_v35 }
 0xba1   :  { %1810 = vadd.xlane.f32.xlu1 %v1809_v31  ;;  %v5226_v3 = vld [vmem:[#allocation2] sm:$0xff] }
 0xba2   :  { %1792 = vst.msk [vmem:[#allocation2 + $0x10] sm:$0xff] %vm206_vm1, %v1786_v27  ;;  %v1806_v34 = vsel %vm206_vm1, %v5226_v3, 0.0  ;;  %v1830_v45 = vmul.f32 %v5226_v3, %v5226_v3  ;;  %v1839_v56 = vsel %vm206_vm1, %v1831_v60, 0.0 }
 0xba3   :  { %1807 = vadd.xlane.f32.xlu0 %v1806_v34  ;;  %v4168_v54 = vpop.f32.mrf.mxu1 }
 0xba4   :  { %v1776_v55 = vadd.f32 %v4168_v54, %v5121_v44  ;;  %v1836_v58 = vsel %vm206_vm1, %v1830_v45, 0.0 }
 0xba5   :  { %1840 = vadd.xlane.f32.xlu1 %v1839_v56  ;;  %v1762_v57 = vpop.f32.mrf.mxu1 }
 0xba6   :  { %v1789_v30 = vadd.f32 %v3673_v50, %v1776_v55  ;;  %v1775_v21 = vadd.f32 %v1762_v57, %v5135_v52 }
 0xba7   :  { %1837 = vadd.xlane.f32.xlu0 %v1836_v58  ;;  %v5237_v59 = vld [vmem:[#allocation2 + $0x18] sm:$0xff] }
 0xba8   :  { %1795 = vst.msk [vmem:[#allocation2 + $0x28] sm:$0xff] %vm206_vm1, %v1789_v30  ;;  %v1788_v61 = vadd.f32 %v3673_v50, %v1775_v21  ;;  %v1815_v24 = vsel %vm206_vm1, %v5237_v59, 0.0  ;;  %v1833_v44 = vmul.f32 %v5237_v59, %v5237_v59 }
 0xba9   :  { %1816 = vadd.xlane.f32.xlu1 %v1815_v24  ;;  %v5244_v62 = vld [vmem:[#allocation2 + $0x10] sm:$0xff] }
 0xbaa   :  { %1794 = vst.msk [vmem:[#allocation2 + $0x20] sm:$0xff] %vm206_vm1, %v1788_v61  ;;  %v1812_v52 = vsel %vm206_vm1, %v5244_v62, 0.0  ;;  %v1832_v46 = vmul.f32 %v5244_v62, %v5244_v62  ;;  %v1845_v13 = vsel %vm206_vm1, %v1833_v44, 0.0 }
 0xbab   :  { %1813 = vadd.xlane.f32.xlu0 %v1812_v52 }
 0xbac   :  { %v1842_v19 = vsel %vm206_vm1, %v1832_v46, 0.0 }
 0xbad   :  { %1846 = vadd.xlane.f32.xlu1 %v1845_v13 }
 0xbaf   :  { %1843 = vadd.xlane.f32.xlu0 %v1842_v19  ;;  %v5253_v15 = vld [vmem:[#allocation2 + $0x28] sm:$0xff] }
 0xbb0   :  { %v1821_v14 = vsel %vm206_vm1, %v5253_v15, 0.0  ;;  %v1835_v63 = vmul.f32 %v5253_v15, %v5253_v15 }
 0xbb1   :  { %1822 = vadd.xlane.f32.xlu1 %v1821_v14  ;;  %v5259_v0 = vld [vmem:[#allocation2 + $0x20] sm:$0xff] }
 0xbb2   :  { %v1818_v40 = vsel %vm206_vm1, %v5259_v0, 0.0  ;;  %v1834_v23 = vmul.f32 %v5259_v0, %v5259_v0  ;;  %v1851_v1 = vsel %vm206_vm1, %v1835_v63, 0.0 }
 0xbb3   :  { %1819 = vadd.xlane.f32.xlu0 %v1818_v40 }
 0xbb4   :  { %v1848_v2 = vsel %vm206_vm1, %v1834_v23, 0.0  ;;  %v3676_v23 = vld [vmem:[%s5817_s25 + $0x1] ss:$0 sm:$0xff] }
 0xbb5   :  { %1852 = vadd.xlane.f32.xlu1 %v1851_v1 }
 0xbb7   :  { %1849 = vadd.xlane.f32.xlu0 %v1848_v2 }
 0xc2a   :  { %v1811_v39 = vpop.xlane.xlu1 %1810 }
 0xc2b   :  { %v1825_v6 = vmul.f32 0.03125, %v1811_v39 }
 0xc2c   :  { %v1808_v7 = vpop.xlane.xlu0 %1807 }
 0xc2d   :  { %v1824_v42 = vmul.f32 0.03125, %v1808_v7  ;;  %v1861_v9 = vmul.f32 %v1825_v6, %v1825_v6  ;;  %v1879_v44 = vsub.f32 %v5219_v35, %v1825_v6  ;;  %v3677_v35 = vld [vmem:[%s5818_s2 + $0x1] ss:$0 sm:$0xff] }
 0xc2e   :  { %v1841_v8 = vpop.xlane.xlu1 %1840 }
 0xc2f   :  { %v1855_v10 = vmul.f32 0.03125, %v1841_v8  ;;  %v1860_v12 = vmul.f32 %v1824_v42, %v1824_v42  ;;  %v1878_v19 = vsub.f32 %v5226_v3, %v1824_v42 }
 0xc30   :  { %v1838_v11 = vpop.xlane.xlu0 %1837 }
 0xc31   :  { %v1867_v18 = vsub.f32 %v1855_v10, %v1861_v9  ;;  %v1854_v25 = vmul.f32 0.03125, %v1838_v11 }
 0xc32   :  { %v1817_v26 = vpop.xlane.xlu1 %1816 }
 0xc33   :  { %v1873_v28 = vmax.f32 %v1867_v18, 0.0  ;;  %v1866_v20 = vsub.f32 %v1854_v25, %v1860_v12  ;;  %v1827_v29 = vmul.f32 0.03125, %v1817_v26 }
 0xc34   :  { %v1814_v32 = vpop.xlane.xlu0 %1813 }
 0xc35   :  { %v1885_v33 = vadd.f32 1e-12, %v1873_v28  ;;  %v1872_v36 = vmax.f32 %v1866_v20, 0.0  ;;  %v1826_v50 = vmul.f32 0.03125, %v1814_v32  ;;  %v1863_v38 = vmul.f32 %v1827_v29, %v1827_v29 }
 0xc36   :  { %v1847_v22 = vpop.xlane.xlu1 %1846  ;;  %v1881_v3 = vsub.f32 %v5237_v59, %v1827_v29 }
 0xc37   :  { %4444 = vrsqrt.f32 %v1885_v33  ;;  %v1884_v37 = vadd.f32 1e-12, %v1872_v36  ;;  %v1857_v41 = vmul.f32 0.03125, %v1847_v22  ;;  %v1862_v48 = vmul.f32 %v1826_v50, %v1826_v50 }
 0xc38   :  { %v1844_v43 = vpop.xlane.xlu0 %1843  ;;  %v1880_v7 = vsub.f32 %v5244_v62, %v1826_v50 }
 0xc39   :  { %4446 = vrsqrt.f32 %v1884_v37  ;;  %v1869_v49 = vsub.f32 %v1857_v41, %v1863_v38  ;;  %v1856_v47 = vmul.f32 0.03125, %v1844_v43 }
 0xc3a   :  { %v1823_v51 = vpop.xlane.xlu1 %1822 }
 0xc3b   :  { %v1875_v53 = vmax.f32 %v1869_v49, 0.0  ;;  %v1868_v27 = vsub.f32 %v1856_v47, %v1862_v48  ;;  %v1829_v31 = vmul.f32 0.03125, %v1823_v51 }
 0xc3c   :  { %v1820_v60 = vpop.xlane.xlu0 %1819 }
 0xc3d   :  { %v1887_v34 = vadd.f32 1e-12, %v1875_v53  ;;  %v1874_v45 = vmax.f32 %v1868_v27, 0.0  ;;  %v1828_v54 = vmul.f32 0.03125, %v1820_v60  ;;  %v1865_v57 = vmul.f32 %v1829_v31, %v1829_v31 }
 0xc3e   :  { %v1853_v55 = vpop.xlane.xlu1 %1852  ;;  %v1883_v12 = vsub.f32 %v5253_v15, %v1829_v31 }
 0xc3f   :  { %4448 = vrsqrt.f32 %v1887_v34  ;;  %v1886_v56 = vadd.f32 1e-12, %v1874_v45  ;;  %v1859_v30 = vmul.f32 0.03125, %v1853_v55  ;;  %v1864_v58 = vmul.f32 %v1828_v54, %v1828_v54 }
 0xc40   :  { %v1850_v21 = vpop.xlane.xlu0 %1849  ;;  %v1882_v59 = vsub.f32 %v5259_v0, %v1828_v54  ;;  %v3683_v0 = vld [vmem:[%s5777_s7 + $0x1] ss:$0 sm:$0xff] }
 0xc41   :  { %4450 = vrsqrt.f32 %v1886_v56  ;;  %v1871_v61 = vsub.f32 %v1859_v30, %v1865_v57  ;;  %v1858_v24 = vmul.f32 0.03125, %v1850_v21 }
 0xc43   :  { %v1877_v52 = vmax.f32 %v1871_v61, 0.0  ;;  %v1870_v46 = vsub.f32 %v1858_v24, %v1864_v58 }
 0xc44   :  { %v4445_v13 = vpop.eup %4444 }
 0xc45   :  { %v1897_v14 = vmul.f32 %v4445_v13, %v1879_v44  ;;  %v1889_v63 = vadd.f32 1e-12, %v1877_v52  ;;  %v1876_v40 = vmax.f32 %v1870_v46, 0.0  ;;  %v5371_v46 = vld [vmem:[%s5819_s5 + $0x8] sm:$0xff] }
 0xc46   :  { %v4447_v1 = vpop.eup %4446 }
 0xc47   :  { %4452 = vrsqrt.f32 %v1889_v63  ;;  %v1888_v2 = vadd.f32 1e-12, %v1876_v40  ;;  %v1896_v4 = vmul.f32 %v4447_v1, %v1878_v19  ;;  %v1909_v17 = vmul.f32 %v3676_v23, %v1897_v14  ;;  %v5377_v63 = vld [vmem:[%s5819_s5] sm:$0xff] }
 0xc49   :  { %4454 = vrsqrt.f32 %v1888_v2  ;;  %v1908_v5 = vmul.f32 %v3676_v23, %v1896_v4  ;;  %v1921_v6 = vadd.f32 %v3677_v35, %v1909_v17  ;;  %v5384_v4 = vld [vmem:[%s5819_s5 + $0x18] sm:$0xff] }
 0xc4b   :  { %v1920_v16 = vadd.f32 %v3677_v35, %v1908_v5 }
 0xc4c   :  { %v4449_v39 = vpop.eup %4448 }
 0xc4d   :  { %4177 = vmatprep.mubr.msk.f32.mxu0 %vm206_vm1, %v1920_v16  ;;  %v1899_v42 = vmul.f32 %v4449_v39, %v1881_v3 }
 0xc4e   :  { %v4451_v8 = vpop.eup %4450  ;;  %4178 = vmatmul.mubr.msk.f32.vlgmr.msra.gmra.mxu0 %vm206_vm1, %v1921_v6  ;;  %v5391_v6 = vld [vmem:[%s5819_s5 + $0x10] sm:$0xff] }
 0xc4f   :  { %v1898_v9 = vmul.f32 %v4451_v8, %v1880_v7  ;;  %v1911_v10 = vmul.f32 %v3676_v23, %v1899_v42  ;;  %v5397_v42 = vld [vmem:[%s5819_s5 + $0x28] sm:$0xff] }
 0xc51   :  { %v1910_v11 = vmul.f32 %v3676_v23, %v1898_v9  ;;  %v1923_v26 = vadd.f32 %v3677_v35, %v1911_v10 }
 0xc53   :  { %v1922_v18 = vadd.f32 %v3677_v35, %v1910_v11 }
 0xc54   :  { %v4453_v25 = vpop.eup %4452 }
 0xc55   :  { %4180 = vmatprep.mubr.msk.f32.mxu0 %vm206_vm1, %v1922_v18  ;;  %v1901_v28 = vmul.f32 %v4453_v25, %v1883_v12  ;;  %v5405_v12 = vld [vmem:[%s5819_s5 + $0x20] sm:$0xff]  ;;  %s5820_s5 = smov 112  }
 0xc56   :  { %v4455_v62 = vpop.eup %4454  ;;  %4181 = vmatmul.mubr.msk.f32.gmra.mxu0 %vm206_vm1, %v1923_v26 }
 0xc57   :  { %v1900_v20 = vmul.f32 %v4455_v62, %v1882_v59  ;;  %v1913_v29 = vmul.f32 %v3676_v23, %v1901_v28 }
 0xc59   :  { %v1912_v32 = vmul.f32 %v3676_v23, %v1900_v20  ;;  %v1925_v36 = vadd.f32 %v3677_v35, %v1913_v29 }
 0xc5b   :  { %v1924_v33 = vadd.f32 %v3677_v35, %v1912_v32 }
 0xc5d   :  { %4183 = vmatprep.mubr.msk.f32.mxu0 %vm206_vm1, %v1924_v33 }
 0xc5e   :  { %4184 = vmatmul.mubr.msk.f32.gmra.mxu0 %vm206_vm1, %v1925_v36 }
 0xd0e   :  { %v4179_v15 = vpop.f32.mrf.mxu0 }
 0xd0f   :  { %v5310_v47 = vadd.f32 %v4179_v15, %v3683_v0 }
 0xd10   :  { %v2023_v50 = vpop.f32.mrf.mxu0 }
 0xd11   :  { %v5300_v22 = vadd.f32 %v3683_v0, %v2023_v50 }
 0xd13   :  { %4198 = vmatprep.mubr.msk.f32.mxu1 %vm490_vm2, %v5300_v22 }
 0xd16   :  { %v4182_v37 = vpop.f32.mrf.mxu0 }
 0xd17   :  { %v5314_v51 = vadd.f32 %v4182_v37, %v3683_v0 }
 0xd18   :  { %v2033_v38 = vpop.f32.mrf.mxu0 }
 0xd19   :  { %v5320_v53 = vadd.f32 %v3683_v0, %v2033_v38 }
 0xd1e   :  { %v4185_v41 = vpop.f32.mrf.mxu0 }
 0xd1f   :  { %v5304_v43 = vadd.f32 %v4185_v41, %v3683_v0 }
 0xd20   :  { %v2043_v48 = vpop.f32.mrf.mxu0 }
 0xd21   :  { %v5306_v49 = vadd.f32 %v3683_v0, %v2043_v48  ;;  %2068 = vrot.lane.b32.xlu0 %v5304_v43, %s4572_s30 }
 0xd23   :  { %2066 = vrot.lane.b32.xlu1 %v5306_v49, %s4572_s30 }
 0xd25   :  { %2060 = vrot.lane.b32.xlu0 %v5310_v47, %s4572_s30 }
 0xd27   :  { %2064 = vrot.lane.b32.xlu1 %v5314_v51, %s4572_s30 }
 0xd29   :  { %2277 = vrot.lane.b32.xlu0 %v5304_v43, %s4573_s4 }
 0xd2b   :  { %2062 = vrot.lane.b32.xlu1 %v5320_v53, %s4572_s30 }
 0xd2d   :  { %2273 = vrot.lane.b32.xlu0 %v5314_v51, %s4573_s4 }
 0xd2f   :  { %2058 = vrot.lane.b32.xlu1 %v5300_v22, %s4572_s30 }
 0xd31   :  { %2420 = vrot.lane.b32.xlu0 %v5304_v43, %s4574_s0 }
 0xd33   :  { %2271 = vrot.lane.b32.xlu1 %v5320_v53, %s4573_s4 }
 0xd37   :  { %2269 = vrot.lane.b32.xlu1 %v5310_v47, %s4573_s4 }
 0xd3b   :  { %2267 = vrot.lane.b32.xlu1 %v5300_v22, %s4573_s4 }
 0xd3f   :  { %2275 = vrot.lane.b32.xlu1 %v5306_v49, %s4573_s4 }
 0xd43   :  { %2418 = vrot.lane.b32.xlu1 %v5306_v49, %s4574_s0 }
 0xd93   :  { %v2069_v27 = vpop.permute.xlu0 %2068 }
 0xd94   :  { %4186 = vmatprep.subr.msk.mxu1 %vm490_vm2, %v2069_v27 }
 0xd95   :  { %4187 = vmatpush3.xpose.msk.msra.mxu1 %vm490_vm2, %v2069_v27  ;;  %v2067_v31 = vpop.permute.xlu1 %2066 }
 0xd96   :  { %4188 = vmatprep.subr.msk.mxu1 %vm490_vm2, %v2067_v31 }
 0xd97   :  { %v2061_v60 = vpop.permute.xlu0 %2060 }
 0xd99   :  { %4189 = vmatpush3.xpose.msk.msra.mxu1 %vm490_vm2, %v2067_v31  ;;  %v2065_v34 = vpop.permute.xlu1 %2064 }
 0xd9a   :  { %4190 = vmatprep.subr.msk.mxu1 %vm490_vm2, %v2065_v34 }
 0xd9b   :  { %v2278_v45 = vpop.permute.xlu0 %2277 }
 0xd9c   :  { %4207 = vmatprep.subr.mxu0 %v2278_v45 }
 0xd9d   :  { %4191 = vmatpush3.xpose.msk.msra.mxu1 %vm490_vm2, %v2065_v34  ;;  %4208 = vmatpush3.msra.mxu0 %v2278_v45  ;;  %v2063_v54 = vpop.permute.xlu1 %2062 }
 0xd9e   :  { %4192 = vmatprep.subr.msk.mxu1 %vm490_vm2, %v2063_v54 }
 0xd9f   :  { %v2274_v58 = vpop.permute.xlu0 %2273 }
 0xda1   :  { %4193 = vmatpush3.xpose.msk.msra.mxu1 %vm490_vm2, %v2063_v54  ;;  %v2059_v55 = vpop.permute.xlu1 %2058 }
 0xda2   :  { %4194 = vmatprep.subr.msk.mxu1 %vm490_vm2, %v2061_v60 }
 0xda3   :  { %v5364_v61 = vpop.permute.xlu0 %2420 }
 0xda5   :  { %4195 = vmatpush3.xpose.msk.msra.mxu1 %vm490_vm2, %v2061_v60  ;;  %v2272_v56 = vpop.permute.xlu1 %2271 }
 0xda6   :  { %4196 = vmatprep.subr.msk.mxu1 %vm490_vm2, %v2059_v55 }
 0xda9   :  { %4197 = vmatpush3.xpose.msk.msra.mxu1 %vm490_vm2, %v2059_v55  ;;  %v2270_v57 = vpop.permute.xlu1 %2269 }
 0xdac   :  { %4199 = vmatmul.mubr.msk.f32.vlgmr.msra.gmra.mxu1 %vm490_vm2, %v5310_v47 }
 0xdad   :  { %4201 = vmatprep.mubr.msk.f32.mxu1 %vm490_vm2, %v5320_v53  ;;  %v2268_v30 = vpop.permute.xlu1 %2267 }
 0xdb0   :  { %4202 = vmatmul.mubr.msk.f32.gmra.mxu1 %vm490_vm2, %v5314_v51 }
 0xdb1   :  { %4204 = vmatprep.mubr.msk.f32.mxu1 %vm490_vm2, %v5306_v49  ;;  %v2276_v21 = vpop.permute.xlu1 %2275 }
 0xdb2   :  { %4209 = vmatprep.subr.mxu0 %v2276_v21 }
 0xdb3   :  { %4210 = vmatpush3.msra.mxu0 %v2276_v21 }
 0xdb4   :  { %4205 = vmatmul.mubr.msk.f32.gmra.mxu1 %vm490_vm2, %v5304_v43  ;;  %4211 = vmatprep.subr.mxu0 %v2274_v58 }
 0xdb5   :  { %4212 = vmatpush3.msra.mxu0 %v2274_v58  ;;  %v5414_v59 = vpop.permute.xlu1 %2418 }
 0xdb6   :  { %4213 = vmatprep.subr.mxu0 %v2272_v56 }
 0xdb7   :  { %4214 = vmatpush3.msra.mxu0 %v2272_v56 }
 0xdb8   :  { %4215 = vmatprep.subr.mxu0 %v2270_v57 }
 0xdb9   :  { %4216 = vmatpush3.msra.mxu0 %v2270_v57 }
 0xdba   :  { %4217 = vmatprep.subr.mxu0 %v2268_v30 }
 0xdbb   :  { %4218 = vmatpush3.msra.mxu0 %v2268_v30 }
 0xdbc   :  { %4228 = vmatprep.subr.msk.mxu0 %vm490_vm2, %v5364_v61 }
 0xe6c   :  { %v4200_v24 = vpop.f32.mrf.mxu1 }
 0xe6d   :  { %v2190_v44 = vmul.f32 0.25, %v4200_v24 }
 0xe6e   :  { %v2160_v52 = vpop.f32.mrf.mxu1 }
 0xe6f   :  { %v2196_v13 = vadd.f32 %v5371_v46, %v2190_v44  ;;  %v2189_v19 = vmul.f32 0.25, %v2160_v52 }
 0xe70   :  { %v4203_v14 = vpop.f32.mrf.mxu1 }
 0xe71   :  { %v2195_v40 = vadd.f32 %v5377_v63, %v2189_v19  ;;  %v2192_v23 = vmul.f32 0.25, %v4203_v14  ;;  %v2204_v1 = vsel %vm622_vm3, %v2196_v13, -inf }
 0xe72   :  { %2205 = vmax.xlane.f32.xlu1 %v2204_v1  ;;  %v2170_v2 = vpop.f32.mrf.mxu1 }
 0xe73   :  { %v2198_v17 = vadd.f32 %v5384_v4, %v2192_v23  ;;  %v2191_v35 = vmul.f32 0.25, %v2170_v2  ;;  %v2201_v5 = vsel %vm622_vm3, %v2195_v40, -inf }
 0xe74   :  { %2202 = vmax.xlane.f32.xlu0 %v2201_v5  ;;  %v4206_v3 = vpop.f32.mrf.mxu1 }
 0xe75   :  { %v2194_v16 = vmul.f32 0.25, %v4206_v3  ;;  %v2197_v7 = vadd.f32 %v5391_v6, %v2191_v35  ;;  %v2210_v10 = vsel %vm622_vm3, %v2198_v17, -inf }
 0xe76   :  { %v2180_v39 = vpop.f32.mrf.mxu1 }
 0xe77   :  { %v2200_v8 = vadd.f32 %v5397_v42, %v2194_v16  ;;  %v2193_v9 = vmul.f32 0.25, %v2180_v39  ;;  %v2207_v25 = vsel %vm622_vm3, %v2197_v7, -inf }
 0xe78   :  { %2211 = vmax.xlane.f32.xlu0 %v2210_v10 }
 0xe79   :  { %v2216_v11 = vsel %vm622_vm3, %v2200_v8, -inf  ;;  %v2199_v18 = vadd.f32 %v5405_v12, %v2193_v9 }
 0xe7a   :  { %2217 = vmax.xlane.f32.xlu1 %v2216_v11 }
 0xe7b   :  { %v2213_v26 = vsel %vm622_vm3, %v2199_v18, -inf }
 0xe7c   :  { %2208 = vmax.xlane.f32.xlu0 %v2207_v25 }
 0xe80   :  { %2214 = vmax.xlane.f32.xlu0 %v2213_v26 }
 0xe8b   :  { %2414 = vrot.lane.b32.xlu1 %v5320_v53, %s4574_s0 }
 0xe96   :  { %2416 = vrot.lane.b32.xlu0 %v5314_v51, %s4574_s0 }
 0xefb   :  { %v2206_v28 = vpop.xlane.xlu1 %2205 }
 0xefc   :  { %v2220_v62 = vsub.f32 %v2196_v13, %v2206_v28 }
 0xefd   :  { %v2203_v20 = vpop.xlane.xlu0 %2202 }
 0xefe   :  { %v2227_v29 = vmul.f32 1.442695, %v2220_v62  ;;  %v2219_v32 = vsub.f32 %v2195_v40, %v2203_v20 }
 0xf00   :  { %4456 = vpow2.f32 %v2227_v29  ;;  %v2225_v33 = vmul.f32 1.442695, %v2219_v32 }
 0xf01   :  { %v2212_v36 = vpop.xlane.xlu0 %2211 }
 0xf02   :  { %4458 = vpow2.f32 %v2225_v33  ;;  %v2222_v15 = vsub.f32 %v2198_v17, %v2212_v36 }
 0xf03   :  { %v2218_v57 = vpop.xlane.xlu1 %2217 }
 0xf04   :  { %v2231_v0 = vmul.f32 1.442695, %v2222_v15  ;;  %v2224_v30 = vsub.f32 %v2200_v8, %v2218_v57 }
 0xf05   :  { %v2209_v50 = vpop.xlane.xlu0 %2208 }
 0xf06   :  { %4460 = vpow2.f32 %v2231_v0  ;;  %v2221_v37 = vsub.f32 %v2197_v7, %v2209_v50  ;;  %v2235_v58 = vmul.f32 1.442695, %v2224_v30 }
 0xf07   :  { %v2415_v19 = vpop.permute.xlu1 %2414 }
 0xf08   :  { %v2229_v38 = vmul.f32 1.442695, %v2221_v37 }
 0xf09   :  { %v2215_v55 = vpop.xlane.xlu0 %2214 }
 0xf0a   :  { %4462 = vpow2.f32 %v2229_v38  ;;  %v2223_v56 = vsub.f32 %v2199_v18, %v2215_v55 }
 0xf0c   :  { %v2233_v21 = vmul.f32 1.442695, %v2223_v56 }
 0xf0d   :  { %v4457_v41 = vpop.eup %4456  ;;  %v2417_v14 = vpop.permute.xlu0 %2416 }
 0xf0e   :  { %v2240_v48 = vsel %vm622_vm3, %v4457_v41, 0.0  ;;  %4464 = vpow2.f32 %v2233_v21 }
 0xf0f   :  { %v4459_v27 = vpop.eup %4458  ;;  %2241 = vadd.xlane.f32.xlu1 %v2240_v48  ;;  %4466 = vpow2.f32 %v2235_v58 }
 0xf10   :  { %v2237_v31 = vsel %vm622_vm3, %v4459_v27, 0.0 }
 0xf11   :  { %2238 = vadd.xlane.f32.xlu0 %v2237_v31 }
 0xf13   :  { %v4461_v60 = vpop.eup %4460 }
 0xf14   :  { %v2246_v34 = vsel %vm622_vm3, %v4461_v60, 0.0 }
 0xf15   :  { %2247 = vadd.xlane.f32.xlu1 %v2246_v34 }
 0xf17   :  { %v4463_v45 = vpop.eup %4462 }
 0xf18   :  { %v2243_v54 = vsel %vm622_vm3, %v4463_v45, 0.0 }
 0xf19   :  { %2244 = vadd.xlane.f32.xlu0 %v2243_v54 }
 0xf1b   :  { %v4465_v24 = vpop.eup %4464 }
 0xf1c   :  { %v2249_v44 = vsel %vm622_vm3, %v4465_v24, 0.0  ;;  %v4467_v52 = vpop.eup %4466 }
 0xf1d   :  { %v2252_v13 = vsel %vm622_vm3, %v4467_v52, 0.0 }
 0xf26   :  { %2410 = vrot.lane.b32.xlu1 %v5300_v22, %s4574_s0 }
 0xf2f   :  { %2412 = vrot.lane.b32.xlu0 %v5310_v47, %s4574_s0  ;;  %s5821_s0 = smov 48  }
 0xf4a   :  { %2250 = vadd.xlane.f32.xlu1 %v2249_v44 }
 0xf4e   :  { %2253 = vadd.xlane.f32.xlu0 %v2252_v13 }
 0xf5b   :  { %2400 = vrot.lane.b32.xlu1 %v5310_v47, %s5820_s5 }
 0xf5f   :  { %2404 = vrot.lane.b32.xlu1 %v5314_v51, %s5820_s5 }
 0xf63   :  { %2408 = vrot.lane.b32.xlu1 %v5304_v43, %s5820_s5 }
 0xf64   :  { %2398 = vrot.lane.b32.xlu0 %v5300_v22, %s5820_s5 }
 0xf68   :  { %2402 = vrot.lane.b32.xlu0 %v5320_v53, %s5820_s5 }
 0xf6c   :  { %2406 = vrot.lane.b32.xlu0 %v5306_v49, %s5820_s5 }
 0xf98   :  { %v2242_v40 = vpop.xlane.xlu1 %2241 }
 0xf99   :  { %4468 = vrcp.f32 %v2242_v40 }
 0xf9a   :  { %v2239_v23 = vpop.xlane.xlu0 %2238 }
 0xf9b   :  { %4470 = vrcp.f32 %v2239_v23 }
 0xf9e   :  { %v2248_v1 = vpop.xlane.xlu1 %2247 }
 0xf9f   :  { %4472 = vrcp.f32 %v2248_v1 }
 0xfa2   :  { %v2245_v2 = vpop.xlane.xlu0 %2244  ;;  %v2411_v9 = vpop.permute.xlu1 %2410 }
 0xfa3   :  { %4474 = vrcp.f32 %v2245_v2 }
 0xfa6   :  { %v4469_v17 = vpop.eup %4468 }
 0xfa7   :  { %v2262_v3 = vmul.f32 %v4469_v17, %v4457_v41 }
 0xfa8   :  { %v4471_v35 = vpop.eup %4470 }
 0xfa9   :  { %v2261_v5 = vmul.f32 %v4471_v35, %v4459_v27 }
 0xfab   :  { %4219 = vmatprep.mubr.msk.f32.mxu0 %vm622_vm3, %v2261_v5 }
 0xfac   :  { %4220 = vmatmul.mubr.msk.f32.vlgmr.msra.gmra.mxu0 %vm622_vm3, %v2262_v3  ;;  %v4473_v16 = vpop.eup %4472 }
 0xfad   :  { %4229 = vmatpush3.xpose.msk.msra.mxu0 %vm490_vm2, %v5364_v61  ;;  %v2264_v8 = vmul.f32 %v4473_v16, %v4461_v60  ;;  %v2413_v61 = vpop.permute.xlu0 %2412 }
 0xfae   :  { %4230 = vmatprep.subr.msk.mxu0 %vm490_vm2, %v5414_v59 }
 0xfb0   :  { %v4475_v39 = vpop.eup %4474 }
 0xfb1   :  { %4231 = vmatpush3.xpose.msk.msra.mxu0 %vm490_vm2, %v5414_v59  ;;  %v2263_v7 = vmul.f32 %v4475_v39, %v4463_v45 }
 0xfb2   :  { %4232 = vmatprep.subr.msk.mxu0 %vm490_vm2, %v2417_v14 }
 0xfb3   :  { %4222 = vmatprep.mubr.msk.f32.mxu0 %vm622_vm3, %v2263_v7 }
 0xfb4   :  { %4223 = vmatmul.mubr.msk.f32.gmra.mxu0 %vm622_vm3, %v2264_v8 }
 0xfb5   :  { %4233 = vmatpush3.xpose.msk.msra.mxu0 %vm490_vm2, %v2417_v14 }
 0xfb6   :  { %4234 = vmatprep.subr.msk.mxu0 %vm490_vm2, %v2415_v19 }
 0xfb9   :  { %4235 = vmatpush3.xpose.msk.msra.mxu0 %vm490_vm2, %v2415_v19 }
 0xfba   :  { %4236 = vmatprep.subr.msk.mxu0 %vm490_vm2, %v2413_v61 }
 0xfbd   :  { %4237 = vmatpush3.xpose.msk.msra.mxu0 %vm490_vm2, %v2413_v61 }
 0xfbe   :  { %4238 = vmatprep.subr.msk.mxu0 %vm490_vm2, %v2411_v9 }
 0xfc1   :  { %4239 = vmatpush3.xpose.msk.msra.mxu0 %vm490_vm2, %v2411_v9 }
 0xfd3   :  { %v2251_v10 = vpop.xlane.xlu1 %2250 }
 0xfd4   :  { %4476 = vrcp.f32 %v2251_v10 }
 0xfd7   :  { %v2254_v11 = vpop.xlane.xlu0 %2253  ;;  %v2401_v62 = vpop.permute.xlu1 %2400 }
 0xfd8   :  { %4478 = vrcp.f32 %v2254_v11 }
 0xfdb   :  { %v2399_v26 = vpop.permute.xlu0 %2398  ;;  %v2405_v29 = vpop.permute.xlu1 %2404 }
 0xfdf   :  { %v2403_v20 = vpop.permute.xlu0 %2402  ;;  %v2409_v33 = vpop.permute.xlu1 %2408 }
 0xfe1   :  { %v4477_v18 = vpop.eup %4476 }
 0xfe2   :  { %v2265_v25 = vmul.f32 %v4477_v18, %v4465_v24 }
 0xfe3   :  { %v2407_v32 = vpop.permute.xlu0 %2406 }
 0xfe4   :  { %4225 = vmatprep.mubr.msk.f32.mxu0 %vm622_vm3, %v2265_v25 }
 0xfe5   :  { %v4479_v59 = vpop.eup %4478 }
 0xfe6   :  { %v2266_v28 = vmul.f32 %v4479_v59, %v4467_v52 }
 0xfe8   :  { %4226 = vmatmul.mubr.msk.f32.gmra.mxu0 %vm622_vm3, %v2266_v28 }
 0xfe9   :  { %4240 = vmatprep.mubr.msk.f32.mxu0 %vm490_vm2, %v2399_v26 }
 0xfec   :  { %4241 = vmatmul.mubr.msk.f32.vlgmr.msra.gmra.mxu0 %vm490_vm2, %v2401_v62 }
 0xfed   :  { %4243 = vmatprep.mubr.msk.f32.mxu0 %vm490_vm2, %v2403_v20 }
 0xff0   :  { %4244 = vmatmul.mubr.msk.f32.gmra.mxu0 %vm490_vm2, %v2405_v29 }
 0xff1   :  { %4246 = vmatprep.mubr.msk.f32.mxu0 %vm490_vm2, %v2407_v32 }
 0xff4   :  { %4247 = vmatmul.mubr.msk.f32.gmra.mxu0 %vm490_vm2, %v2409_v33 }
0x106c   :  { %v5464_v36 = vpop.f32.mrf.mxu0 }
0x106e   :  { %v5466_v15 = vpop.f32.mrf.mxu0 }
0x1074   :  { %v5468_v0 = vpop.f32.mrf.mxu0 }
0x1076   :  { %v5470_v50 = vpop.f32.mrf.mxu0 }
0x10a8   :  { %v5472_v37 = vpop.f32.mrf.mxu0 }
0x10aa   :  { %v5474_v38 = vpop.f32.mrf.mxu0 }
0x10ac   :  { %v4242_v41 = vpop.f32.mrf.mxu0 }
0x10ad   :  { %v2542_v48 = vmul.f32 0.25, %v4242_v41 }
0x10ae   :  { %v2512_v27 = vpop.f32.mrf.mxu0 }
0x10af   :  { %v2548_v31 = vadd.f32 %v5371_v46, %v2542_v48  ;;  %v2541_v60 = vmul.f32 0.25, %v2512_v27 }
0x10b0   :  { %v4245_v34 = vpop.f32.mrf.mxu0 }
0x10b1   :  { %v2547_v45 = vadd.f32 %v5377_v63, %v2541_v60  ;;  %v2556_v54 = vsel %vm622_vm3, %v2548_v31, -inf  ;;  %v2544_v56 = vmul.f32 0.25, %v4245_v34 }
0x10b2   :  { %2557 = vmax.xlane.f32.xlu1 %v2556_v54  ;;  %v2522_v55 = vpop.f32.mrf.mxu0 }
0x10b3   :  { %v2543_v57 = vmul.f32 0.25, %v2522_v55  ;;  %v2553_v30 = vsel %vm622_vm3, %v2547_v45, -inf  ;;  %v2550_v58 = vadd.f32 %v5384_v4, %v2544_v56 }
0x10b4   :  { %2554 = vmax.xlane.f32.xlu0 %v2553_v30  ;;  %v4248_v61 = vpop.f32.mrf.mxu0 }
0x10b5   :  { %v2549_v21 = vadd.f32 %v5391_v6, %v2543_v57  ;;  %v2562_v46 = vsel %vm622_vm3, %v2550_v58, -inf  ;;  %v2546_v11 = vmul.f32 0.25, %v4248_v61 }
0x10b6   :  { %v2532_v9 = vpop.f32.mrf.mxu0 }
0x10b7   :  { %v2559_v24 = vsel %vm622_vm3, %v2549_v21, -inf  ;;  %v2545_v10 = vmul.f32 0.25, %v2532_v9  ;;  %v2552_v25 = vadd.f32 %v5397_v42, %v2546_v11  ;;  %v4545_v9 = vld [vmem:[#allocation2] sm:$0xff] }
0x10b8   :  { %2560 = vmax.xlane.f32.xlu0 %v2559_v24  ;;  %v3729_v24 = vld [vmem:[%s5778_s8 + $0x38] sm:$0xff] }
0x10b9   :  { %v2551_v18 = vadd.f32 %v5405_v12, %v2545_v10  ;;  %v2568_v59 = vsel %vm622_vm3, %v2552_v25, -inf }
0x10bb   :  { %v2565_v26 = vsel %vm622_vm3, %v2551_v18, -inf }
0x10bc   :  { %2563 = vmax.xlane.f32.xlu0 %v2562_v46  ;;  %v3728_v46 = vld [vmem:[%s5778_s8 + $0x30] sm:$0xff] }
0x10c3   :  { %2627 = vrot.lane.b32.xlu1 %v5306_v49, %s5821_s0 }
0x10c7   :  { %2625 = vrot.lane.b32.xlu1 %v5314_v51, %s5821_s0 }
0x10cb   :  { %2623 = vrot.lane.b32.xlu1 %v5320_v53, %s5821_s0 }
0x10d2   :  { %2629 = vrot.lane.b32.xlu0 %v5304_v43, %s5821_s0 }
0x113b   :  { %v2558_v63 = vpop.xlane.xlu1 %2557 }
0x113c   :  { %v2572_v4 = vsub.f32 %v2548_v31, %v2558_v63  ;;  %v3727_v63 = vld [vmem:[%s5778_s8 + $0x28] sm:$0xff] }
0x113d   :  { %v2555_v6 = vpop.xlane.xlu0 %2554 }
0x113e   :  { %v2579_v44 = vmul.f32 1.442695, %v2572_v4  ;;  %v2571_v52 = vsub.f32 %v2547_v45, %v2555_v6  ;;  %v3726_v4 = vld [vmem:[%s5778_s8 + $0x20] sm:$0xff] }
0x113f   :  { %v2628_v49 = vpop.permute.xlu1 %2627 }
0x1140   :  { %4480 = vpow2.f32 %v2579_v44  ;;  %v2577_v13 = vmul.f32 1.442695, %v2571_v52 }
0x1141   :  { %v2561_v19 = vpop.xlane.xlu0 %2560 }
0x1142   :  { %4482 = vpow2.f32 %v2577_v13  ;;  %v2573_v14 = vsub.f32 %v2549_v21, %v2561_v19 }
0x1143   :  { %v2626_v53 = vpop.permute.xlu1 %2625 }
0x1144   :  { %v2581_v40 = vmul.f32 1.442695, %v2573_v14 }
0x1145   :  { %v2564_v23 = vpop.xlane.xlu0 %2563 }
0x1146   :  { %4484 = vpow2.f32 %v2581_v40  ;;  %v2574_v51 = vsub.f32 %v2550_v58, %v2564_v23 }
0x1147   :  { %v2624_v5 = vpop.permute.xlu1 %2623 }
0x1148   :  { %v2583_v1 = vmul.f32 1.442695, %v2574_v51 }
0x1149   :  { %v2630_v2 = vpop.permute.xlu0 %2629 }
0x114a   :  { %4486 = vpow2.f32 %v2583_v1  ;;  %4249 = vmatprep.subr.mxu1 %v2630_v2 }
0x114b   :  { %4250 = vmatpush3.msra.mxu1 %v2630_v2 }
0x114c   :  { %4251 = vmatprep.subr.mxu1 %v2628_v49 }
0x114d   :  { %v4481_v43 = vpop.eup %4480  ;;  %4252 = vmatpush3.msra.mxu1 %v2628_v49 }
0x114e   :  { %4253 = vmatprep.subr.mxu1 %v2626_v53  ;;  %v2592_v17 = vsel %vm622_vm3, %v4481_v43, 0.0 }
0x114f   :  { %v4483_v35 = vpop.eup %4482  ;;  %2593 = vadd.xlane.f32.xlu1 %v2592_v17  ;;  %4254 = vmatpush3.msra.mxu1 %v2626_v53 }
0x1150   :  { %4255 = vmatprep.subr.mxu1 %v2624_v5  ;;  %v2589_v3 = vsel %vm622_vm3, %v4483_v35, 0.0 }
0x1151   :  { %2590 = vadd.xlane.f32.xlu0 %v2589_v3  ;;  %4256 = vmatpush3.msra.mxu1 %v2624_v5 }
0x1153   :  { %v4485_v16 = vpop.eup %4484 }
0x1154   :  { %v2595_v39 = vsel %vm622_vm3, %v4485_v16, 0.0 }
0x1155   :  { %2596 = vadd.xlane.f32.xlu0 %v2595_v39 }
0x1157   :  { %v4487_v7 = vpop.eup %4486 }
0x1158   :  { %v2598_v8 = vsel %vm622_vm3, %v4487_v7, 0.0 }
0x1159   :  { %2599 = vadd.xlane.f32.xlu1 %v2598_v8 }
0x116a   :  { %2619 = vrot.lane.b32.xlu1 %v5300_v22, %s5821_s0 }
0x116b   :  { %2621 = vrot.lane.b32.xlu0 %v5310_v47, %s5821_s0 }
0x118a   :  { %2566 = vmax.xlane.f32.xlu0 %v2565_v26 }
0x118e   :  { %2569 = vmax.xlane.f32.xlu1 %v2568_v59 }
0x11d8   :  { %v2594_v28 = vpop.xlane.xlu1 %2593 }
0x11d9   :  { %4488 = vrcp.f32 %v2594_v28 }
0x11da   :  { %v2591_v22 = vpop.xlane.xlu0 %2590 }
0x11db   :  { %4490 = vrcp.f32 %v2591_v22  ;;  %v4547_v22 = vld [vmem:[#allocation2 + $0x10] sm:$0xff] }
0x11de   :  { %v2597_v62 = vpop.xlane.xlu0 %2596 }
0x11df   :  { %4492 = vrcp.f32 %v2597_v62 }
0x11e2   :  { %v2622_v47 = vpop.permute.xlu0 %2621  ;;  %v2600_v20 = vpop.xlane.xlu1 %2599 }
0x11e3   :  { %4494 = vrcp.f32 %v2600_v20  ;;  %4257 = vmatprep.subr.mxu1 %v2622_v47 }
0x11e4   :  { %4258 = vmatpush3.msra.mxu1 %v2622_v47 }
0x11e6   :  { %v2620_v12 = vpop.permute.xlu1 %2619  ;;  %v4489_v29 = vpop.eup %4488 }
0x11e7   :  { %4259 = vmatprep.subr.mxu1 %v2620_v12  ;;  %v2614_v33 = vmul.f32 %v4489_v29, %v4481_v43 }
0x11e8   :  { %v4491_v42 = vpop.eup %4490  ;;  %4260 = vmatpush3.msra.mxu1 %v2620_v12 }
0x11e9   :  { %v2613_v32 = vmul.f32 %v4491_v42, %v4483_v35  ;;  %4270 = vmatprep.subr.mxu1 %v3729_v24 }
0x11eb   :  { %4261 = vmatprep.mubr.msk.f32.mxu1 %vm622_vm3, %v2613_v32 }
0x11ec   :  { %v4493_v41 = vpop.eup %4492  ;;  %4262 = vmatmul.mubr.msk.f32.vlgmr.msra.gmra.mxu1 %vm622_vm3, %v2614_v33 }
0x11ed   :  { %v2615_v48 = vmul.f32 %v4493_v41, %v4485_v16  ;;  %4271 = vmatpush3.msra.mxu1 %v3729_v24 }
0x11ee   :  { %4272 = vmatprep.subr.mxu1 %v3728_v46 }
0x11ef   :  { %4264 = vmatprep.mubr.msk.f32.mxu1 %vm622_vm3, %v2615_v48  ;;  %4273 = vmatpush3.msra.mxu1 %v3728_v46 }
0x11f0   :  { %v4495_v27 = vpop.eup %4494  ;;  %4274 = vmatprep.subr.mxu1 %v3727_v63 }
0x11f1   :  { %v2616_v31 = vmul.f32 %v4495_v27, %v4487_v7  ;;  %4275 = vmatpush3.msra.mxu1 %v3727_v63  ;;  %v4544_v7 = vld [vmem:[#allocation2 + $0x8] sm:$0xff] }
0x11f2   :  { %4276 = vmatprep.subr.mxu1 %v3726_v4 }
0x11f3   :  { %4265 = vmatmul.mubr.msk.f32.gmra.mxu1 %vm622_vm3, %v2616_v31 }
0x11f4   :  { %4277 = vmatpush3.msra.mxu1 %v3726_v4 }
0x1213   :  { %v2567_v60 = vpop.xlane.xlu0 %2566 }
0x1214   :  { %v2575_v34 = vsub.f32 %v2551_v18, %v2567_v60  ;;  %v4546_v18 = vld [vmem:[#allocation2 + $0x18] sm:$0xff] }
0x1216   :  { %v2585_v55 = vmul.f32 1.442695, %v2575_v34 }
0x1217   :  { %v2570_v45 = vpop.xlane.xlu1 %2569 }
0x1218   :  { %v2576_v54 = vsub.f32 %v2552_v25, %v2570_v45 }
0x121a   :  { %v2587_v56 = vmul.f32 1.442695, %v2576_v54 }
0x121c   :  { %4496 = vpow2.f32 %v2587_v56  ;;  %v3745_v56 = vld [vmem:[%s5782_s12 + $0x38] sm:$0xff] }
0x121d   :  { %4498 = vpow2.f32 %v2585_v55  ;;  %4287 = vmatprep.subr.mxu0 %v3745_v56 }
0x121e   :  { %4288 = vmatpush3.msra.mxu0 %v3745_v56 }
0x1229   :  { %v4497_v57 = vpop.eup %4496 }
0x122a   :  { %v2604_v30 = vsel %vm622_vm3, %v4497_v57, 0.0  ;;  %v4499_v21 = vpop.eup %4498 }
0x122b   :  { %2605 = vadd.xlane.f32.xlu0 %v2604_v30  ;;  %v2601_v58 = vsel %vm622_vm3, %v4499_v21, 0.0  ;;  %v3743_v30 = vld [vmem:[%s5782_s12 + $0x28] sm:$0xff] }
0x122f   :  { %2602 = vadd.xlane.f32.xlu0 %v2601_v58 }
0x12ac   :  { %v4263_v6 = vpop.f32.mrf.mxu1 }
0x12ad   :  { %2758 = vrot.lane.b32.xlu1 %v4263_v6, %s5822_s26 }
0x12ae   :  { %v2721_v44 = vpop.f32.mrf.mxu1 }
0x12af   :  { %2756 = vrot.lane.b32.xlu0 %v2721_v44, %s5822_s26 }
0x12b3   :  { %v4266_v52 = vpop.f32.mrf.mxu1 }
0x12b4   :  { %v2606_v13 = vpop.xlane.xlu0 %2605 }
0x12b5   :  { %v2731_v19 = vpop.f32.mrf.mxu1  ;;  %4500 = vrcp.f32 %v2606_v13 }
0x12b6   :  { %2760 = vrot.lane.b32.xlu1 %v2731_v19, %s5822_s26 }
0x12b8   :  { %v2603_v14 = vpop.xlane.xlu0 %2602 }
0x12b9   :  { %4502 = vrcp.f32 %v2603_v14 }
0x12ba   :  { %2762 = vrot.lane.b32.xlu1 %v4266_v52, %s5822_s26 }
0x12c2   :  { %v4501_v49 = vpop.eup %4500 }
0x12c3   :  { %v2618_v51 = vmul.f32 %v4501_v49, %v4497_v57  ;;  %v3744_v57 = vld [vmem:[%s5782_s12 + $0x30] sm:$0xff] }
0x12c4   :  { %4289 = vmatprep.subr.mxu0 %v3744_v57 }
0x12c5   :  { %4290 = vmatpush3.msra.mxu0 %v3744_v57 }
0x12c6   :  { %v4503_v40 = vpop.eup %4502  ;;  %4291 = vmatprep.subr.mxu0 %v3743_v30 }
0x12c7   :  { %v2617_v23 = vmul.f32 %v4503_v40, %v4499_v21  ;;  %v3742_v21 = vld [vmem:[%s5782_s12 + $0x20] sm:$0xff]  ;;  %4292 = vmatpush3.msra.mxu0 %v3743_v30 }
0x12c8   :  { %4293 = vmatprep.subr.mxu0 %v3742_v21 }
0x12c9   :  { %4267 = vmatprep.mubr.msk.f32.mxu1 %vm622_vm3, %v2617_v23  ;;  %4294 = vmatpush3.msra.mxu0 %v3742_v21  ;;  %v3761_v21 = vld [vmem:[%s5784_s14 + $0x78] sm:$0xff] }
0x12ca   :  { %4268 = vmatmul.mubr.msk.f32.gmra.mxu1 %vm622_vm3, %v2618_v51  ;;  %4304 = vmatprep.subr.mxu1 %v3761_v21 }
0x131f   :  { %v2759_v1 = vpop.permute.xlu1 %2758 }
0x1320   :  { %v2775_v43 = vsel %vm490_vm2, %v5464_v36, %v2759_v1  ;;  %v5543_v36 = vld [vmem:[%s5779_s9 + $0x1] ss:$0 sm:$0xff] }
0x1321   :  { %v2757_v53 = vpop.permute.xlu0 %2756 }
0x1322   :  { %v2774_v2 = vsel %vm490_vm2, %v5466_v15, %v2757_v53 }
0x1323   :  { %4278 = vmatprep.mubr.msk.f32.mxu1 %vm206_vm1, %v2774_v2 }
0x1324   :  { %4279 = vmatmul.mubr.msk.f32.vlgmr.msra.gmra.mxu1 %vm206_vm1, %v2775_v43 }
0x1325   :  { %4305 = vmatpush3.msra.mxu1 %v3761_v21 }
0x1328   :  { %v2761_v17 = vpop.permute.xlu1 %2760 }
0x1329   :  { %v2776_v35 = vsel %vm490_vm2, %v5470_v50, %v2761_v17 }
0x132a   :  { %4281 = vmatprep.mubr.msk.f32.mxu1 %vm206_vm1, %v2776_v35 }
0x132c   :  { %v2763_v5 = vpop.permute.xlu1 %2762 }
0x132d   :  { %v2777_v3 = vsel %vm490_vm2, %v5468_v0, %v2763_v5 }
0x132e   :  { %4282 = vmatmul.mubr.msk.f32.gmra.mxu1 %vm206_vm1, %v2777_v3 }
0x138a   :  { %v4269_v15 = vpop.f32.mrf.mxu1 }
0x138c   :  { %v2741_v16 = vpop.f32.mrf.mxu1 }
0x13e4   :  { %v4280_v39 = vpop.f32.mrf.mxu1 }
0x13e5   :  { %v2899_v8 = vadd.f32 %v4544_v7, %v4280_v39 }
0x13e6   :  { %v2869_v61 = vpop.f32.mrf.mxu1 }
0x13e7   :  { %v2913_v50 = vadd.f32 %v5543_v36, %v2899_v8  ;;  %v2898_v10 = vadd.f32 %v4545_v9, %v2869_v61 }
0x13e9   :  { %2919 = vst.msk [vmem:[#allocation2 + $0x8] sm:$0xff] %vm206_vm1, %v2913_v50  ;;  %v2912_v0 = vadd.f32 %v5543_v36, %v2898_v10 }
0x13eb   :  { %2918 = vst.msk [vmem:[#allocation2] sm:$0xff] %vm206_vm1, %v2912_v0 }
0x13ee   :  { %v4283_v11 = vpop.f32.mrf.mxu1 }
0x13ef   :  { %v2901_v25 = vadd.f32 %v4546_v18, %v4283_v11 }
0x13f0   :  { %v2879_v26 = vpop.f32.mrf.mxu1  ;;  %v5549_v59 = vld [vmem:[#allocation2 + $0x8] sm:$0xff] }
0x13f1   :  { %v2915_v28 = vadd.f32 %v5543_v36, %v2901_v25  ;;  %v2900_v62 = vadd.f32 %v4547_v22, %v2879_v26  ;;  %v2937_v47 = vsel %vm206_vm1, %v5549_v59, 0.0  ;;  %v2959_v42 = vmul.f32 %v5549_v59, %v5549_v59 }
0x13f2   :  { %2938 = vadd.xlane.f32.xlu1 %v2937_v47  ;;  %v5554_v20 = vld [vmem:[#allocation2] sm:$0xff] }
0x13f3   :  { %2921 = vst.msk [vmem:[#allocation2 + $0x18] sm:$0xff] %vm206_vm1, %v2915_v28  ;;  %v2914_v12 = vadd.f32 %v5543_v36, %v2900_v62  ;;  %v2934_v29 = vsel %vm206_vm1, %v5554_v20, 0.0  ;;  %v2967_v32 = vsel %vm206_vm1, %v2959_v42, 0.0  ;;  %v2958_v33 = vmul.f32 %v5554_v20, %v5554_v20  ;;  %v5606_v47 = vld [vmem:[%s5780_s10 + $0x1] ss:$0 sm:$0xff] }
0x13f4   :  { %2935 = vadd.xlane.f32.xlu0 %v2934_v29  ;;  %v5612_v29 = vld [vmem:[%s5781_s11 + $0x1] ss:$0 sm:$0xff] }
0x13f5   :  { %2920 = vst.msk [vmem:[#allocation2 + $0x10] sm:$0xff] %vm206_vm1, %v2914_v12  ;;  %v2964_v48 = vsel %vm206_vm1, %v2958_v33, 0.0 }
0x13f8   :  { %2968 = vadd.xlane.f32.xlu0 %v2967_v32 }
0x13fa   :  { %v5566_v41 = vld [vmem:[#allocation2 + $0x18] sm:$0xff] }
0x13fb   :  { %v2943_v27 = vsel %vm206_vm1, %v5566_v41, 0.0  ;;  %v2961_v31 = vmul.f32 %v5566_v41, %v5566_v41 }
0x13fc   :  { %2965 = vadd.xlane.f32.xlu0 %v2964_v48  ;;  %2944 = vadd.xlane.f32.xlu1 %v2943_v27  ;;  %v5573_v60 = vld [vmem:[#allocation2 + $0x10] sm:$0xff] }
0x13fd   :  { %v2973_v34 = vsel %vm206_vm1, %v2961_v31, 0.0  ;;  %v2940_v45 = vsel %vm206_vm1, %v5573_v60, 0.0  ;;  %v2960_v54 = vmul.f32 %v5573_v60, %v5573_v60 }
0x13ff   :  { %v2970_v55 = vsel %vm206_vm1, %v2960_v54, 0.0 }
0x1400   :  { %2974 = vadd.xlane.f32.xlu1 %v2973_v34  ;;  %2941 = vadd.xlane.f32.xlu0 %v2940_v45 }
0x1404   :  { %2971 = vadd.xlane.f32.xlu0 %v2970_v55 }
0x1411   :  { %2766 = vrot.lane.b32.xlu1 %v4269_v15, %s5822_s26 }
0x141a   :  { %2764 = vrot.lane.b32.xlu0 %v2741_v16, %s5822_s26 }
0x147b   :  { %v2939_v58 = vpop.xlane.xlu1 %2938 }
0x147c   :  { %v2953_v46 = vmul.f32 0.03125, %v2939_v58  ;;  %v3760_v58 = vld [vmem:[%s5784_s14 + $0x70] sm:$0xff] }
0x147d   :  { %v2936_v24 = vpop.xlane.xlu0 %2935  ;;  %4306 = vmatprep.subr.mxu1 %v3760_v58 }
0x147e   :  { %v2989_v4 = vmul.f32 %v2953_v46, %v2953_v46  ;;  %v2952_v6 = vmul.f32 0.03125, %v2936_v24  ;;  %v3007_v28 = vsub.f32 %v5549_v59, %v2953_v46  ;;  %4307 = vmatpush3.msra.mxu1 %v3760_v58  ;;  %v3759_v24 = vld [vmem:[%s5784_s14 + $0x68] sm:$0xff]  ;;  %v3758_v46 = vld [vmem:[%s5784_s14 + $0x60] sm:$0xff] }
0x147f   :  { %4308 = vmatprep.subr.mxu1 %v3759_v24 }
0x1480   :  { %v2988_v14 = vmul.f32 %v2952_v6, %v2952_v6  ;;  %v3006_v62 = vsub.f32 %v5554_v20, %v2952_v6  ;;  %4309 = vmatpush3.msra.mxu1 %v3759_v24  ;;  %v3755_v6 = vld [vmem:[%s5784_s14 + $0x48] sm:$0xff] }
0x1481   :  { %v2969_v63 = vpop.xlane.xlu0 %2968  ;;  %4310 = vmatprep.subr.mxu1 %v3758_v46 }
0x1482   :  { %v2983_v44 = vmul.f32 0.03125, %v2969_v63  ;;  %4311 = vmatpush3.msra.mxu1 %v3758_v46  ;;  %v3757_v63 = vld [vmem:[%s5784_s14 + $0x58] sm:$0xff] }
0x1483   :  { %4312 = vmatprep.subr.mxu1 %v3757_v63 }
0x1484   :  { %v2995_v52 = vsub.f32 %v2983_v44, %v2989_v4  ;;  %4313 = vmatpush3.msra.mxu1 %v3757_v63  ;;  %v3756_v4 = vld [vmem:[%s5784_s14 + $0x50] sm:$0xff]  ;;  %v3754_v44 = vld [vmem:[%s5784_s14 + $0x40] sm:$0xff]  ;;  %s4580_s14 = smov [#allocation3]  }
0x1485   :  { %v2966_v13 = vpop.xlane.xlu0 %2965  ;;  %v2945_v19 = vpop.xlane.xlu1 %2944  ;;  %4314 = vmatprep.subr.mxu1 %v3756_v4  ;;  %s3592_s25 = sshll.u32 %s4580_s14, 4  ;;  %s3593_s25 = int_to_ptr.vmem [resolvable:$true] %s3592_s25 }
0x1486   :  { %v3001_v49 = vmax.f32 %v2995_v52, 0.0  ;;  %v2982_v40 = vmul.f32 0.03125, %v2966_v13  ;;  %v2955_v23 = vmul.f32 0.03125, %v2945_v19  ;;  %4315 = vmatpush3.msra.mxu1 %v3756_v4  ;;  %v4548_v13 = vld [vmem:[#allocation2 + $0x28] sm:$0xff]  ;;  %p4555_p1 = scmp.lt.s32.totalorder %s3593_s25, %s3593_s25 }
0x1487   :  { %4316 = vmatprep.subr.mxu1 %v3755_v6 }
0x1488   :  { %v3013_v51 = vadd.f32 1e-12, %v3001_v49  ;;  %v2994_v1 = vsub.f32 %v2982_v40, %v2988_v14  ;;  %v2991_v53 = vmul.f32 %v2955_v23, %v2955_v23  ;;  %v3009_v33 = vsub.f32 %v5566_v41, %v2955_v23  ;;  %4317 = vmatpush3.msra.mxu1 %v3755_v6  ;;  %v4549_v40 = vld [vmem:[#allocation2 + $0x20] sm:$0xff] }
0x1489   :  { %v2942_v2 = vpop.xlane.xlu0 %2941  ;;  %v2975_v43 = vpop.xlane.xlu1 %2974  ;;  %4318 = vmatprep.subr.mxu1 %v3754_v44 }
0x148a   :  { %4504 = vrsqrt.f32 %v3013_v51  ;;  %v3000_v17 = vmax.f32 %v2994_v1, 0.0  ;;  %v2954_v35 = vmul.f32 0.03125, %v2942_v2  ;;  %v2985_v5 = vmul.f32 0.03125, %v2975_v43  ;;  %4319 = vmatpush3.msra.mxu1 %v3754_v44  ;;  %v5662_v2 = vld [vmem:[%s5783_s13 + $0x1] ss:$0 sm:$0xff]  ;;  %s4550_s13 = scalar_lea.vmem %s3593_s25, 32 }
0x148b   :  { %p4551_p0 = scmp.ne.s32.totalorder %s3593_s25, %s4550_s13  ;;  %p4556_p2 = scmp.lt.s32.totalorder %s4550_s13, %s4550_s13 }
0x148c   :  { %v3012_v3 = vadd.f32 1e-12, %v3000_v17  ;;  %v2997_v15 = vsub.f32 %v2985_v5, %v2991_v53  ;;  %v2990_v39 = vmul.f32 %v2954_v35, %v2954_v35  ;;  %v3008_v34 = vsub.f32 %v5573_v60, %v2954_v35 }
0x148d   :  { %v2972_v16 = vpop.xlane.xlu0 %2971  ;;  %v2767_v9 = vpop.permute.xlu1 %2766  ;;  %p4557_p3 = por %p4556_p2, %p4555_p1 }
0x148e   :  { %4506 = vrsqrt.f32 %v3012_v3  ;;  %v3003_v7 = vmax.f32 %v2997_v15, 0.0  ;;  %v2984_v8 = vmul.f32 0.03125, %v2972_v16  ;;  %v2779_v18 = vsel %vm490_vm2, %v5472_v37, %v2767_v9 }
0x148f   :  { %p4558_p4 = pnand %p4557_p3, %p4551_p0 }
0x1490   :  { %v3015_v61 = vadd.f32 1e-12, %v3003_v7  ;;  %v2996_v50 = vsub.f32 %v2984_v8, %v2990_v39 }
0x1491   :  { %v2765_v10 = vpop.permute.xlu0 %2764 }
0x1492   :  { %4508 = vrsqrt.f32 %v3015_v61  ;;  %v3002_v0 = vmax.f32 %v2996_v50, 0.0  ;;  %v2778_v11 = vsel %vm490_vm2, %v5474_v38, %v2765_v10 }
0x1493   :  { %4284 = vmatprep.mubr.msk.f32.mxu1 %vm206_vm1, %v2778_v11 }
0x1494   :  { %v3014_v25 = vadd.f32 1e-12, %v3002_v0  ;;  %4285 = vmatmul.mubr.msk.f32.gmra.mxu1 %vm206_vm1, %v2779_v18 }
0x1496   :  { %4510 = vrsqrt.f32 %v3014_v25 }
0x1497   :  { %v4505_v26 = vpop.eup %4504 }
0x1498   :  { %v3025_v22 = vmul.f32 %v4505_v26, %v3007_v28 }
0x149a   :  { %v3037_v37 = vmul.f32 %v5606_v47, %v3025_v22 }
0x149b   :  { %v4507_v38 = vpop.eup %4506 }
0x149c   :  { %v3024_v12 = vmul.f32 %v4507_v38, %v3006_v62  ;;  %v3049_v27 = vadd.f32 %v5612_v29, %v3037_v37 }
0x149e   :  { %v3036_v42 = vmul.f32 %v5606_v47, %v3024_v12 }
0x149f   :  { %v4509_v32 = vpop.eup %4508 }
0x14a0   :  { %v3048_v48 = vadd.f32 %v5612_v29, %v3036_v42  ;;  %v3027_v31 = vmul.f32 %v4509_v32, %v3009_v33 }
0x14a2   :  { %4295 = vmatprep.mubr.msk.f32.mxu0 %vm206_vm1, %v3048_v48  ;;  %v3039_v55 = vmul.f32 %v5606_v47, %v3027_v31 }
0x14a3   :  { %v4511_v45 = vpop.eup %4510  ;;  %4296 = vmatmul.mubr.msk.f32.vlgmr.msra.gmra.mxu0 %vm206_vm1, %v3049_v27 }
0x14a4   :  { %v3026_v54 = vmul.f32 %v4511_v45, %v3008_v34  ;;  %v3051_v30 = vadd.f32 %v5612_v29, %v3039_v55 }
0x14a6   :  { %v3038_v56 = vmul.f32 %v5606_v47, %v3026_v54 }
0x14a8   :  { %v3050_v57 = vadd.f32 %v5612_v29, %v3038_v56 }
0x14aa   :  { %4298 = vmatprep.mubr.msk.f32.mxu0 %vm206_vm1, %v3050_v57 }
0x14ab   :  { %4299 = vmatmul.mubr.msk.f32.gmra.mxu0 %vm206_vm1, %v3051_v30 }
0x1554   :  { %v4286_v52 = vpop.f32.mrf.mxu1 }
0x1555   :  { %v2903_v19 = vadd.f32 %v4548_v13, %v4286_v52 }
0x1556   :  { %v2889_v14 = vpop.f32.mrf.mxu1 }
0x1557   :  { %v2917_v49 = vadd.f32 %v5543_v36, %v2903_v19  ;;  %v2902_v23 = vadd.f32 %v4549_v40, %v2889_v14 }
0x1559   :  { %2923 = vst.msk [vmem:[#allocation2 + $0x28] sm:$0xff] %vm206_vm1, %v2917_v49  ;;  %v2916_v51 = vadd.f32 %v5543_v36, %v2902_v23 }
0x155b   :  { %2922 = vst.msk [vmem:[#allocation2 + $0x20] sm:$0xff] %vm206_vm1, %v2916_v51 }
0x1560   :  { %v5655_v1 = vld [vmem:[#allocation2 + $0x28] sm:$0xff] }
0x1561   :  { %v2949_v53 = vsel %vm206_vm1, %v5655_v1, 0.0  ;;  %v2963_v5 = vmul.f32 %v5655_v1, %v5655_v1 }
0x1562   :  { %2950 = vadd.xlane.f32.xlu0 %v2949_v53  ;;  %v5664_v43 = vld [vmem:[#allocation2 + $0x20] sm:$0xff] }
0x1563   :  { %v4297_v17 = vpop.f32.mrf.mxu0  ;;  %v2946_v35 = vsel %vm206_vm1, %v5664_v43, 0.0  ;;  %v2962_v36 = vmul.f32 %v5664_v43, %v5664_v43  ;;  %v2979_v8 = vsel %vm206_vm1, %v2963_v5, 0.0 }
0x1564   :  { %v3157_v3 = vadd.f32 %v4297_v17, %v5662_v2  ;;  %2947 = vadd.xlane.f32.xlu1 %v2946_v35 }
0x1565   :  { %v3151_v15 = vpop.f32.mrf.mxu0  ;;  %v2976_v16 = vsel %vm206_vm1, %v2962_v36, 0.0 }
0x1566   :  { %v3181_v39 = vmul.f32 %v3157_v3, %v3157_v3  ;;  %v3152_v7 = vadd.f32 %v5662_v2, %v3151_v15  ;;  %2977 = vadd.xlane.f32.xlu0 %v2976_v16 }
0x1568   :  { %v3187_v61 = vmul.f32 %v3181_v39, %v3157_v3  ;;  %v3180_v50 = vmul.f32 %v3152_v7, %v3152_v7  ;;  %2980 = vadd.xlane.f32.xlu1 %v2979_v8 }
0x156a   :  { %v3193_v9 = vmul.f32 0.044715, %v3187_v61  ;;  %v3186_v10 = vmul.f32 %v3180_v50, %v3152_v7 }
0x156b   :  { %v4300_v0 = vpop.f32.mrf.mxu0 }
0x156c   :  { %v3199_v11 = vadd.f32 %v3193_v9, %v3157_v3  ;;  %v3192_v18 = vmul.f32 0.044715, %v3186_v10  ;;  %v3167_v25 = vadd.f32 %v4300_v0, %v5662_v2 }
0x156d   :  { %v3161_v26 = vpop.f32.mrf.mxu0 }
0x156e   :  { %v3205_v28 = vmul.f32 0.7978846, %v3199_v11  ;;  %v3198_v22 = vadd.f32 %v3192_v18, %v3152_v7  ;;  %v3183_v62 = vmul.f32 %v3167_v25, %v3167_v25  ;;  %v3162_v38 = vadd.f32 %v5662_v2, %v3161_v26 }
0x1570   :  { %4512 = vtanh.f32 %v3205_v28  ;;  %v3204_v12 = vmul.f32 0.7978846, %v3198_v22  ;;  %v3189_v37 = vmul.f32 %v3183_v62, %v3167_v25  ;;  %v3182_v42 = vmul.f32 %v3162_v38, %v3162_v38  ;;  %v5693_v62 = vld [vmem:[%s5785_s15 + $0x1] ss:$0 sm:$0xff] }
0x1572   :  { %4514 = vtanh.f32 %v3204_v12  ;;  %v3195_v32 = vmul.f32 0.044715, %v3189_v37  ;;  %v3188_v33 = vmul.f32 %v3182_v42, %v3162_v38 }
0x1574   :  { %v3201_v48 = vadd.f32 %v3195_v32, %v3167_v25  ;;  %v3194_v27 = vmul.f32 0.044715, %v3188_v33 }
0x1576   :  { %v3207_v31 = vmul.f32 0.7978846, %v3201_v48  ;;  %v3200_v34 = vadd.f32 %v3194_v27, %v3162_v38 }
0x1578   :  { %4516 = vtanh.f32 %v3207_v31  ;;  %v3206_v45 = vmul.f32 0.7978846, %v3200_v34 }
0x157a   :  { %4518 = vtanh.f32 %v3206_v45 }
0x157d   :  { %v4513_v54 = vpop.eup %4512 }
0x157e   :  { %v3217_v55 = vadd.f32 1.0, %v4513_v54  ;;  %v4578_v54 = vmov 0.0  }
0x157f   :  { %v4515_v56 = vpop.eup %4514  ;;  %4329 = vmatprep.subr.mxu0 %v4578_v54 }
0x1580   :  { %v3216_v57 = vadd.f32 1.0, %v4515_v56  ;;  %v3223_v30 = vmul.f32 0.5, %v3217_v55  ;;  %v3417_v55 = vld [vmem:[%s5788_s18 + $0x8] sm:$0xff]  ;;  %v3416_v56 = vld [vmem:[%s5788_s18] sm:$0xff] }
0x1582   :  { %v3222_v21 = vmul.f32 0.5, %v3216_v57  ;;  %v3229_v46 = vmul.f32 %v3223_v30, %v3157_v3 }
0x1584   :  { %v3228_v58 = vmul.f32 %v3222_v21, %v3152_v7 }
0x1585   :  { %v4517_v24 = vpop.eup %4516 }
0x1586   :  { %4320 = vmatprep.mubr.msk.f32.mxu1 %vm92_vm0, %v3228_v58  ;;  %v3219_v63 = vadd.f32 1.0, %v4517_v24 }
0x1587   :  { %v4519_v4 = vpop.eup %4518  ;;  %4321 = vmatmul.mubr.msk.f32.vlgmr.msra.gmra.mxu1 %vm92_vm0, %v3229_v46 }
0x1588   :  { %v3218_v6 = vadd.f32 1.0, %v4519_v4  ;;  %v3225_v44 = vmul.f32 0.5, %v3219_v63 }
0x158a   :  { %v3224_v52 = vmul.f32 0.5, %v3218_v6  ;;  %v3231_v19 = vmul.f32 %v3225_v44, %v3167_v25 }
0x158c   :  { %v3230_v13 = vmul.f32 %v3224_v52, %v3162_v38 }
0x158e   :  { %4323 = vmatprep.mubr.msk.f32.mxu1 %vm92_vm0, %v3230_v13 }
0x158f   :  { %4324 = vmatmul.mubr.msk.f32.gmra.mxu1 %vm92_vm0, %v3231_v19 }
0x15eb   :  { %v2951_v14 = vpop.xlane.xlu0 %2950 }
0x15ec   :  { %v2957_v40 = vmul.f32 0.03125, %v2951_v14 }
0x15ed   :  { %v2948_v49 = vpop.xlane.xlu1 %2947 }
0x15ee   :  { %v2956_v23 = vmul.f32 0.03125, %v2948_v49  ;;  %v2993_v36 = vmul.f32 %v2957_v40, %v2957_v40  ;;  %v3011_v9 = vsub.f32 %v5655_v1, %v2957_v40 }
0x15ef   :  { %v2978_v51 = vpop.xlane.xlu0 %2977 }
0x15f0   :  { %v2992_v53 = vmul.f32 %v2956_v23, %v2956_v23  ;;  %v2986_v17 = vmul.f32 0.03125, %v2978_v51  ;;  %v3010_v61 = vsub.f32 %v5664_v43, %v2956_v23 }
0x15f1   :  { %v2981_v35 = vpop.xlane.xlu1 %2980 }
0x15f2   :  { %v2998_v5 = vsub.f32 %v2986_v17, %v2992_v53  ;;  %v2987_v3 = vmul.f32 0.03125, %v2981_v35 }
0x15f4   :  { %v3004_v15 = vmax.f32 %v2998_v5, 0.0  ;;  %v2999_v16 = vsub.f32 %v2987_v3, %v2993_v36 }
0x15f6   :  { %v3016_v39 = vadd.f32 1e-12, %v3004_v15  ;;  %v3005_v7 = vmax.f32 %v2999_v16, 0.0 }
0x15f8   :  { %4520 = vrsqrt.f32 %v3016_v39  ;;  %v3017_v8 = vadd.f32 1e-12, %v3005_v7 }
0x15fa   :  { %4522 = vrsqrt.f32 %v3017_v8 }
0x1605   :  { %v4521_v50 = vpop.eup %4520 }
0x1606   :  { %v3028_v10 = vmul.f32 %v4521_v50, %v3010_v61 }
0x1607   :  { %v4523_v0 = vpop.eup %4522 }
0x1608   :  { %v3040_v11 = vmul.f32 %v5606_v47, %v3028_v10  ;;  %v3029_v18 = vmul.f32 %v4523_v0, %v3011_v9  ;;  %v3770_v9 = vld [vmem:[%s5786_s16] ss:$0 sm:$0xff] }
0x1609   :  { %v3771_v0 = vld [vmem:[%s5787_s17] ss:$0 sm:$0xff] }
0x160a   :  { %v3052_v25 = vadd.f32 %v5612_v29, %v3040_v11  ;;  %v3041_v26 = vmul.f32 %v5606_v47, %v3029_v18 }
0x160c   :  { %4301 = vmatprep.mubr.msk.f32.mxu0 %vm206_vm1, %v3052_v25  ;;  %v3053_v28 = vadd.f32 %v5612_v29, %v3041_v26  ;;  %v3504_v25 = vld [vmem:[%s5790_s20 + $0x18] sm:$0xff]  ;;  %v3503_v26 = vld [vmem:[%s5790_s20 + $0x10] sm:$0xff] }
0x160e   :  { %4302 = vmatmul.mubr.msk.f32.gmra.mxu0 %vm206_vm1, %v3053_v28  ;;  %v3502_v28 = vld [vmem:[%s5790_s20 + $0x8] sm:$0xff] }
0x160f   :  { %4337 = vmatprep.mubr.msk.f32.mxu0 %vm4579_vm5, %v4578_v54 }
0x1647   :  { %v4322_v22 = vpop.f32.mrf.mxu1 }
0x1648   :  { %v3357_v38 = vadd.f32 %v4322_v22, %v5549_v59  ;;  %v3501_v22 = vld [vmem:[%s5790_s20] sm:$0xff] }
0x1649   :  { %v3327_v12 = vpop.f32.mrf.mxu1 }
0x164a   :  { %v3371_v37 = vadd.f32 %v5693_v62, %v3357_v38  ;;  %v3356_v42 = vadd.f32 %v3327_v12, %v5554_v20 }
0x164c   :  { %3377 = vst.msk [vmem:[#allocation2 + $0x8] sm:$0xff] %vm206_vm1, %v3371_v37  ;;  %v3370_v47 = vadd.f32 %v5693_v62, %v3356_v42 }
0x164e   :  { %3376 = vst.msk [vmem:[#allocation2] sm:$0xff] %vm206_vm1, %v3370_v47 }
0x164f   :  { %v4325_v29 = vpop.f32.mrf.mxu1 }
0x1650   :  { %v3359_v32 = vadd.f32 %v4325_v29, %v5566_v41  ;;  %v3419_v41 = vld [vmem:[%s5788_s18 + $0x18] sm:$0xff] }
0x1651   :  { %v3337_v33 = vpop.f32.mrf.mxu1  ;;  %4330 = vmatpush3.msra.mxu0 %v3419_v41 }
0x1652   :  { %v3373_v48 = vadd.f32 %v5693_v62, %v3359_v32  ;;  %v3358_v27 = vadd.f32 %v3337_v33, %v5573_v60  ;;  %4331 = vmatprep.subr.mxu0 %v4578_v54  ;;  %v3418_v60 = vld [vmem:[%s5788_s18 + $0x10] sm:$0xff]  ;;  %v3772_v32 = vld [vmem:[%s5789_s19] ss:$0 sm:$0xff] }
0x1653   :  { %4332 = vmatpush3.msra.mxu0 %v3418_v60 }
0x1654   :  { %3379 = vst.msk [vmem:[#allocation2 + $0x18] sm:$0xff] %vm206_vm1, %v3373_v48  ;;  %v3372_v59 = vadd.f32 %v5693_v62, %v3358_v27  ;;  %4333 = vmatprep.subr.mxu0 %v4578_v54 }
0x1655   :  { %4334 = vmatpush3.msra.mxu0 %v3417_v55 }
0x1656   :  { %3378 = vst.msk [vmem:[#allocation2 + $0x10] sm:$0xff] %vm206_vm1, %v3372_v59  ;;  %4335 = vmatprep.subr.mxu0 %v4578_v54 }
0x1657   :  { %4336 = vmatpush3.msra.mxu0 %v3416_v56 }
0x1658   :  { %4340 = vmatprep.subr.mxu0 %v4578_v54 }
0x165b   :  { %v3382_v20 = vld [vmem:[#allocation2] ss:$24 sm:$0x3] }
0x165c   :  { %v3386_v31 = vsel %vm3385_vm4, %v3382_v20, 0.0  ;;  %v3390_v34 = vmul.f32 %v3382_v20, %v3382_v20 }
0x165d   :  { %3387 = vadd.xlane.f32.xlu0 %v3386_v31 }
0x165e   :  { %v3391_v45 = vsel %vm3385_vm4, %v3390_v34, 0.0 }
0x165f   :  { %3392 = vadd.xlane.f32.xlu1 %v3391_v45 }
0x16ce   :  { %v4303_v57 = vpop.f32.mrf.mxu0 }
0x16cf   :  { %v3177_v30 = vadd.f32 %v4303_v57, %v5662_v2 }
0x16d0   :  { %v3171_v21 = vpop.f32.mrf.mxu0 }
0x16d1   :  { %v3185_v58 = vmul.f32 %v3177_v30, %v3177_v30  ;;  %v3172_v24 = vadd.f32 %v5662_v2, %v3171_v21 }
0x16d3   :  { %v3191_v46 = vmul.f32 %v3185_v58, %v3177_v30  ;;  %v3184_v63 = vmul.f32 %v3172_v24, %v3172_v24 }
0x16d5   :  { %v3197_v4 = vmul.f32 0.044715, %v3191_v46  ;;  %v3190_v6 = vmul.f32 %v3184_v63, %v3172_v24 }
0x16d7   :  { %v3203_v44 = vadd.f32 %v3197_v4, %v3177_v30  ;;  %v3196_v52 = vmul.f32 0.044715, %v3190_v6 }
0x16d9   :  { %v3209_v13 = vmul.f32 0.7978846, %v3203_v44  ;;  %v3202_v19 = vadd.f32 %v3196_v52, %v3172_v24 }
0x16db   :  { %4524 = vtanh.f32 %v3209_v13  ;;  %v3208_v14 = vmul.f32 0.7978846, %v3202_v19 }
0x16dd   :  { %4526 = vtanh.f32 %v3208_v14 }
0x16e6   :  { %v3388_v49 = vpop.xlane.xlu0 %3387 }
0x16e7   :  { %v3389_v40 = vmul.f32 0.03125, %v3388_v49 }
0x16e8   :  { %v4525_v23 = vpop.eup %4524  ;;  %v3393_v51 = vpop.xlane.xlu1 %3392 }
0x16e9   :  { %v3395_v53 = vmul.f32 %v3389_v40, %v3389_v40  ;;  %v3394_v17 = vmul.f32 0.03125, %v3393_v51  ;;  %v3221_v35 = vadd.f32 1.0, %v4525_v23  ;;  %v3398_v61 = vsub.f32 %v3382_v20, %v3389_v40 }
0x16ea   :  { %v4527_v36 = vpop.eup %4526 }
0x16eb   :  { %v3396_v2 = vsub.f32 %v3394_v17, %v3395_v53  ;;  %v3220_v5 = vadd.f32 1.0, %v4527_v36  ;;  %v3227_v3 = vmul.f32 0.5, %v3221_v35 }
0x16ed   :  { %v3397_v15 = vmax.f32 %v3396_v2, 0.0  ;;  %v3226_v16 = vmul.f32 0.5, %v3220_v5  ;;  %v3233_v8 = vmul.f32 %v3227_v3, %v3177_v30 }
0x16ef   :  { %v3399_v39 = vadd.f32 1e-12, %v3397_v15  ;;  %v3232_v7 = vmul.f32 %v3226_v16, %v3172_v24 }
0x16f1   :  { %4528 = vrsqrt.f32 %v3399_v39  ;;  %4326 = vmatprep.mubr.msk.f32.mxu1 %vm92_vm0, %v3232_v7 }
0x16f2   :  { %4327 = vmatmul.mubr.msk.f32.gmra.mxu1 %vm92_vm0, %v3233_v8 }
0x16fe   :  { %v4529_v50 = vpop.eup %4528 }
0x16ff   :  { %v3401_v10 = vmul.f32 %v4529_v50, %v3398_v61 }
0x1701   :  { %v3408_v11 = vmul.f32 %v3770_v9, %v3401_v10 }
0x1703   :  { %v3415_v18 = vadd.f32 %v3771_v0, %v3408_v11 }
0x1705   :  { %4338 = vmatmul.mubr.msk.f32.vlgmr.msra.gmra.mxu0 %vm206_vm1, %v3415_v18 }
0x1706   :  { %4348 = vmatprep.mubr.msk.f32.mxu0 %vm4579_vm5, %v4578_v54  ;;  %4341 = vmatpush3.msra.mxu0 %v3504_v25 }
0x1707   :  { %4342 = vmatprep.subr.mxu0 %v4578_v54 }
0x1708   :  { %4343 = vmatpush3.msra.mxu0 %v3503_v26 }
0x1709   :  { %4344 = vmatprep.subr.mxu0 %v4578_v54 }
0x170a   :  { %4345 = vmatpush3.msra.mxu0 %v3502_v28 }
0x170b   :  { %4346 = vmatprep.subr.mxu0 %v4578_v54 }
0x170c   :  { %4347 = vmatpush3.msra.mxu0 %v3501_v22 }
0x17b2   :  { %v4328_v38 = vpop.f32.mrf.mxu1 }
0x17b3   :  { %v3361_v12 = vadd.f32 %v4328_v38, %v5655_v1 }
0x17b4   :  { %v3347_v37 = vpop.f32.mrf.mxu1 }
0x17b5   :  { %v3375_v42 = vadd.f32 %v5693_v62, %v3361_v12  ;;  %v3360_v47 = vadd.f32 %v3347_v37, %v5664_v43  ;;  %v3774_v43 = vld [vmem:[%s5791_s21] ss:$0 sm:$0xff] }
0x17b7   :  { %3381 = vst.msk [vmem:[#allocation2 + $0x28] sm:$0xff] %vm206_vm1, %v3375_v42  ;;  %v3374_v29 = vadd.f32 %v5693_v62, %v3360_v47 }
0x17b9   :  { %3380 = vst.msk [vmem:[#allocation2 + $0x20] sm:$0xff] %vm206_vm1, %v3374_v29 }
0x17c5   :  { %v3496_v33 = vpop.f32.mrf.mxu0 }
0x17c6   :  { %v3497_v48 = vadd.f32 %v3772_v32, %v3496_v33 }
0x17c7   :  { %v4339_v27 = vpop.f32.mrf.mxu0 }
0x17c8   :  { %4530 = vtanh.f32 %v3497_v48 }
0x17d5   :  { %v4531_v1 = vpop.eup %4530 }
0x17d6   :  { %4349 = vmatmul.mubr.msk.f32.vlgmr.msra.gmra.mxu0 %vm206_vm1, %v4531_v1 }
0x1896   :  { %v3581_v62 = vpop.f32.mrf.mxu0 }
0x1897   :  { %v3582_v59 = vadd.f32 %v3774_v43, %v3581_v62 }
0x1898   :  { %v4350_v20 = vpop.f32.mrf.mxu0 }
0x1899   :  { %3585 = vst [vmem:[#allocation3] sm:$0x3] %v3582_v59 }
0x189a   :  { %4561 = shalt.err (!%p4558_p4)
}
0x189b   :  { %3595 = dma.vmem_to_hbm [thread:$0]  %s3593_s25, 32, %s5792_s22, [#allocation4]  }
0x189c   :  { %4570 = dma.done.wait [#allocation4], 32  }
0x189d   :  { %4571 = vsyncadd [#allocation4], 4294967264 }
0x189e   :  { %3599 = vsyncpa [#allocation4], 1 }

</bundles_post_ra>
